<compile_context>
chip_gen: v7x
topology: tpu7x:2x2x1
jax: 0.10.0
libtpu: 0.0.40
codegen_flags: <defaults>
</compile_context>

<pallas_src>
import functools

import jax
import jax.numpy as jnp
from jax.experimental import pallas as pl
from jax.experimental.pallas import tpu as pltpu


# ----------------------------------------------------------------------------
# Host-side helpers
# ----------------------------------------------------------------------------
def _spatial_tap_masks(H, W, dil):
    """(9, H*W) f32 {0,1}: tap (kh, kw) is valid where the shifted pixel is in-bounds."""
    h_idx = jnp.arange(H, dtype=jnp.int32).reshape(H, 1)
    w_idx = jnp.arange(W, dtype=jnp.int32).reshape(1, W)
    masks = []
    for kh in range(3):
        dh = (kh - 1) * dil
        for kw in range(3):
            dw = (kw - 1) * dil
            valid = ((h_idx + dh >= 0) & (h_idx + dh < H) &
                     (w_idx + dw >= 0) & (w_idx + dw < W))
            masks.append(valid.astype(jnp.float32).reshape(1, H * W))
    return jnp.concatenate(masks, axis=0)                       # (9, H*W)


def _fold_bn(gamma, beta, running_mean, running_var, eps=1e-5):
    scale = gamma / jnp.sqrt(running_var + eps)
    shift = beta - running_mean * scale
    return scale, shift


# ----------------------------------------------------------------------------
# Conv3d (k=3, 'same', dilation) + per-channel affine (+ residual) (+ ReLU)
# ----------------------------------------------------------------------------
def _make_conv_kernel(H, W, D, Cin, Cout, dil, relu, has_residual):
    HW = H * W

    def kernel(*refs):
        if has_residual:
            (xlo_ref, xmid_ref, xhi_ref, w_ref, scale_ref, shift_ref,
             mask_ref, res_ref, o_ref) = refs
        else:
            (xlo_ref, xmid_ref, xhi_ref, w_ref, scale_ref, shift_ref,
             mask_ref, o_ref) = refs

        d = pl.program_id(1)
        # Scalar depth-validity masks implement 'same' zero padding in depth
        # (the halo slabs are fetched with a clamped index and zeroed here).
        m_lo = jnp.where(d >= dil, 1.0, 0.0).astype(jnp.float32)
        m_hi = jnp.where(d + dil < D, 1.0, 0.0).astype(jnp.float32)

        slab_lo = xlo_ref[...].reshape(Cin, HW).astype(jnp.float32) * m_lo
        slab_md = xmid_ref[...].reshape(Cin, HW).astype(jnp.float32)
        slab_hi = xhi_ref[...].reshape(Cin, HW).astype(jnp.float32) * m_hi

        # Spatial boundary masks (hoisted: reused for all three depth slabs).
        mrows = [mask_ref[pl.ds(t, 1), :] for t in range(9)]     # each (1, HW)

        # im2col: 27 shifted+masked taps, each (Cin, HW) -> (27*Cin, HW).
        taps = []
        for slab in (slab_lo, slab_md, slab_hi):
            for kh in range(3):
                dh = (kh - 1) * dil
                for kw in range(3):
                    dw = (kw - 1) * dil
                    off = dh * W + dw
                    if off == 0:
                        taps.append(slab)                        # center tap
                    else:
                        t = pltpu.roll(slab, (-off) % HW, axis=1)
                        taps.append(t * mrows[kh * 3 + kw])
        xcol = jnp.concatenate(taps, axis=0).astype(jnp.bfloat16)  # (27*Cin, HW)

        # Single big MXU contraction, lane-dense f32 accumulator (Cout, HW).
        acc = jnp.dot(w_ref[...], xcol, preferred_element_type=jnp.float32)

        out = acc * scale_ref[...] + shift_ref[...]              # folded BN / bias
        if has_residual:
            out = out + res_ref[...].reshape(Cout, HW).astype(jnp.float32)
        if relu:
            out = jnp.maximum(out, 0.0)
        o_ref[...] = out.reshape(1, 1, Cout, HW).astype(o_ref.dtype)

    return kernel


def conv3d_bn_act(x, w_pt, scale, shift, *, H, W, dilation, relu,
                  residual=None, out_dtype=jnp.bfloat16):
    """3x3x3 'same' conv (given dilation) + channel affine (+residual) (+ReLU).

    x:        [B, D, Cin, H*W]        (f32 or bf16)
    w_pt:     [Cout, Cin, 3, 3, 3]    (PyTorch Conv3d weight layout)
    scale/shift: [Cout]               (folded BN, or 1/bias)
    residual: optional [B, D, Cout, H*W] added before the ReLU.
    returns   [B, D, Cout, H*W] in out_dtype.
    """
    B, D, Cin, HW = x.shape
    assert HW == H * W
    Cout = w_pt.shape[0]
    K = 27 * Cin

    # Weight columns ordered (kd, kh, kw, cin) to match the in-kernel im2col.
    w_col = jnp.transpose(w_pt, (0, 2, 3, 4, 1)).reshape(Cout, K).astype(jnp.bfloat16)
    scale2 = scale.reshape(Cout, 1).astype(jnp.float32)
    shift2 = shift.reshape(Cout, 1).astype(jnp.float32)
    masks = _spatial_tap_masks(H, W, dilation)

    def x_spec(off):
        def imap(b, d):
            dd = jnp.minimum(jnp.maximum(d + off, 0), D - 1)     # clamped halo
            return (b, dd, 0, 0)
        return pl.BlockSpec((1, 1, Cin, HW), imap)

    in_specs = [
        x_spec(-dilation), x_spec(0), x_spec(dilation),
        pl.BlockSpec((Cout, K), lambda b, d: (0, 0)),
        pl.BlockSpec((Cout, 1), lambda b, d: (0, 0)),
        pl.BlockSpec((Cout, 1), lambda b, d: (0, 0)),
        pl.BlockSpec((9, HW), lambda b, d: (0, 0)),
    ]
    args = [x, x, x, w_col, scale2, shift2, masks]
    if residual is not None:
        in_specs.append(pl.BlockSpec((1, 1, Cout, HW), lambda b, d: (b, d, 0, 0)))
        args.append(residual)

    kernel = _make_conv_kernel(H, W, D, Cin, Cout, dilation, relu,
                               residual is not None)
    return pl.pallas_call(
        kernel,
        out_shape=jax.ShapeDtypeStruct((B, D, Cout, HW), out_dtype),
        grid=(B, D),
        in_specs=in_specs,
        out_specs=pl.BlockSpec((1, 1, Cout, HW), lambda b, d: (b, d, 0, 0)),
        compiler_params=pltpu.CompilerParams(
            dimension_semantics=("parallel", "parallel")),
    )(*args)


# ----------------------------------------------------------------------------
# SegmentationHead forward
# ----------------------------------------------------------------------------
def segmentation_head_forward(x, params, dilations):
    """x: [B, D, H, W]  ->  [B, nbr_classes, D, H, W] (PyTorch NCDHW layout)."""
    B, D, H, W = x.shape
    HW = H * W
    planes = params["conv0_w"].shape[0]
    nbr_classes = params["cls_w"].shape[0]

    # Dim expansion x_in[:, None] -> channel dim of 1; spatial flattened (lane axis).
    x5 = x.reshape(B, D, 1, HW).astype(jnp.float32)

    # conv0 + bias + relu
    x0 = conv3d_bn_act(x5, params["conv0_w"],
                       jnp.ones((planes,), jnp.float32), params["conv0_b"],
                       H=H, W=W, dilation=1, relu=True)

    # ASPP branches: bn2(conv2(relu(bn1(conv1(x0))))). The residual
    # x0 + sum_i branch_i and the final ReLU are fused into the epilogue of
    # each branch's second conv (chained running sum).
    prev = x0
    n = len(dilations)
    for i, dil in enumerate(dilations):
        s1, b1 = _fold_bn(params["bn1_g"][i], params["bn1_b"][i],
                          params["bn1_rm"][i], params["bn1_rv"][i])
        a = conv3d_bn_act(x0, params["conv1_w"][i], s1, b1,
                          H=H, W=W, dilation=dil, relu=True)
        s2, b2 = _fold_bn(params["bn2_g"][i], params["bn2_b"][i],
                          params["bn2_rm"][i], params["bn2_rv"][i])
        prev = conv3d_bn_act(a, params["conv2_w"][i], s2, b2,
                             H=H, W=W, dilation=dil,
                             relu=(i == n - 1), residual=prev)
    # prev == relu(x0 + sum_i branch_i)

    # classifier conv (+ bias), f32 output
    out = conv3d_bn_act(prev, params["cls_w"],
                        jnp.ones((nbr_classes,), jnp.float32), params["cls_b"],
                        H=H, W=W, dilation=1, relu=False,
                        out_dtype=jnp.float32)                   # [B, D, C, HW]
    return jnp.transpose(out.reshape(B, D, nbr_classes, H, W), (0, 2, 1, 3, 4))


def init_params(key, inplanes, planes, nbr_classes, dilations):
    n = len(dilations)
    keys = jax.random.split(key, 4 + 8 * n)
    ki = iter(range(len(keys)))
    nrm = lambda shp, s=0.05: jax.random.normal(keys[next(ki)], shp, jnp.float32) * s
    p = {
        "conv0_w": nrm((planes, inplanes, 3, 3, 3)),     # PyTorch [Cout,Cin,kD,kH,kW]
        "conv0_b": nrm((planes,)),
        "cls_w": nrm((nbr_classes, planes, 3, 3, 3)),
        "cls_b": nrm((nbr_classes,)),
        "conv1_w": [], "conv2_w": [],
        "bn1_g": [], "bn1_b": [], "bn1_rm": [], "bn1_rv": [],
        "bn2_g": [], "bn2_b": [], "bn2_rm": [], "bn2_rv": [],
    }
    for _ in dilations:
        p["conv1_w"].append(nrm((planes, planes, 3, 3, 3)))
        p["conv2_w"].append(nrm((planes, planes, 3, 3, 3)))
        p["bn1_g"].append(1.0 + nrm((planes,)))
        p["bn1_b"].append(nrm((planes,)))
        p["bn1_rm"].append(jnp.zeros((planes,), jnp.float32))
        p["bn1_rv"].append(jnp.ones((planes,), jnp.float32))
        p["bn2_g"].append(1.0 + nrm((planes,)))
        p["bn2_b"].append(nrm((planes,)))
        p["bn2_rm"].append(jnp.zeros((planes,), jnp.float32))
        p["bn2_rv"].append(jnp.ones((planes,), jnp.float32))
    return p


if __name__ == "__main__":
    B, D, H, W = 2, 8, 16, 16
    inplanes, planes, nbr_classes = 1, 8, 4
    dilations = [1, 2]

    key = jax.random.PRNGKey(0)
    kx, kp = jax.random.split(key)
    x = jax.random.normal(kx, (B, D, H, W), jnp.float32)
    params = init_params(kp, inplanes, planes, nbr_classes, dilations)

    fwd = jax.jit(functools.partial(segmentation_head_forward,
                                    dilations=dilations))
    out = jax.block_until_ready(fwd(x, params))
    assert out.shape == (B, nbr_classes, D, H, W), out.shape
    print("KERNEL_OK")
</pallas_src>

<mosaic_0001>
module attributes {stable_mosaic.version = 11 : i64} {
  func.func @kernel(%arg0: i32, %arg1: i32, %arg2: memref<1x1x8x256xbf16, #tpu.memory_space<vmem>>, %arg3: memref<1x1x8x256xbf16, #tpu.memory_space<vmem>>, %arg4: memref<1x1x8x256xbf16, #tpu.memory_space<vmem>>, %arg5: memref<8x216xbf16, #tpu.memory_space<vmem>>, %arg6: memref<8x1xf32, #tpu.memory_space<vmem>>, %arg7: memref<8x1xf32, #tpu.memory_space<vmem>>, %arg8: memref<9x256xf32, #tpu.memory_space<vmem>>, %arg9: memref<1x1x8x256xbf16, #tpu.memory_space<vmem>>) attributes {dimension_semantics = [#tpu.dimension_semantics<parallel>, #tpu.dimension_semantics<parallel>], iteration_bounds = array<i64: 2, 8>, scalar_prefetch = 0 : i64, scratch_operands = 0 : i64, tpu.core_type = #tpu.core_type<tc>, window_params = [{transform_indices = @transform_0, window_bounds = array<i64: 1, 1, 8, 256>}, {transform_indices = @transform_1, window_bounds = array<i64: 1, 1, 8, 256>}, {transform_indices = @transform_2, window_bounds = array<i64: 1, 1, 8, 256>}, {pipeline_mode = #tpu.pipeline_mode<synchronous>, transform_indices = @transform_3, window_bounds = array<i64: 8, 216>}, {pipeline_mode = #tpu.pipeline_mode<synchronous>, transform_indices = @transform_4, window_bounds = array<i64: 8, 1>}, {pipeline_mode = #tpu.pipeline_mode<synchronous>, transform_indices = @transform_5, window_bounds = array<i64: 8, 1>}, {pipeline_mode = #tpu.pipeline_mode<synchronous>, transform_indices = @transform_6, window_bounds = array<i64: 9, 256>}, {transform_indices = @transform_7, window_bounds = array<i64: 1, 1, 8, 256>}]} {
    %c1_i32 = arith.constant 1 : i32
    %0 = arith.cmpi sge, %arg1, %c1_i32 : i32
    %cst = arith.constant 1.000000e+00 : f32
    %cst_0 = arith.constant 0.000000e+00 : f32
    %1 = arith.select %0, %cst, %cst_0 : f32
    %c1_i32_1 = arith.constant 1 : i32
    %2 = arith.addi %arg1, %c1_i32_1 : i32
    %c8_i32 = arith.constant 8 : i32
    %3 = arith.cmpi slt, %2, %c8_i32 : i32
    %cst_2 = arith.constant 1.000000e+00 : f32
    %cst_3 = arith.constant 0.000000e+00 : f32
    %4 = arith.select %3, %cst_2, %cst_3 : f32
    %c0 = arith.constant 0 : index
    %c0_4 = arith.constant 0 : index
    %c0_5 = arith.constant 0 : index
    %c0_6 = arith.constant 0 : index
    %5 = vector.load %arg2[%c0, %c0_4, %c0_5, %c0_6] : memref<1x1x8x256xbf16, #tpu.memory_space<vmem>>, vector<1x1x8x256xbf16>
    %6 = vector.shape_cast %5 : vector<1x1x8x256xbf16> to vector<8x256xbf16>
    %7 = arith.extf %6 : vector<8x256xbf16> to vector<8x256xf32>
    %8 = vector.broadcast %1 : f32 to vector<8x256xf32>
    %9 = arith.mulf %7, %8 : vector<8x256xf32>
    %c0_7 = arith.constant 0 : index
    %c0_8 = arith.constant 0 : index
    %c0_9 = arith.constant 0 : index
    %c0_10 = arith.constant 0 : index
    %10 = vector.load %arg3[%c0_7, %c0_8, %c0_9, %c0_10] : memref<1x1x8x256xbf16, #tpu.memory_space<vmem>>, vector<1x1x8x256xbf16>
    %11 = vector.shape_cast %10 : vector<1x1x8x256xbf16> to vector<8x256xbf16>
    %12 = arith.extf %11 : vector<8x256xbf16> to vector<8x256xf32>
    %c0_11 = arith.constant 0 : index
    %c0_12 = arith.constant 0 : index
    %c0_13 = arith.constant 0 : index
    %c0_14 = arith.constant 0 : index
    %13 = vector.load %arg4[%c0_11, %c0_12, %c0_13, %c0_14] : memref<1x1x8x256xbf16, #tpu.memory_space<vmem>>, vector<1x1x8x256xbf16>
    %14 = vector.shape_cast %13 : vector<1x1x8x256xbf16> to vector<8x256xbf16>
    %15 = arith.extf %14 : vector<8x256xbf16> to vector<8x256xf32>
    %16 = vector.broadcast %4 : f32 to vector<8x256xf32>
    %17 = arith.mulf %15, %16 : vector<8x256xf32>
    %c0_15 = arith.constant 0 : index
    %c0_16 = arith.constant 0 : index
    %18 = vector.load %arg8[%c0_15, %c0_16] : memref<9x256xf32, #tpu.memory_space<vmem>>, vector<1x256xf32>
    %c1 = arith.constant 1 : index
    %c0_17 = arith.constant 0 : index
    %19 = vector.load %arg8[%c1, %c0_17] : memref<9x256xf32, #tpu.memory_space<vmem>>, vector<1x256xf32>
    %c2 = arith.constant 2 : index
    %c0_18 = arith.constant 0 : index
    %20 = vector.load %arg8[%c2, %c0_18] : memref<9x256xf32, #tpu.memory_space<vmem>>, vector<1x256xf32>
    %c3 = arith.constant 3 : index
    %c0_19 = arith.constant 0 : index
    %21 = vector.load %arg8[%c3, %c0_19] : memref<9x256xf32, #tpu.memory_space<vmem>>, vector<1x256xf32>
    %c5 = arith.constant 5 : index
    %c0_20 = arith.constant 0 : index
    %22 = vector.load %arg8[%c5, %c0_20] : memref<9x256xf32, #tpu.memory_space<vmem>>, vector<1x256xf32>
    %c6 = arith.constant 6 : index
    %c0_21 = arith.constant 0 : index
    %23 = vector.load %arg8[%c6, %c0_21] : memref<9x256xf32, #tpu.memory_space<vmem>>, vector<1x256xf32>
    %c7 = arith.constant 7 : index
    %c0_22 = arith.constant 0 : index
    %24 = vector.load %arg8[%c7, %c0_22] : memref<9x256xf32, #tpu.memory_space<vmem>>, vector<1x256xf32>
    %c8 = arith.constant 8 : index
    %c0_23 = arith.constant 0 : index
    %25 = vector.load %arg8[%c8, %c0_23] : memref<9x256xf32, #tpu.memory_space<vmem>>, vector<1x256xf32>
    %c17_i32 = arith.constant 17 : i32
    %26 = tpu.dynamic_rotate %9 by %c17_i32 dim 1 : vector<8x256xf32>, i32 -> vector<8x256xf32>
    %27 = vector.broadcast %18 : vector<1x256xf32> to vector<8x256xf32>
    %28 = arith.mulf %26, %27 : vector<8x256xf32>
    %c16_i32 = arith.constant 16 : i32
    %29 = tpu.dynamic_rotate %9 by %c16_i32 dim 1 : vector<8x256xf32>, i32 -> vector<8x256xf32>
    %30 = vector.broadcast %19 : vector<1x256xf32> to vector<8x256xf32>
    %31 = arith.mulf %29, %30 : vector<8x256xf32>
    %c15_i32 = arith.constant 15 : i32
    %32 = tpu.dynamic_rotate %9 by %c15_i32 dim 1 : vector<8x256xf32>, i32 -> vector<8x256xf32>
    %33 = vector.broadcast %20 : vector<1x256xf32> to vector<8x256xf32>
    %34 = arith.mulf %32, %33 : vector<8x256xf32>
    %c1_i32_24 = arith.constant 1 : i32
    %35 = tpu.dynamic_rotate %9 by %c1_i32_24 dim 1 : vector<8x256xf32>, i32 -> vector<8x256xf32>
    %36 = vector.broadcast %21 : vector<1x256xf32> to vector<8x256xf32>
    %37 = arith.mulf %35, %36 : vector<8x256xf32>
    %c255_i32 = arith.constant 255 : i32
    %38 = tpu.dynamic_rotate %9 by %c255_i32 dim 1 : vector<8x256xf32>, i32 -> vector<8x256xf32>
    %39 = vector.broadcast %22 : vector<1x256xf32> to vector<8x256xf32>
    %40 = arith.mulf %38, %39 : vector<8x256xf32>
    %c241_i32 = arith.constant 241 : i32
    %41 = tpu.dynamic_rotate %9 by %c241_i32 dim 1 : vector<8x256xf32>, i32 -> vector<8x256xf32>
    %42 = vector.broadcast %23 : vector<1x256xf32> to vector<8x256xf32>
    %43 = arith.mulf %41, %42 : vector<8x256xf32>
    %c240_i32 = arith.constant 240 : i32
    %44 = tpu.dynamic_rotate %9 by %c240_i32 dim 1 : vector<8x256xf32>, i32 -> vector<8x256xf32>
    %45 = vector.broadcast %24 : vector<1x256xf32> to vector<8x256xf32>
    %46 = arith.mulf %44, %45 : vector<8x256xf32>
    %c239_i32 = arith.constant 239 : i32
    %47 = tpu.dynamic_rotate %9 by %c239_i32 dim 1 : vector<8x256xf32>, i32 -> vector<8x256xf32>
    %48 = vector.broadcast %25 : vector<1x256xf32> to vector<8x256xf32>
    %49 = arith.mulf %47, %48 : vector<8x256xf32>
    %c17_i32_25 = arith.constant 17 : i32
    %50 = tpu.dynamic_rotate %12 by %c17_i32_25 dim 1 : vector<8x256xf32>, i32 -> vector<8x256xf32>
    %51 = vector.broadcast %18 : vector<1x256xf32> to vector<8x256xf32>
    %52 = arith.mulf %50, %51 : vector<8x256xf32>
    %c16_i32_26 = arith.constant 16 : i32
    %53 = tpu.dynamic_rotate %12 by %c16_i32_26 dim 1 : vector<8x256xf32>, i32 -> vector<8x256xf32>
    %54 = vector.broadcast %19 : vector<1x256xf32> to vector<8x256xf32>
    %55 = arith.mulf %53, %54 : vector<8x256xf32>
    %c15_i32_27 = arith.constant 15 : i32
    %56 = tpu.dynamic_rotate %12 by %c15_i32_27 dim 1 : vector<8x256xf32>, i32 -> vector<8x256xf32>
    %57 = vector.broadcast %20 : vector<1x256xf32> to vector<8x256xf32>
    %58 = arith.mulf %56, %57 : vector<8x256xf32>
    %c1_i32_28 = arith.constant 1 : i32
    %59 = tpu.dynamic_rotate %12 by %c1_i32_28 dim 1 : vector<8x256xf32>, i32 -> vector<8x256xf32>
    %60 = vector.broadcast %21 : vector<1x256xf32> to vector<8x256xf32>
    %61 = arith.mulf %59, %60 : vector<8x256xf32>
    %c255_i32_29 = arith.constant 255 : i32
    %62 = tpu.dynamic_rotate %12 by %c255_i32_29 dim 1 : vector<8x256xf32>, i32 -> vector<8x256xf32>
    %63 = vector.broadcast %22 : vector<1x256xf32> to vector<8x256xf32>
    %64 = arith.mulf %62, %63 : vector<8x256xf32>
    %c241_i32_30 = arith.constant 241 : i32
    %65 = tpu.dynamic_rotate %12 by %c241_i32_30 dim 1 : vector<8x256xf32>, i32 -> vector<8x256xf32>
    %66 = vector.broadcast %23 : vector<1x256xf32> to vector<8x256xf32>
    %67 = arith.mulf %65, %66 : vector<8x256xf32>
    %c240_i32_31 = arith.constant 240 : i32
    %68 = tpu.dynamic_rotate %12 by %c240_i32_31 dim 1 : vector<8x256xf32>, i32 -> vector<8x256xf32>
    %69 = vector.broadcast %24 : vector<1x256xf32> to vector<8x256xf32>
    %70 = arith.mulf %68, %69 : vector<8x256xf32>
    %c239_i32_32 = arith.constant 239 : i32
    %71 = tpu.dynamic_rotate %12 by %c239_i32_32 dim 1 : vector<8x256xf32>, i32 -> vector<8x256xf32>
    %72 = vector.broadcast %25 : vector<1x256xf32> to vector<8x256xf32>
    %73 = arith.mulf %71, %72 : vector<8x256xf32>
    %c17_i32_33 = arith.constant 17 : i32
    %74 = tpu.dynamic_rotate %17 by %c17_i32_33 dim 1 : vector<8x256xf32>, i32 -> vector<8x256xf32>
    %75 = vector.broadcast %18 : vector<1x256xf32> to vector<8x256xf32>
    %76 = arith.mulf %74, %75 : vector<8x256xf32>
    %c16_i32_34 = arith.constant 16 : i32
    %77 = tpu.dynamic_rotate %17 by %c16_i32_34 dim 1 : vector<8x256xf32>, i32 -> vector<8x256xf32>
    %78 = vector.broadcast %19 : vector<1x256xf32> to vector<8x256xf32>
    %79 = arith.mulf %77, %78 : vector<8x256xf32>
    %c15_i32_35 = arith.constant 15 : i32
    %80 = tpu.dynamic_rotate %17 by %c15_i32_35 dim 1 : vector<8x256xf32>, i32 -> vector<8x256xf32>
    %81 = vector.broadcast %20 : vector<1x256xf32> to vector<8x256xf32>
    %82 = arith.mulf %80, %81 : vector<8x256xf32>
    %c1_i32_36 = arith.constant 1 : i32
    %83 = tpu.dynamic_rotate %17 by %c1_i32_36 dim 1 : vector<8x256xf32>, i32 -> vector<8x256xf32>
    %84 = vector.broadcast %21 : vector<1x256xf32> to vector<8x256xf32>
    %85 = arith.mulf %83, %84 : vector<8x256xf32>
    %c255_i32_37 = arith.constant 255 : i32
    %86 = tpu.dynamic_rotate %17 by %c255_i32_37 dim 1 : vector<8x256xf32>, i32 -> vector<8x256xf32>
    %87 = vector.broadcast %22 : vector<1x256xf32> to vector<8x256xf32>
    %88 = arith.mulf %86, %87 : vector<8x256xf32>
    %c241_i32_38 = arith.constant 241 : i32
    %89 = tpu.dynamic_rotate %17 by %c241_i32_38 dim 1 : vector<8x256xf32>, i32 -> vector<8x256xf32>
    %90 = vector.broadcast %23 : vector<1x256xf32> to vector<8x256xf32>
    %91 = arith.mulf %89, %90 : vector<8x256xf32>
    %c240_i32_39 = arith.constant 240 : i32
    %92 = tpu.dynamic_rotate %17 by %c240_i32_39 dim 1 : vector<8x256xf32>, i32 -> vector<8x256xf32>
    %93 = vector.broadcast %24 : vector<1x256xf32> to vector<8x256xf32>
    %94 = arith.mulf %92, %93 : vector<8x256xf32>
    %c239_i32_40 = arith.constant 239 : i32
    %95 = tpu.dynamic_rotate %17 by %c239_i32_40 dim 1 : vector<8x256xf32>, i32 -> vector<8x256xf32>
    %96 = vector.broadcast %25 : vector<1x256xf32> to vector<8x256xf32>
    %97 = arith.mulf %95, %96 : vector<8x256xf32>
    %98 = tpu.concatenate %28, %31, %34, %37, %9, %40, %43, %46, %49, %52, %55, %58, %61, %12, %64, %67 in 0 : vector<8x256xf32>, vector<8x256xf32>, vector<8x256xf32>, vector<8x256xf32>, vector<8x256xf32>, vector<8x256xf32>, vector<8x256xf32>, vector<8x256xf32>, vector<8x256xf32>, vector<8x256xf32>, vector<8x256xf32>, vector<8x256xf32>, vector<8x256xf32>, vector<8x256xf32>, vector<8x256xf32>, vector<8x256xf32> -> vector<128x256xf32>
    %99 = tpu.concatenate %70, %73, %76, %79, %82, %85, %17, %88, %91, %94, %97 in 0 : vector<8x256xf32>, vector<8x256xf32>, vector<8x256xf32>, vector<8x256xf32>, vector<8x256xf32>, vector<8x256xf32>, vector<8x256xf32>, vector<8x256xf32>, vector<8x256xf32>, vector<8x256xf32>, vector<8x256xf32> -> vector<88x256xf32>
    %100 = tpu.concatenate %98, %99 in 0 : vector<128x256xf32>, vector<88x256xf32> -> vector<216x256xf32>
    %101 = arith.truncf %100 : vector<216x256xf32> to vector<216x256xbf16>
    %c0_41 = arith.constant 0 : index
    %c0_42 = arith.constant 0 : index
    %102 = vector.load %arg5[%c0_41, %c0_42] : memref<8x216xbf16, #tpu.memory_space<vmem>>, vector<8x216xbf16>
    %cst_43 = arith.constant dense<0.000000e+00> : vector<8x256xf32>
    %103 = tpu.matmul %102, %101, %cst_43 {dimension_numbers = #tpu.dot_dimension_numbers<[1], [0], [0], [1], [0, 0, 1, 1], [], []>} : vector<8x216xbf16>, vector<216x256xbf16>, vector<8x256xf32> -> vector<8x256xf32>
    %c0_44 = arith.constant 0 : index
    %c0_45 = arith.constant 0 : index
    %104 = vector.load %arg6[%c0_44, %c0_45] : memref<8x1xf32, #tpu.memory_space<vmem>>, vector<8x1xf32>
    %105 = vector.broadcast %104 : vector<8x1xf32> to vector<8x256xf32>
    %106 = arith.mulf %103, %105 : vector<8x256xf32>
    %c0_46 = arith.constant 0 : index
    %c0_47 = arith.constant 0 : index
    %107 = vector.load %arg7[%c0_46, %c0_47] : memref<8x1xf32, #tpu.memory_space<vmem>>, vector<8x1xf32>
    %108 = vector.broadcast %107 : vector<8x1xf32> to vector<8x256xf32>
    %109 = arith.addf %106, %108 : vector<8x256xf32>
    %cst_48 = arith.constant 0.000000e+00 : f32
    %110 = vector.broadcast %cst_48 : f32 to vector<8x256xf32>
    %111 = arith.maximumf %109, %110 : vector<8x256xf32>
    %112 = vector.shape_cast %111 : vector<8x256xf32> to vector<1x1x8x256xf32>
    %113 = arith.truncf %112 : vector<1x1x8x256xf32> to vector<1x1x8x256xbf16>
    %c0_49 = arith.constant 0 : index
    %c0_50 = arith.constant 0 : index
    %c0_51 = arith.constant 0 : index
    %c0_52 = arith.constant 0 : index
    %114 = vector.load %arg9[%c0_49, %c0_50, %c0_51, %c0_52] : memref<1x1x8x256xbf16, #tpu.memory_space<vmem>>, vector<1x1x8x256xbf16>
    tpu.vector_store %arg9[%c0_49, %c0_50, %c0_51, %c0_52], %113 {strides = array<i32>} : memref<1x1x8x256xbf16, #tpu.memory_space<vmem>>, vector<1x1x8x256xbf16>,
    return
  }
  func.func @transform_0(%arg0: i32, %arg1: i32) -> (i32, i32, i32, i32) {
    %c-1_i32 = arith.constant -1 : i32
    %0 = arith.addi %arg1, %c-1_i32 : i32
    %c0_i32 = arith.constant 0 : i32
    %1 = arith.maxsi %0, %c0_i32 : i32
    %c7_i32 = arith.constant 7 : i32
    %2 = arith.minsi %1, %c7_i32 : i32
    %c0_i32_0 = arith.constant 0 : i32
    %c0_i32_1 = arith.constant 0 : i32
    %c0_i32_2 = arith.constant 0 : i32
    return %arg0, %2, %c0_i32_0, %c0_i32_1 : i32, i32, i32, i32
  }
  func.func @transform_1(%arg0: i32, %arg1: i32) -> (i32, i32, i32, i32) {
    %c0_i32 = arith.constant 0 : i32
    %0 = arith.addi %arg1, %c0_i32 : i32
    %c0_i32_0 = arith.constant 0 : i32
    %1 = arith.maxsi %0, %c0_i32_0 : i32
    %c7_i32 = arith.constant 7 : i32
    %2 = arith.minsi %1, %c7_i32 : i32
    %c0_i32_1 = arith.constant 0 : i32
    %c0_i32_2 = arith.constant 0 : i32
    %c0_i32_3 = arith.constant 0 : i32
    return %arg0, %2, %c0_i32_1, %c0_i32_2 : i32, i32, i32, i32
  }
  func.func @transform_2(%arg0: i32, %arg1: i32) -> (i32, i32, i32, i32) {
    %c1_i32 = arith.constant 1 : i32
    %0 = arith.addi %arg1, %c1_i32 : i32
    %c0_i32 = arith.constant 0 : i32
    %1 = arith.maxsi %0, %c0_i32 : i32
    %c7_i32 = arith.constant 7 : i32
    %2 = arith.minsi %1, %c7_i32 : i32
    %c0_i32_0 = arith.constant 0 : i32
    %c0_i32_1 = arith.constant 0 : i32
    %c0_i32_2 = arith.constant 0 : i32
    return %arg0, %2, %c0_i32_0, %c0_i32_1 : i32, i32, i32, i32
  }
  func.func @transform_3(%arg0: i32, %arg1: i32) -> (i32, i32) {
    %c0_i32 = arith.constant 0 : i32
    %c0_i32_0 = arith.constant 0 : i32
    %c0_i32_1 = arith.constant 0 : i32
    return %c0_i32, %c0_i32_0 : i32, i32
  }
  func.func @transform_4(%arg0: i32, %arg1: i32) -> (i32, i32) {
    %c0_i32 = arith.constant 0 : i32
    %c0_i32_0 = arith.constant 0 : i32
    %c0_i32_1 = arith.constant 0 : i32
    return %c0_i32, %c0_i32_0 : i32, i32
  }
  func.func @transform_5(%arg0: i32, %arg1: i32) -> (i32, i32) {
    %c0_i32 = arith.constant 0 : i32
    %c0_i32_0 = arith.constant 0 : i32
    %c0_i32_1 = arith.constant 0 : i32
    return %c0_i32, %c0_i32_0 : i32, i32
  }
  func.func @transform_6(%arg0: i32, %arg1: i32) -> (i32, i32) {
    %c0_i32 = arith.constant 0 : i32
    %c0_i32_0 = arith.constant 0 : i32
    %c0_i32_1 = arith.constant 0 : i32
    return %c0_i32, %c0_i32_0 : i32, i32
  }
  func.func @transform_7(%arg0: i32, %arg1: i32) -> (i32, i32, i32, i32) {
    %c0_i32 = arith.constant 0 : i32
    %c0_i32_0 = arith.constant 0 : i32
    %c0_i32_1 = arith.constant 0 : i32
    return %arg0, %arg1, %c0_i32, %c0_i32_0 : i32, i32, i32, i32
  }
}

module attributes {stable_mosaic.version = 11 : i64} {
  func.func @kernel(%arg0: i32, %arg1: i32, %arg2: memref<1x1x1x256xf32, #tpu.memory_space<vmem>>, %arg3: memref<1x1x1x256xf32, #tpu.memory_space<vmem>>, %arg4: memref<1x1x1x256xf32, #tpu.memory_space<vmem>>, %arg5: memref<8x27xbf16, #tpu.memory_space<vmem>>, %arg6: memref<8x1xf32, #tpu.memory_space<vmem>>, %arg7: memref<8x1xf32, #tpu.memory_space<vmem>>, %arg8: memref<9x256xf32, #tpu.memory_space<vmem>>, %arg9: memref<1x1x8x256xbf16, #tpu.memory_space<vmem>>) attributes {dimension_semantics = [#tpu.dimension_semantics<parallel>, #tpu.dimension_semantics<parallel>], iteration_bounds = array<i64: 2, 8>, scalar_prefetch = 0 : i64, scratch_operands = 0 : i64, tpu.core_type = #tpu.core_type<tc>, window_params = [{transform_indices = @transform_0, window_bounds = array<i64: 1, 1, 1, 256>}, {transform_indices = @transform_1, window_bounds = array<i64: 1, 1, 1, 256>}, {transform_indices = @transform_2, window_bounds = array<i64: 1, 1, 1, 256>}, {pipeline_mode = #tpu.pipeline_mode<synchronous>, transform_indices = @transform_3, window_bounds = array<i64: 8, 27>}, {pipeline_mode = #tpu.pipeline_mode<synchronous>, transform_indices = @transform_4, window_bounds = array<i64: 8, 1>}, {pipeline_mode = #tpu.pipeline_mode<synchronous>, transform_indices = @transform_5, window_bounds = array<i64: 8, 1>}, {pipeline_mode = #tpu.pipeline_mode<synchronous>, transform_indices = @transform_6, window_bounds = array<i64: 9, 256>}, {transform_indices = @transform_7, window_bounds = array<i64: 1, 1, 8, 256>}]} {
    %c1_i32 = arith.constant 1 : i32
    %0 = arith.cmpi sge, %arg1, %c1_i32 : i32
    %cst = arith.constant 1.000000e+00 : f32
    %cst_0 = arith.constant 0.000000e+00 : f32
    %1 = arith.select %0, %cst, %cst_0 : f32
    %c1_i32_1 = arith.constant 1 : i32
    %2 = arith.addi %arg1, %c1_i32_1 : i32
    %c8_i32 = arith.constant 8 : i32
    %3 = arith.cmpi slt, %2, %c8_i32 : i32
    %cst_2 = arith.constant 1.000000e+00 : f32
    %cst_3 = arith.constant 0.000000e+00 : f32
    %4 = arith.select %3, %cst_2, %cst_3 : f32
    %c0 = arith.constant 0 : index
    %c0_4 = arith.constant 0 : index
    %c0_5 = arith.constant 0 : index
    %c0_6 = arith.constant 0 : index
    %5 = vector.load %arg2[%c0, %c0_4, %c0_5, %c0_6] : memref<1x1x1x256xf32, #tpu.memory_space<vmem>>, vector<1x1x1x256xf32>
    %6 = vector.shape_cast %5 : vector<1x1x1x256xf32> to vector<1x256xf32>
    %7 = vector.broadcast %1 : f32 to vector<1x256xf32>
    %8 = arith.mulf %6, %7 : vector<1x256xf32>
    %c0_7 = arith.constant 0 : index
    %c0_8 = arith.constant 0 : index
    %c0_9 = arith.constant 0 : index
    %c0_10 = arith.constant 0 : index
    %9 = vector.load %arg3[%c0_7, %c0_8, %c0_9, %c0_10] : memref<1x1x1x256xf32, #tpu.memory_space<vmem>>, vector<1x1x1x256xf32>
    %10 = vector.shape_cast %9 : vector<1x1x1x256xf32> to vector<1x256xf32>
    %c0_11 = arith.constant 0 : index
    %c0_12 = arith.constant 0 : index
    %c0_13 = arith.constant 0 : index
    %c0_14 = arith.constant 0 : index
    %11 = vector.load %arg4[%c0_11, %c0_12, %c0_13, %c0_14] : memref<1x1x1x256xf32, #tpu.memory_space<vmem>>, vector<1x1x1x256xf32>
    %12 = vector.shape_cast %11 : vector<1x1x1x256xf32> to vector<1x256xf32>
    %13 = vector.broadcast %4 : f32 to vector<1x256xf32>
    %14 = arith.mulf %12, %13 : vector<1x256xf32>
    %c0_15 = arith.constant 0 : index
    %c0_16 = arith.constant 0 : index
    %15 = vector.load %arg8[%c0_15, %c0_16] : memref<9x256xf32, #tpu.memory_space<vmem>>, vector<1x256xf32>
    %c1 = arith.constant 1 : index
    %c0_17 = arith.constant 0 : index
    %16 = vector.load %arg8[%c1, %c0_17] : memref<9x256xf32, #tpu.memory_space<vmem>>, vector<1x256xf32>
    %c2 = arith.constant 2 : index
    %c0_18 = arith.constant 0 : index
    %17 = vector.load %arg8[%c2, %c0_18] : memref<9x256xf32, #tpu.memory_space<vmem>>, vector<1x256xf32>
    %c3 = arith.constant 3 : index
    %c0_19 = arith.constant 0 : index
    %18 = vector.load %arg8[%c3, %c0_19] : memref<9x256xf32, #tpu.memory_space<vmem>>, vector<1x256xf32>
    %c5 = arith.constant 5 : index
    %c0_20 = arith.constant 0 : index
    %19 = vector.load %arg8[%c5, %c0_20] : memref<9x256xf32, #tpu.memory_space<vmem>>, vector<1x256xf32>
    %c6 = arith.constant 6 : index
    %c0_21 = arith.constant 0 : index
    %20 = vector.load %arg8[%c6, %c0_21] : memref<9x256xf32, #tpu.memory_space<vmem>>, vector<1x256xf32>
    %c7 = arith.constant 7 : index
    %c0_22 = arith.constant 0 : index
    %21 = vector.load %arg8[%c7, %c0_22] : memref<9x256xf32, #tpu.memory_space<vmem>>, vector<1x256xf32>
    %c8 = arith.constant 8 : index
    %c0_23 = arith.constant 0 : index
    %22 = vector.load %arg8[%c8, %c0_23] : memref<9x256xf32, #tpu.memory_space<vmem>>, vector<1x256xf32>
    %c17_i32 = arith.constant 17 : i32
    %23 = tpu.dynamic_rotate %8 by %c17_i32 dim 1 : vector<1x256xf32>, i32 -> vector<1x256xf32>
    %24 = arith.mulf %23, %15 : vector<1x256xf32>
    %c16_i32 = arith.constant 16 : i32
    %25 = tpu.dynamic_rotate %8 by %c16_i32 dim 1 : vector<1x256xf32>, i32 -> vector<1x256xf32>
    %26 = arith.mulf %25, %16 : vector<1x256xf32>
    %c15_i32 = arith.constant 15 : i32
    %27 = tpu.dynamic_rotate %8 by %c15_i32 dim 1 : vector<1x256xf32>, i32 -> vector<1x256xf32>
    %28 = arith.mulf %27, %17 : vector<1x256xf32>
    %c1_i32_24 = arith.constant 1 : i32
    %29 = tpu.dynamic_rotate %8 by %c1_i32_24 dim 1 : vector<1x256xf32>, i32 -> vector<1x256xf32>
    %30 = arith.mulf %29, %18 : vector<1x256xf32>
    %c255_i32 = arith.constant 255 : i32
    %31 = tpu.dynamic_rotate %8 by %c255_i32 dim 1 : vector<1x256xf32>, i32 -> vector<1x256xf32>
    %32 = arith.mulf %31, %19 : vector<1x256xf32>
    %c241_i32 = arith.constant 241 : i32
    %33 = tpu.dynamic_rotate %8 by %c241_i32 dim 1 : vector<1x256xf32>, i32 -> vector<1x256xf32>
    %34 = arith.mulf %33, %20 : vector<1x256xf32>
    %c240_i32 = arith.constant 240 : i32
    %35 = tpu.dynamic_rotate %8 by %c240_i32 dim 1 : vector<1x256xf32>, i32 -> vector<1x256xf32>
    %36 = arith.mulf %35, %21 : vector<1x256xf32>
    %c239_i32 = arith.constant 239 : i32
    %37 = tpu.dynamic_rotate %8 by %c239_i32 dim 1 : vector<1x256xf32>, i32 -> vector<1x256xf32>
    %38 = arith.mulf %37, %22 : vector<1x256xf32>
    %c17_i32_25 = arith.constant 17 : i32
    %39 = tpu.dynamic_rotate %10 by %c17_i32_25 dim 1 : vector<1x256xf32>, i32 -> vector<1x256xf32>
    %40 = arith.mulf %39, %15 : vector<1x256xf32>
    %c16_i32_26 = arith.constant 16 : i32
    %41 = tpu.dynamic_rotate %10 by %c16_i32_26 dim 1 : vector<1x256xf32>, i32 -> vector<1x256xf32>
    %42 = arith.mulf %41, %16 : vector<1x256xf32>
    %c15_i32_27 = arith.constant 15 : i32
    %43 = tpu.dynamic_rotate %10 by %c15_i32_27 dim 1 : vector<1x256xf32>, i32 -> vector<1x256xf32>
    %44 = arith.mulf %43, %17 : vector<1x256xf32>
    %c1_i32_28 = arith.constant 1 : i32
    %45 = tpu.dynamic_rotate %10 by %c1_i32_28 dim 1 : vector<1x256xf32>, i32 -> vector<1x256xf32>
    %46 = arith.mulf %45, %18 : vector<1x256xf32>
    %c255_i32_29 = arith.constant 255 : i32
    %47 = tpu.dynamic_rotate %10 by %c255_i32_29 dim 1 : vector<1x256xf32>, i32 -> vector<1x256xf32>
    %48 = arith.mulf %47, %19 : vector<1x256xf32>
    %c241_i32_30 = arith.constant 241 : i32
    %49 = tpu.dynamic_rotate %10 by %c241_i32_30 dim 1 : vector<1x256xf32>, i32 -> vector<1x256xf32>
    %50 = arith.mulf %49, %20 : vector<1x256xf32>
    %c240_i32_31 = arith.constant 240 : i32
    %51 = tpu.dynamic_rotate %10 by %c240_i32_31 dim 1 : vector<1x256xf32>, i32 -> vector<1x256xf32>
    %52 = arith.mulf %51, %21 : vector<1x256xf32>
    %c239_i32_32 = arith.constant 239 : i32
    %53 = tpu.dynamic_rotate %10 by %c239_i32_32 dim 1 : vector<1x256xf32>, i32 -> vector<1x256xf32>
    %54 = arith.mulf %53, %22 : vector<1x256xf32>
    %c17_i32_33 = arith.constant 17 : i32
    %55 = tpu.dynamic_rotate %14 by %c17_i32_33 dim 1 : vector<1x256xf32>, i32 -> vector<1x256xf32>
    %56 = arith.mulf %55, %15 : vector<1x256xf32>
    %c16_i32_34 = arith.constant 16 : i32
    %57 = tpu.dynamic_rotate %14 by %c16_i32_34 dim 1 : vector<1x256xf32>, i32 -> vector<1x256xf32>
    %58 = arith.mulf %57, %16 : vector<1x256xf32>
    %c15_i32_35 = arith.constant 15 : i32
    %59 = tpu.dynamic_rotate %14 by %c15_i32_35 dim 1 : vector<1x256xf32>, i32 -> vector<1x256xf32>
    %60 = arith.mulf %59, %17 : vector<1x256xf32>
    %c1_i32_36 = arith.constant 1 : i32
    %61 = tpu.dynamic_rotate %14 by %c1_i32_36 dim 1 : vector<1x256xf32>, i32 -> vector<1x256xf32>
    %62 = arith.mulf %61, %18 : vector<1x256xf32>
    %c255_i32_37 = arith.constant 255 : i32
    %63 = tpu.dynamic_rotate %14 by %c255_i32_37 dim 1 : vector<1x256xf32>, i32 -> vector<1x256xf32>
    %64 = arith.mulf %63, %19 : vector<1x256xf32>
    %c241_i32_38 = arith.constant 241 : i32
    %65 = tpu.dynamic_rotate %14 by %c241_i32_38 dim 1 : vector<1x256xf32>, i32 -> vector<1x256xf32>
    %66 = arith.mulf %65, %20 : vector<1x256xf32>
    %c240_i32_39 = arith.constant 240 : i32
    %67 = tpu.dynamic_rotate %14 by %c240_i32_39 dim 1 : vector<1x256xf32>, i32 -> vector<1x256xf32>
    %68 = arith.mulf %67, %21 : vector<1x256xf32>
    %c239_i32_40 = arith.constant 239 : i32
    %69 = tpu.dynamic_rotate %14 by %c239_i32_40 dim 1 : vector<1x256xf32>, i32 -> vector<1x256xf32>
    %70 = arith.mulf %69, %22 : vector<1x256xf32>
    %71 = tpu.concatenate %24, %26, %28, %30, %8, %32, %34, %36, %38, %40, %42, %44, %46, %10, %48, %50 in 0 : vector<1x256xf32>, vector<1x256xf32>, vector<1x256xf32>, vector<1x256xf32>, vector<1x256xf32>, vector<1x256xf32>, vector<1x256xf32>, vector<1x256xf32>, vector<1x256xf32>, vector<1x256xf32>, vector<1x256xf32>, vector<1x256xf32>, vector<1x256xf32>, vector<1x256xf32>, vector<1x256xf32>, vector<1x256xf32> -> vector<16x256xf32>
    %72 = tpu.concatenate %52, %54, %56, %58, %60, %62, %14, %64, %66, %68, %70 in 0 : vector<1x256xf32>, vector<1x256xf32>, vector<1x256xf32>, vector<1x256xf32>, vector<1x256xf32>, vector<1x256xf32>, vector<1x256xf32>, vector<1x256xf32>, vector<1x256xf32>, vector<1x256xf32>, vector<1x256xf32> -> vector<11x256xf32>
    %73 = tpu.concatenate %71, %72 in 0 : vector<16x256xf32>, vector<11x256xf32> -> vector<27x256xf32>
    %74 = arith.truncf %73 : vector<27x256xf32> to vector<27x256xbf16>
    %c0_41 = arith.constant 0 : index
    %c0_42 = arith.constant 0 : index
    %75 = vector.load %arg5[%c0_41, %c0_42] : memref<8x27xbf16, #tpu.memory_space<vmem>>, vector<8x27xbf16>
    %cst_43 = arith.constant dense<0.000000e+00> : vector<8x256xf32>
    %76 = tpu.matmul %75, %74, %cst_43 {dimension_numbers = #tpu.dot_dimension_numbers<[1], [0], [0], [1], [0, 0, 1, 1], [], []>} : vector<8x27xbf16>, vector<27x256xbf16>, vector<8x256xf32> -> vector<8x256xf32>
    %c0_44 = arith.constant 0 : index
    %c0_45 = arith.constant 0 : index
    %77 = vector.load %arg6[%c0_44, %c0_45] : memref<8x1xf32, #tpu.memory_space<vmem>>, vector<8x1xf32>
    %78 = vector.broadcast %77 : vector<8x1xf32> to vector<8x256xf32>
    %79 = arith.mulf %76, %78 : vector<8x256xf32>
    %c0_46 = arith.constant 0 : index
    %c0_47 = arith.constant 0 : index
    %80 = vector.load %arg7[%c0_46, %c0_47] : memref<8x1xf32, #tpu.memory_space<vmem>>, vector<8x1xf32>
    %81 = vector.broadcast %80 : vector<8x1xf32> to vector<8x256xf32>
    %82 = arith.addf %79, %81 : vector<8x256xf32>
    %cst_48 = arith.constant 0.000000e+00 : f32
    %83 = vector.broadcast %cst_48 : f32 to vector<8x256xf32>
    %84 = arith.maximumf %82, %83 : vector<8x256xf32>
    %85 = vector.shape_cast %84 : vector<8x256xf32> to vector<1x1x8x256xf32>
    %86 = arith.truncf %85 : vector<1x1x8x256xf32> to vector<1x1x8x256xbf16>
    %c0_49 = arith.constant 0 : index
    %c0_50 = arith.constant 0 : index
    %c0_51 = arith.constant 0 : index
    %c0_52 = arith.constant 0 : index
    %87 = vector.load %arg9[%c0_49, %c0_50, %c0_51, %c0_52] : memref<1x1x8x256xbf16, #tpu.memory_space<vmem>>, vector<1x1x8x256xbf16>
    tpu.vector_store %arg9[%c0_49, %c0_50, %c0_51, %c0_52], %86 {strides = array<i32>} : memref<1x1x8x256xbf16, #tpu.memory_space<vmem>>, vector<1x1x8x256xbf16>,
    return
  }
  func.func @transform_0(%arg0: i32, %arg1: i32) -> (i32, i32, i32, i32) {
    %c-1_i32 = arith.constant -1 : i32
    %0 = arith.addi %arg1, %c-1_i32 : i32
    %c0_i32 = arith.constant 0 : i32
    %1 = arith.maxsi %0, %c0_i32 : i32
    %c7_i32 = arith.constant 7 : i32
    %2 = arith.minsi %1, %c7_i32 : i32
    %c0_i32_0 = arith.constant 0 : i32
    %c0_i32_1 = arith.constant 0 : i32
    %c0_i32_2 = arith.constant 0 : i32
    return %arg0, %2, %c0_i32_0, %c0_i32_1 : i32, i32, i32, i32
  }
  func.func @transform_1(%arg0: i32, %arg1: i32) -> (i32, i32, i32, i32) {
    %c0_i32 = arith.constant 0 : i32
    %0 = arith.addi %arg1, %c0_i32 : i32
    %c0_i32_0 = arith.constant 0 : i32
    %1 = arith.maxsi %0, %c0_i32_0 : i32
    %c7_i32 = arith.constant 7 : i32
    %2 = arith.minsi %1, %c7_i32 : i32
    %c0_i32_1 = arith.constant 0 : i32
    %c0_i32_2 = arith.constant 0 : i32
    %c0_i32_3 = arith.constant 0 : i32
    return %arg0, %2, %c0_i32_1, %c0_i32_2 : i32, i32, i32, i32
  }
  func.func @transform_2(%arg0: i32, %arg1: i32) -> (i32, i32, i32, i32) {
    %c1_i32 = arith.constant 1 : i32
    %0 = arith.addi %arg1, %c1_i32 : i32
    %c0_i32 = arith.constant 0 : i32
    %1 = arith.maxsi %0, %c0_i32 : i32
    %c7_i32 = arith.constant 7 : i32
    %2 = arith.minsi %1, %c7_i32 : i32
    %c0_i32_0 = arith.constant 0 : i32
    %c0_i32_1 = arith.constant 0 : i32
    %c0_i32_2 = arith.constant 0 : i32
    return %arg0, %2, %c0_i32_0, %c0_i32_1 : i32, i32, i32, i32
  }
  func.func @transform_3(%arg0: i32, %arg1: i32) -> (i32, i32) {
    %c0_i32 = arith.constant 0 : i32
    %c0_i32_0 = arith.constant 0 : i32
    %c0_i32_1 = arith.constant 0 : i32
    return %c0_i32, %c0_i32_0 : i32, i32
  }
  func.func @transform_4(%arg0: i32, %arg1: i32) -> (i32, i32) {
    %c0_i32 = arith.constant 0 : i32
    %c0_i32_0 = arith.constant 0 : i32
    %c0_i32_1 = arith.constant 0 : i32
    return %c0_i32, %c0_i32_0 : i32, i32
  }
  func.func @transform_5(%arg0: i32, %arg1: i32) -> (i32, i32) {
    %c0_i32 = arith.constant 0 : i32
    %c0_i32_0 = arith.constant 0 : i32
    %c0_i32_1 = arith.constant 0 : i32
    return %c0_i32, %c0_i32_0 : i32, i32
  }
  func.func @transform_6(%arg0: i32, %arg1: i32) -> (i32, i32) {
    %c0_i32 = arith.constant 0 : i32
    %c0_i32_0 = arith.constant 0 : i32
    %c0_i32_1 = arith.constant 0 : i32
    return %c0_i32, %c0_i32_0 : i32, i32
  }
  func.func @transform_7(%arg0: i32, %arg1: i32) -> (i32, i32, i32, i32) {
    %c0_i32 = arith.constant 0 : i32
    %c0_i32_0 = arith.constant 0 : i32
    %c0_i32_1 = arith.constant 0 : i32
    return %arg0, %arg1, %c0_i32, %c0_i32_0 : i32, i32, i32, i32
  }
}

module attributes {stable_mosaic.version = 11 : i64} {
  func.func @kernel(%arg0: i32, %arg1: i32, %arg2: memref<1x1x8x256xbf16, #tpu.memory_space<vmem>>, %arg3: memref<1x1x8x256xbf16, #tpu.memory_space<vmem>>, %arg4: memref<1x1x8x256xbf16, #tpu.memory_space<vmem>>, %arg5: memref<8x216xbf16, #tpu.memory_space<vmem>>, %arg6: memref<8x1xf32, #tpu.memory_space<vmem>>, %arg7: memref<8x1xf32, #tpu.memory_space<vmem>>, %arg8: memref<9x256xf32, #tpu.memory_space<vmem>>, %arg9: memref<1x1x8x256xbf16, #tpu.memory_space<vmem>>) attributes {dimension_semantics = [#tpu.dimension_semantics<parallel>, #tpu.dimension_semantics<parallel>], iteration_bounds = array<i64: 2, 8>, scalar_prefetch = 0 : i64, scratch_operands = 0 : i64, tpu.core_type = #tpu.core_type<tc>, window_params = [{transform_indices = @transform_0, window_bounds = array<i64: 1, 1, 8, 256>}, {transform_indices = @transform_1, window_bounds = array<i64: 1, 1, 8, 256>}, {transform_indices = @transform_2, window_bounds = array<i64: 1, 1, 8, 256>}, {pipeline_mode = #tpu.pipeline_mode<synchronous>, transform_indices = @transform_3, window_bounds = array<i64: 8, 216>}, {pipeline_mode = #tpu.pipeline_mode<synchronous>, transform_indices = @transform_4, window_bounds = array<i64: 8, 1>}, {pipeline_mode = #tpu.pipeline_mode<synchronous>, transform_indices = @transform_5, window_bounds = array<i64: 8, 1>}, {pipeline_mode = #tpu.pipeline_mode<synchronous>, transform_indices = @transform_6, window_bounds = array<i64: 9, 256>}, {transform_indices = @transform_7, window_bounds = array<i64: 1, 1, 8, 256>}]} {
    %c2_i32 = arith.constant 2 : i32
    %0 = arith.cmpi sge, %arg1, %c2_i32 : i32
    %cst = arith.constant 1.000000e+00 : f32
    %cst_0 = arith.constant 0.000000e+00 : f32
    %1 = arith.select %0, %cst, %cst_0 : f32
    %c2_i32_1 = arith.constant 2 : i32
    %2 = arith.addi %arg1, %c2_i32_1 : i32
    %c8_i32 = arith.constant 8 : i32
    %3 = arith.cmpi slt, %2, %c8_i32 : i32
    %cst_2 = arith.constant 1.000000e+00 : f32
    %cst_3 = arith.constant 0.000000e+00 : f32
    %4 = arith.select %3, %cst_2, %cst_3 : f32
    %c0 = arith.constant 0 : index
    %c0_4 = arith.constant 0 : index
    %c0_5 = arith.constant 0 : index
    %c0_6 = arith.constant 0 : index
    %5 = vector.load %arg2[%c0, %c0_4, %c0_5, %c0_6] : memref<1x1x8x256xbf16, #tpu.memory_space<vmem>>, vector<1x1x8x256xbf16>
    %6 = vector.shape_cast %5 : vector<1x1x8x256xbf16> to vector<8x256xbf16>
    %7 = arith.extf %6 : vector<8x256xbf16> to vector<8x256xf32>
    %8 = vector.broadcast %1 : f32 to vector<8x256xf32>
    %9 = arith.mulf %7, %8 : vector<8x256xf32>
    %c0_7 = arith.constant 0 : index
    %c0_8 = arith.constant 0 : index
    %c0_9 = arith.constant 0 : index
    %c0_10 = arith.constant 0 : index
    %10 = vector.load %arg3[%c0_7, %c0_8, %c0_9, %c0_10] : memref<1x1x8x256xbf16, #tpu.memory_space<vmem>>, vector<1x1x8x256xbf16>
    %11 = vector.shape_cast %10 : vector<1x1x8x256xbf16> to vector<8x256xbf16>
    %12 = arith.extf %11 : vector<8x256xbf16> to vector<8x256xf32>
    %c0_11 = arith.constant 0 : index
    %c0_12 = arith.constant 0 : index
    %c0_13 = arith.constant 0 : index
    %c0_14 = arith.constant 0 : index
    %13 = vector.load %arg4[%c0_11, %c0_12, %c0_13, %c0_14] : memref<1x1x8x256xbf16, #tpu.memory_space<vmem>>, vector<1x1x8x256xbf16>
    %14 = vector.shape_cast %13 : vector<1x1x8x256xbf16> to vector<8x256xbf16>
    %15 = arith.extf %14 : vector<8x256xbf16> to vector<8x256xf32>
    %16 = vector.broadcast %4 : f32 to vector<8x256xf32>
    %17 = arith.mulf %15, %16 : vector<8x256xf32>
    %c0_15 = arith.constant 0 : index
    %c0_16 = arith.constant 0 : index
    %18 = vector.load %arg8[%c0_15, %c0_16] : memref<9x256xf32, #tpu.memory_space<vmem>>, vector<1x256xf32>
    %c1 = arith.constant 1 : index
    %c0_17 = arith.constant 0 : index
    %19 = vector.load %arg8[%c1, %c0_17] : memref<9x256xf32, #tpu.memory_space<vmem>>, vector<1x256xf32>
    %c2 = arith.constant 2 : index
    %c0_18 = arith.constant 0 : index
    %20 = vector.load %arg8[%c2, %c0_18] : memref<9x256xf32, #tpu.memory_space<vmem>>, vector<1x256xf32>
    %c3 = arith.constant 3 : index
    %c0_19 = arith.constant 0 : index
    %21 = vector.load %arg8[%c3, %c0_19] : memref<9x256xf32, #tpu.memory_space<vmem>>, vector<1x256xf32>
    %c5 = arith.constant 5 : index
    %c0_20 = arith.constant 0 : index
    %22 = vector.load %arg8[%c5, %c0_20] : memref<9x256xf32, #tpu.memory_space<vmem>>, vector<1x256xf32>
    %c6 = arith.constant 6 : index
    %c0_21 = arith.constant 0 : index
    %23 = vector.load %arg8[%c6, %c0_21] : memref<9x256xf32, #tpu.memory_space<vmem>>, vector<1x256xf32>
    %c7 = arith.constant 7 : index
    %c0_22 = arith.constant 0 : index
    %24 = vector.load %arg8[%c7, %c0_22] : memref<9x256xf32, #tpu.memory_space<vmem>>, vector<1x256xf32>
    %c8 = arith.constant 8 : index
    %c0_23 = arith.constant 0 : index
    %25 = vector.load %arg8[%c8, %c0_23] : memref<9x256xf32, #tpu.memory_space<vmem>>, vector<1x256xf32>
    %c34_i32 = arith.constant 34 : i32
    %26 = tpu.dynamic_rotate %9 by %c34_i32 dim 1 : vector<8x256xf32>, i32 -> vector<8x256xf32>
    %27 = vector.broadcast %18 : vector<1x256xf32> to vector<8x256xf32>
    %28 = arith.mulf %26, %27 : vector<8x256xf32>
    %c32_i32 = arith.constant 32 : i32
    %29 = tpu.dynamic_rotate %9 by %c32_i32 dim 1 : vector<8x256xf32>, i32 -> vector<8x256xf32>
    %30 = vector.broadcast %19 : vector<1x256xf32> to vector<8x256xf32>
    %31 = arith.mulf %29, %30 : vector<8x256xf32>
    %c30_i32 = arith.constant 30 : i32
    %32 = tpu.dynamic_rotate %9 by %c30_i32 dim 1 : vector<8x256xf32>, i32 -> vector<8x256xf32>
    %33 = vector.broadcast %20 : vector<1x256xf32> to vector<8x256xf32>
    %34 = arith.mulf %32, %33 : vector<8x256xf32>
    %c2_i32_24 = arith.constant 2 : i32
    %35 = tpu.dynamic_rotate %9 by %c2_i32_24 dim 1 : vector<8x256xf32>, i32 -> vector<8x256xf32>
    %36 = vector.broadcast %21 : vector<1x256xf32> to vector<8x256xf32>
    %37 = arith.mulf %35, %36 : vector<8x256xf32>
    %c254_i32 = arith.constant 254 : i32
    %38 = tpu.dynamic_rotate %9 by %c254_i32 dim 1 : vector<8x256xf32>, i32 -> vector<8x256xf32>
    %39 = vector.broadcast %22 : vector<1x256xf32> to vector<8x256xf32>
    %40 = arith.mulf %38, %39 : vector<8x256xf32>
    %c226_i32 = arith.constant 226 : i32
    %41 = tpu.dynamic_rotate %9 by %c226_i32 dim 1 : vector<8x256xf32>, i32 -> vector<8x256xf32>
    %42 = vector.broadcast %23 : vector<1x256xf32> to vector<8x256xf32>
    %43 = arith.mulf %41, %42 : vector<8x256xf32>
    %c224_i32 = arith.constant 224 : i32
    %44 = tpu.dynamic_rotate %9 by %c224_i32 dim 1 : vector<8x256xf32>, i32 -> vector<8x256xf32>
    %45 = vector.broadcast %24 : vector<1x256xf32> to vector<8x256xf32>
    %46 = arith.mulf %44, %45 : vector<8x256xf32>
    %c222_i32 = arith.constant 222 : i32
    %47 = tpu.dynamic_rotate %9 by %c222_i32 dim 1 : vector<8x256xf32>, i32 -> vector<8x256xf32>
    %48 = vector.broadcast %25 : vector<1x256xf32> to vector<8x256xf32>
    %49 = arith.mulf %47, %48 : vector<8x256xf32>
    %c34_i32_25 = arith.constant 34 : i32
    %50 = tpu.dynamic_rotate %12 by %c34_i32_25 dim 1 : vector<8x256xf32>, i32 -> vector<8x256xf32>
    %51 = vector.broadcast %18 : vector<1x256xf32> to vector<8x256xf32>
    %52 = arith.mulf %50, %51 : vector<8x256xf32>
    %c32_i32_26 = arith.constant 32 : i32
    %53 = tpu.dynamic_rotate %12 by %c32_i32_26 dim 1 : vector<8x256xf32>, i32 -> vector<8x256xf32>
    %54 = vector.broadcast %19 : vector<1x256xf32> to vector<8x256xf32>
    %55 = arith.mulf %53, %54 : vector<8x256xf32>
    %c30_i32_27 = arith.constant 30 : i32
    %56 = tpu.dynamic_rotate %12 by %c30_i32_27 dim 1 : vector<8x256xf32>, i32 -> vector<8x256xf32>
    %57 = vector.broadcast %20 : vector<1x256xf32> to vector<8x256xf32>
    %58 = arith.mulf %56, %57 : vector<8x256xf32>
    %c2_i32_28 = arith.constant 2 : i32
    %59 = tpu.dynamic_rotate %12 by %c2_i32_28 dim 1 : vector<8x256xf32>, i32 -> vector<8x256xf32>
    %60 = vector.broadcast %21 : vector<1x256xf32> to vector<8x256xf32>
    %61 = arith.mulf %59, %60 : vector<8x256xf32>
    %c254_i32_29 = arith.constant 254 : i32
    %62 = tpu.dynamic_rotate %12 by %c254_i32_29 dim 1 : vector<8x256xf32>, i32 -> vector<8x256xf32>
    %63 = vector.broadcast %22 : vector<1x256xf32> to vector<8x256xf32>
    %64 = arith.mulf %62, %63 : vector<8x256xf32>
    %c226_i32_30 = arith.constant 226 : i32
    %65 = tpu.dynamic_rotate %12 by %c226_i32_30 dim 1 : vector<8x256xf32>, i32 -> vector<8x256xf32>
    %66 = vector.broadcast %23 : vector<1x256xf32> to vector<8x256xf32>
    %67 = arith.mulf %65, %66 : vector<8x256xf32>
    %c224_i32_31 = arith.constant 224 : i32
    %68 = tpu.dynamic_rotate %12 by %c224_i32_31 dim 1 : vector<8x256xf32>, i32 -> vector<8x256xf32>
    %69 = vector.broadcast %24 : vector<1x256xf32> to vector<8x256xf32>
    %70 = arith.mulf %68, %69 : vector<8x256xf32>
    %c222_i32_32 = arith.constant 222 : i32
    %71 = tpu.dynamic_rotate %12 by %c222_i32_32 dim 1 : vector<8x256xf32>, i32 -> vector<8x256xf32>
    %72 = vector.broadcast %25 : vector<1x256xf32> to vector<8x256xf32>
    %73 = arith.mulf %71, %72 : vector<8x256xf32>
    %c34_i32_33 = arith.constant 34 : i32
    %74 = tpu.dynamic_rotate %17 by %c34_i32_33 dim 1 : vector<8x256xf32>, i32 -> vector<8x256xf32>
    %75 = vector.broadcast %18 : vector<1x256xf32> to vector<8x256xf32>
    %76 = arith.mulf %74, %75 : vector<8x256xf32>
    %c32_i32_34 = arith.constant 32 : i32
    %77 = tpu.dynamic_rotate %17 by %c32_i32_34 dim 1 : vector<8x256xf32>, i32 -> vector<8x256xf32>
    %78 = vector.broadcast %19 : vector<1x256xf32> to vector<8x256xf32>
    %79 = arith.mulf %77, %78 : vector<8x256xf32>
    %c30_i32_35 = arith.constant 30 : i32
    %80 = tpu.dynamic_rotate %17 by %c30_i32_35 dim 1 : vector<8x256xf32>, i32 -> vector<8x256xf32>
    %81 = vector.broadcast %20 : vector<1x256xf32> to vector<8x256xf32>
    %82 = arith.mulf %80, %81 : vector<8x256xf32>
    %c2_i32_36 = arith.constant 2 : i32
    %83 = tpu.dynamic_rotate %17 by %c2_i32_36 dim 1 : vector<8x256xf32>, i32 -> vector<8x256xf32>
    %84 = vector.broadcast %21 : vector<1x256xf32> to vector<8x256xf32>
    %85 = arith.mulf %83, %84 : vector<8x256xf32>
    %c254_i32_37 = arith.constant 254 : i32
    %86 = tpu.dynamic_rotate %17 by %c254_i32_37 dim 1 : vector<8x256xf32>, i32 -> vector<8x256xf32>
    %87 = vector.broadcast %22 : vector<1x256xf32> to vector<8x256xf32>
    %88 = arith.mulf %86, %87 : vector<8x256xf32>
    %c226_i32_38 = arith.constant 226 : i32
    %89 = tpu.dynamic_rotate %17 by %c226_i32_38 dim 1 : vector<8x256xf32>, i32 -> vector<8x256xf32>
    %90 = vector.broadcast %23 : vector<1x256xf32> to vector<8x256xf32>
    %91 = arith.mulf %89, %90 : vector<8x256xf32>
    %c224_i32_39 = arith.constant 224 : i32
    %92 = tpu.dynamic_rotate %17 by %c224_i32_39 dim 1 : vector<8x256xf32>, i32 -> vector<8x256xf32>
    %93 = vector.broadcast %24 : vector<1x256xf32> to vector<8x256xf32>
    %94 = arith.mulf %92, %93 : vector<8x256xf32>
    %c222_i32_40 = arith.constant 222 : i32
    %95 = tpu.dynamic_rotate %17 by %c222_i32_40 dim 1 : vector<8x256xf32>, i32 -> vector<8x256xf32>
    %96 = vector.broadcast %25 : vector<1x256xf32> to vector<8x256xf32>
    %97 = arith.mulf %95, %96 : vector<8x256xf32>
    %98 = tpu.concatenate %28, %31, %34, %37, %9, %40, %43, %46, %49, %52, %55, %58, %61, %12, %64, %67 in 0 : vector<8x256xf32>, vector<8x256xf32>, vector<8x256xf32>, vector<8x256xf32>, vector<8x256xf32>, vector<8x256xf32>, vector<8x256xf32>, vector<8x256xf32>, vector<8x256xf32>, vector<8x256xf32>, vector<8x256xf32>, vector<8x256xf32>, vector<8x256xf32>, vector<8x256xf32>, vector<8x256xf32>, vector<8x256xf32> -> vector<128x256xf32>
    %99 = tpu.concatenate %70, %73, %76, %79, %82, %85, %17, %88, %91, %94, %97 in 0 : vector<8x256xf32>, vector<8x256xf32>, vector<8x256xf32>, vector<8x256xf32>, vector<8x256xf32>, vector<8x256xf32>, vector<8x256xf32>, vector<8x256xf32>, vector<8x256xf32>, vector<8x256xf32>, vector<8x256xf32> -> vector<88x256xf32>
    %100 = tpu.concatenate %98, %99 in 0 : vector<128x256xf32>, vector<88x256xf32> -> vector<216x256xf32>
    %101 = arith.truncf %100 : vector<216x256xf32> to vector<216x256xbf16>
    %c0_41 = arith.constant 0 : index
    %c0_42 = arith.constant 0 : index
    %102 = vector.load %arg5[%c0_41, %c0_42] : memref<8x216xbf16, #tpu.memory_space<vmem>>, vector<8x216xbf16>
    %cst_43 = arith.constant dense<0.000000e+00> : vector<8x256xf32>
    %103 = tpu.matmul %102, %101, %cst_43 {dimension_numbers = #tpu.dot_dimension_numbers<[1], [0], [0], [1], [0, 0, 1, 1], [], []>} : vector<8x216xbf16>, vector<216x256xbf16>, vector<8x256xf32> -> vector<8x256xf32>
    %c0_44 = arith.constant 0 : index
    %c0_45 = arith.constant 0 : index
    %104 = vector.load %arg6[%c0_44, %c0_45] : memref<8x1xf32, #tpu.memory_space<vmem>>, vector<8x1xf32>
    %105 = vector.broadcast %104 : vector<8x1xf32> to vector<8x256xf32>
    %106 = arith.mulf %103, %105 : vector<8x256xf32>
    %c0_46 = arith.constant 0 : index
    %c0_47 = arith.constant 0 : index
    %107 = vector.load %arg7[%c0_46, %c0_47] : memref<8x1xf32, #tpu.memory_space<vmem>>, vector<8x1xf32>
    %108 = vector.broadcast %107 : vector<8x1xf32> to vector<8x256xf32>
    %109 = arith.addf %106, %108 : vector<8x256xf32>
    %cst_48 = arith.constant 0.000000e+00 : f32
    %110 = vector.broadcast %cst_48 : f32 to vector<8x256xf32>
    %111 = arith.maximumf %109, %110 : vector<8x256xf32>
    %112 = vector.shape_cast %111 : vector<8x256xf32> to vector<1x1x8x256xf32>
    %113 = arith.truncf %112 : vector<1x1x8x256xf32> to vector<1x1x8x256xbf16>
    %c0_49 = arith.constant 0 : index
    %c0_50 = arith.constant 0 : index
    %c0_51 = arith.constant 0 : index
    %c0_52 = arith.constant 0 : index
    %114 = vector.load %arg9[%c0_49, %c0_50, %c0_51, %c0_52] : memref<1x1x8x256xbf16, #tpu.memory_space<vmem>>, vector<1x1x8x256xbf16>
    tpu.vector_store %arg9[%c0_49, %c0_50, %c0_51, %c0_52], %113 {strides = array<i32>} : memref<1x1x8x256xbf16, #tpu.memory_space<vmem>>, vector<1x1x8x256xbf16>,
    return
  }
  func.func @transform_0(%arg0: i32, %arg1: i32) -> (i32, i32, i32, i32) {
    %c-2_i32 = arith.constant -2 : i32
    %0 = arith.addi %arg1, %c-2_i32 : i32
    %c0_i32 = arith.constant 0 : i32
    %1 = arith.maxsi %0, %c0_i32 : i32
    %c7_i32 = arith.constant 7 : i32
    %2 = arith.minsi %1, %c7_i32 : i32
    %c0_i32_0 = arith.constant 0 : i32
    %c0_i32_1 = arith.constant 0 : i32
    %c0_i32_2 = arith.constant 0 : i32
    return %arg0, %2, %c0_i32_0, %c0_i32_1 : i32, i32, i32, i32
  }
  func.func @transform_1(%arg0: i32, %arg1: i32) -> (i32, i32, i32, i32) {
    %c0_i32 = arith.constant 0 : i32
    %0 = arith.addi %arg1, %c0_i32 : i32
    %c0_i32_0 = arith.constant 0 : i32
    %1 = arith.maxsi %0, %c0_i32_0 : i32
    %c7_i32 = arith.constant 7 : i32
    %2 = arith.minsi %1, %c7_i32 : i32
    %c0_i32_1 = arith.constant 0 : i32
    %c0_i32_2 = arith.constant 0 : i32
    %c0_i32_3 = arith.constant 0 : i32
    return %arg0, %2, %c0_i32_1, %c0_i32_2 : i32, i32, i32, i32
  }
  func.func @transform_2(%arg0: i32, %arg1: i32) -> (i32, i32, i32, i32) {
    %c2_i32 = arith.constant 2 : i32
    %0 = arith.addi %arg1, %c2_i32 : i32
    %c0_i32 = arith.constant 0 : i32
    %1 = arith.maxsi %0, %c0_i32 : i32
    %c7_i32 = arith.constant 7 : i32
    %2 = arith.minsi %1, %c7_i32 : i32
    %c0_i32_0 = arith.constant 0 : i32
    %c0_i32_1 = arith.constant 0 : i32
    %c0_i32_2 = arith.constant 0 : i32
    return %arg0, %2, %c0_i32_0, %c0_i32_1 : i32, i32, i32, i32
  }
  func.func @transform_3(%arg0: i32, %arg1: i32) -> (i32, i32) {
    %c0_i32 = arith.constant 0 : i32
    %c0_i32_0 = arith.constant 0 : i32
    %c0_i32_1 = arith.constant 0 : i32
    return %c0_i32, %c0_i32_0 : i32, i32
  }
  func.func @transform_4(%arg0: i32, %arg1: i32) -> (i32, i32) {
    %c0_i32 = arith.constant 0 : i32
    %c0_i32_0 = arith.constant 0 : i32
    %c0_i32_1 = arith.constant 0 : i32
    return %c0_i32, %c0_i32_0 : i32, i32
  }
  func.func @transform_5(%arg0: i32, %arg1: i32) -> (i32, i32) {
    %c0_i32 = arith.constant 0 : i32
    %c0_i32_0 = arith.constant 0 : i32
    %c0_i32_1 = arith.constant 0 : i32
    return %c0_i32, %c0_i32_0 : i32, i32
  }
  func.func @transform_6(%arg0: i32, %arg1: i32) -> (i32, i32) {
    %c0_i32 = arith.constant 0 : i32
    %c0_i32_0 = arith.constant 0 : i32
    %c0_i32_1 = arith.constant 0 : i32
    return %c0_i32, %c0_i32_0 : i32, i32
  }
  func.func @transform_7(%arg0: i32, %arg1: i32) -> (i32, i32, i32, i32) {
    %c0_i32 = arith.constant 0 : i32
    %c0_i32_0 = arith.constant 0 : i32
    %c0_i32_1 = arith.constant 0 : i32
    return %arg0, %arg1, %c0_i32, %c0_i32_0 : i32, i32, i32, i32
  }
}

module attributes {stable_mosaic.version = 11 : i64} {
  func.func @kernel(%arg0: i32, %arg1: i32, %arg2: memref<1x1x8x256xbf16, #tpu.memory_space<vmem>>, %arg3: memref<1x1x8x256xbf16, #tpu.memory_space<vmem>>, %arg4: memref<1x1x8x256xbf16, #tpu.memory_space<vmem>>, %arg5: memref<8x216xbf16, #tpu.memory_space<vmem>>, %arg6: memref<8x1xf32, #tpu.memory_space<vmem>>, %arg7: memref<8x1xf32, #tpu.memory_space<vmem>>, %arg8: memref<9x256xf32, #tpu.memory_space<vmem>>, %arg9: memref<1x1x8x256xbf16, #tpu.memory_space<vmem>>, %arg10: memref<1x1x8x256xbf16, #tpu.memory_space<vmem>>) attributes {dimension_semantics = [#tpu.dimension_semantics<parallel>, #tpu.dimension_semantics<parallel>], iteration_bounds = array<i64: 2, 8>, scalar_prefetch = 0 : i64, scratch_operands = 0 : i64, tpu.core_type = #tpu.core_type<tc>, window_params = [{transform_indices = @transform_0, window_bounds = array<i64: 1, 1, 8, 256>}, {transform_indices = @transform_1, window_bounds = array<i64: 1, 1, 8, 256>}, {transform_indices = @transform_2, window_bounds = array<i64: 1, 1, 8, 256>}, {pipeline_mode = #tpu.pipeline_mode<synchronous>, transform_indices = @transform_3, window_bounds = array<i64: 8, 216>}, {pipeline_mode = #tpu.pipeline_mode<synchronous>, transform_indices = @transform_4, window_bounds = array<i64: 8, 1>}, {pipeline_mode = #tpu.pipeline_mode<synchronous>, transform_indices = @transform_5, window_bounds = array<i64: 8, 1>}, {pipeline_mode = #tpu.pipeline_mode<synchronous>, transform_indices = @transform_6, window_bounds = array<i64: 9, 256>}, {transform_indices = @transform_7, window_bounds = array<i64: 1, 1, 8, 256>}, {transform_indices = @transform_8, window_bounds = array<i64: 1, 1, 8, 256>}]} {
    %c1_i32 = arith.constant 1 : i32
    %0 = arith.cmpi sge, %arg1, %c1_i32 : i32
    %cst = arith.constant 1.000000e+00 : f32
    %cst_0 = arith.constant 0.000000e+00 : f32
    %1 = arith.select %0, %cst, %cst_0 : f32
    %c1_i32_1 = arith.constant 1 : i32
    %2 = arith.addi %arg1, %c1_i32_1 : i32
    %c8_i32 = arith.constant 8 : i32
    %3 = arith.cmpi slt, %2, %c8_i32 : i32
    %cst_2 = arith.constant 1.000000e+00 : f32
    %cst_3 = arith.constant 0.000000e+00 : f32
    %4 = arith.select %3, %cst_2, %cst_3 : f32
    %c0 = arith.constant 0 : index
    %c0_4 = arith.constant 0 : index
    %c0_5 = arith.constant 0 : index
    %c0_6 = arith.constant 0 : index
    %5 = vector.load %arg2[%c0, %c0_4, %c0_5, %c0_6] : memref<1x1x8x256xbf16, #tpu.memory_space<vmem>>, vector<1x1x8x256xbf16>
    %6 = vector.shape_cast %5 : vector<1x1x8x256xbf16> to vector<8x256xbf16>
    %7 = arith.extf %6 : vector<8x256xbf16> to vector<8x256xf32>
    %8 = vector.broadcast %1 : f32 to vector<8x256xf32>
    %9 = arith.mulf %7, %8 : vector<8x256xf32>
    %c0_7 = arith.constant 0 : index
    %c0_8 = arith.constant 0 : index
    %c0_9 = arith.constant 0 : index
    %c0_10 = arith.constant 0 : index
    %10 = vector.load %arg3[%c0_7, %c0_8, %c0_9, %c0_10] : memref<1x1x8x256xbf16, #tpu.memory_space<vmem>>, vector<1x1x8x256xbf16>
    %11 = vector.shape_cast %10 : vector<1x1x8x256xbf16> to vector<8x256xbf16>
    %12 = arith.extf %11 : vector<8x256xbf16> to vector<8x256xf32>
    %c0_11 = arith.constant 0 : index
    %c0_12 = arith.constant 0 : index
    %c0_13 = arith.constant 0 : index
    %c0_14 = arith.constant 0 : index
    %13 = vector.load %arg4[%c0_11, %c0_12, %c0_13, %c0_14] : memref<1x1x8x256xbf16, #tpu.memory_space<vmem>>, vector<1x1x8x256xbf16>
    %14 = vector.shape_cast %13 : vector<1x1x8x256xbf16> to vector<8x256xbf16>
    %15 = arith.extf %14 : vector<8x256xbf16> to vector<8x256xf32>
    %16 = vector.broadcast %4 : f32 to vector<8x256xf32>
    %17 = arith.mulf %15, %16 : vector<8x256xf32>
    %c0_15 = arith.constant 0 : index
    %c0_16 = arith.constant 0 : index
    %18 = vector.load %arg8[%c0_15, %c0_16] : memref<9x256xf32, #tpu.memory_space<vmem>>, vector<1x256xf32>
    %c1 = arith.constant 1 : index
    %c0_17 = arith.constant 0 : index
    %19 = vector.load %arg8[%c1, %c0_17] : memref<9x256xf32, #tpu.memory_space<vmem>>, vector<1x256xf32>
    %c2 = arith.constant 2 : index
    %c0_18 = arith.constant 0 : index
    %20 = vector.load %arg8[%c2, %c0_18] : memref<9x256xf32, #tpu.memory_space<vmem>>, vector<1x256xf32>
    %c3 = arith.constant 3 : index
    %c0_19 = arith.constant 0 : index
    %21 = vector.load %arg8[%c3, %c0_19] : memref<9x256xf32, #tpu.memory_space<vmem>>, vector<1x256xf32>
    %c5 = arith.constant 5 : index
    %c0_20 = arith.constant 0 : index
    %22 = vector.load %arg8[%c5, %c0_20] : memref<9x256xf32, #tpu.memory_space<vmem>>, vector<1x256xf32>
    %c6 = arith.constant 6 : index
    %c0_21 = arith.constant 0 : index
    %23 = vector.load %arg8[%c6, %c0_21] : memref<9x256xf32, #tpu.memory_space<vmem>>, vector<1x256xf32>
    %c7 = arith.constant 7 : index
    %c0_22 = arith.constant 0 : index
    %24 = vector.load %arg8[%c7, %c0_22] : memref<9x256xf32, #tpu.memory_space<vmem>>, vector<1x256xf32>
    %c8 = arith.constant 8 : index
    %c0_23 = arith.constant 0 : index
    %25 = vector.load %arg8[%c8, %c0_23] : memref<9x256xf32, #tpu.memory_space<vmem>>, vector<1x256xf32>
    %c17_i32 = arith.constant 17 : i32
    %26 = tpu.dynamic_rotate %9 by %c17_i32 dim 1 : vector<8x256xf32>, i32 -> vector<8x256xf32>
    %27 = vector.broadcast %18 : vector<1x256xf32> to vector<8x256xf32>
    %28 = arith.mulf %26, %27 : vector<8x256xf32>
    %c16_i32 = arith.constant 16 : i32
    %29 = tpu.dynamic_rotate %9 by %c16_i32 dim 1 : vector<8x256xf32>, i32 -> vector<8x256xf32>
    %30 = vector.broadcast %19 : vector<1x256xf32> to vector<8x256xf32>
    %31 = arith.mulf %29, %30 : vector<8x256xf32>
    %c15_i32 = arith.constant 15 : i32
    %32 = tpu.dynamic_rotate %9 by %c15_i32 dim 1 : vector<8x256xf32>, i32 -> vector<8x256xf32>
    %33 = vector.broadcast %20 : vector<1x256xf32> to vector<8x256xf32>
    %34 = arith.mulf %32, %33 : vector<8x256xf32>
    %c1_i32_24 = arith.constant 1 : i32
    %35 = tpu.dynamic_rotate %9 by %c1_i32_24 dim 1 : vector<8x256xf32>, i32 -> vector<8x256xf32>
    %36 = vector.broadcast %21 : vector<1x256xf32> to vector<8x256xf32>
    %37 = arith.mulf %35, %36 : vector<8x256xf32>
    %c255_i32 = arith.constant 255 : i32
    %38 = tpu.dynamic_rotate %9 by %c255_i32 dim 1 : vector<8x256xf32>, i32 -> vector<8x256xf32>
    %39 = vector.broadcast %22 : vector<1x256xf32> to vector<8x256xf32>
    %40 = arith.mulf %38, %39 : vector<8x256xf32>
    %c241_i32 = arith.constant 241 : i32
    %41 = tpu.dynamic_rotate %9 by %c241_i32 dim 1 : vector<8x256xf32>, i32 -> vector<8x256xf32>
    %42 = vector.broadcast %23 : vector<1x256xf32> to vector<8x256xf32>
    %43 = arith.mulf %41, %42 : vector<8x256xf32>
    %c240_i32 = arith.constant 240 : i32
    %44 = tpu.dynamic_rotate %9 by %c240_i32 dim 1 : vector<8x256xf32>, i32 -> vector<8x256xf32>
    %45 = vector.broadcast %24 : vector<1x256xf32> to vector<8x256xf32>
    %46 = arith.mulf %44, %45 : vector<8x256xf32>
    %c239_i32 = arith.constant 239 : i32
    %47 = tpu.dynamic_rotate %9 by %c239_i32 dim 1 : vector<8x256xf32>, i32 -> vector<8x256xf32>
    %48 = vector.broadcast %25 : vector<1x256xf32> to vector<8x256xf32>
    %49 = arith.mulf %47, %48 : vector<8x256xf32>
    %c17_i32_25 = arith.constant 17 : i32
    %50 = tpu.dynamic_rotate %12 by %c17_i32_25 dim 1 : vector<8x256xf32>, i32 -> vector<8x256xf32>
    %51 = vector.broadcast %18 : vector<1x256xf32> to vector<8x256xf32>
    %52 = arith.mulf %50, %51 : vector<8x256xf32>
    %c16_i32_26 = arith.constant 16 : i32
    %53 = tpu.dynamic_rotate %12 by %c16_i32_26 dim 1 : vector<8x256xf32>, i32 -> vector<8x256xf32>
    %54 = vector.broadcast %19 : vector<1x256xf32> to vector<8x256xf32>
    %55 = arith.mulf %53, %54 : vector<8x256xf32>
    %c15_i32_27 = arith.constant 15 : i32
    %56 = tpu.dynamic_rotate %12 by %c15_i32_27 dim 1 : vector<8x256xf32>, i32 -> vector<8x256xf32>
    %57 = vector.broadcast %20 : vector<1x256xf32> to vector<8x256xf32>
    %58 = arith.mulf %56, %57 : vector<8x256xf32>
    %c1_i32_28 = arith.constant 1 : i32
    %59 = tpu.dynamic_rotate %12 by %c1_i32_28 dim 1 : vector<8x256xf32>, i32 -> vector<8x256xf32>
    %60 = vector.broadcast %21 : vector<1x256xf32> to vector<8x256xf32>
    %61 = arith.mulf %59, %60 : vector<8x256xf32>
    %c255_i32_29 = arith.constant 255 : i32
    %62 = tpu.dynamic_rotate %12 by %c255_i32_29 dim 1 : vector<8x256xf32>, i32 -> vector<8x256xf32>
    %63 = vector.broadcast %22 : vector<1x256xf32> to vector<8x256xf32>
    %64 = arith.mulf %62, %63 : vector<8x256xf32>
    %c241_i32_30 = arith.constant 241 : i32
    %65 = tpu.dynamic_rotate %12 by %c241_i32_30 dim 1 : vector<8x256xf32>, i32 -> vector<8x256xf32>
    %66 = vector.broadcast %23 : vector<1x256xf32> to vector<8x256xf32>
    %67 = arith.mulf %65, %66 : vector<8x256xf32>
    %c240_i32_31 = arith.constant 240 : i32
    %68 = tpu.dynamic_rotate %12 by %c240_i32_31 dim 1 : vector<8x256xf32>, i32 -> vector<8x256xf32>
    %69 = vector.broadcast %24 : vector<1x256xf32> to vector<8x256xf32>
    %70 = arith.mulf %68, %69 : vector<8x256xf32>
    %c239_i32_32 = arith.constant 239 : i32
    %71 = tpu.dynamic_rotate %12 by %c239_i32_32 dim 1 : vector<8x256xf32>, i32 -> vector<8x256xf32>
    %72 = vector.broadcast %25 : vector<1x256xf32> to vector<8x256xf32>
    %73 = arith.mulf %71, %72 : vector<8x256xf32>
    %c17_i32_33 = arith.constant 17 : i32
    %74 = tpu.dynamic_rotate %17 by %c17_i32_33 dim 1 : vector<8x256xf32>, i32 -> vector<8x256xf32>
    %75 = vector.broadcast %18 : vector<1x256xf32> to vector<8x256xf32>
    %76 = arith.mulf %74, %75 : vector<8x256xf32>
    %c16_i32_34 = arith.constant 16 : i32
    %77 = tpu.dynamic_rotate %17 by %c16_i32_34 dim 1 : vector<8x256xf32>, i32 -> vector<8x256xf32>
    %78 = vector.broadcast %19 : vector<1x256xf32> to vector<8x256xf32>
    %79 = arith.mulf %77, %78 : vector<8x256xf32>
    %c15_i32_35 = arith.constant 15 : i32
    %80 = tpu.dynamic_rotate %17 by %c15_i32_35 dim 1 : vector<8x256xf32>, i32 -> vector<8x256xf32>
    %81 = vector.broadcast %20 : vector<1x256xf32> to vector<8x256xf32>
    %82 = arith.mulf %80, %81 : vector<8x256xf32>
    %c1_i32_36 = arith.constant 1 : i32
    %83 = tpu.dynamic_rotate %17 by %c1_i32_36 dim 1 : vector<8x256xf32>, i32 -> vector<8x256xf32>
    %84 = vector.broadcast %21 : vector<1x256xf32> to vector<8x256xf32>
    %85 = arith.mulf %83, %84 : vector<8x256xf32>
    %c255_i32_37 = arith.constant 255 : i32
    %86 = tpu.dynamic_rotate %17 by %c255_i32_37 dim 1 : vector<8x256xf32>, i32 -> vector<8x256xf32>
    %87 = vector.broadcast %22 : vector<1x256xf32> to vector<8x256xf32>
    %88 = arith.mulf %86, %87 : vector<8x256xf32>
    %c241_i32_38 = arith.constant 241 : i32
    %89 = tpu.dynamic_rotate %17 by %c241_i32_38 dim 1 : vector<8x256xf32>, i32 -> vector<8x256xf32>
    %90 = vector.broadcast %23 : vector<1x256xf32> to vector<8x256xf32>
    %91 = arith.mulf %89, %90 : vector<8x256xf32>
    %c240_i32_39 = arith.constant 240 : i32
    %92 = tpu.dynamic_rotate %17 by %c240_i32_39 dim 1 : vector<8x256xf32>, i32 -> vector<8x256xf32>
    %93 = vector.broadcast %24 : vector<1x256xf32> to vector<8x256xf32>
    %94 = arith.mulf %92, %93 : vector<8x256xf32>
    %c239_i32_40 = arith.constant 239 : i32
    %95 = tpu.dynamic_rotate %17 by %c239_i32_40 dim 1 : vector<8x256xf32>, i32 -> vector<8x256xf32>
    %96 = vector.broadcast %25 : vector<1x256xf32> to vector<8x256xf32>
    %97 = arith.mulf %95, %96 : vector<8x256xf32>
    %98 = tpu.concatenate %28, %31, %34, %37, %9, %40, %43, %46, %49, %52, %55, %58, %61, %12, %64, %67 in 0 : vector<8x256xf32>, vector<8x256xf32>, vector<8x256xf32>, vector<8x256xf32>, vector<8x256xf32>, vector<8x256xf32>, vector<8x256xf32>, vector<8x256xf32>, vector<8x256xf32>, vector<8x256xf32>, vector<8x256xf32>, vector<8x256xf32>, vector<8x256xf32>, vector<8x256xf32>, vector<8x256xf32>, vector<8x256xf32> -> vector<128x256xf32>
    %99 = tpu.concatenate %70, %73, %76, %79, %82, %85, %17, %88, %91, %94, %97 in 0 : vector<8x256xf32>, vector<8x256xf32>, vector<8x256xf32>, vector<8x256xf32>, vector<8x256xf32>, vector<8x256xf32>, vector<8x256xf32>, vector<8x256xf32>, vector<8x256xf32>, vector<8x256xf32>, vector<8x256xf32> -> vector<88x256xf32>
    %100 = tpu.concatenate %98, %99 in 0 : vector<128x256xf32>, vector<88x256xf32> -> vector<216x256xf32>
    %101 = arith.truncf %100 : vector<216x256xf32> to vector<216x256xbf16>
    %c0_41 = arith.constant 0 : index
    %c0_42 = arith.constant 0 : index
    %102 = vector.load %arg5[%c0_41, %c0_42] : memref<8x216xbf16, #tpu.memory_space<vmem>>, vector<8x216xbf16>
    %cst_43 = arith.constant dense<0.000000e+00> : vector<8x256xf32>
    %103 = tpu.matmul %102, %101, %cst_43 {dimension_numbers = #tpu.dot_dimension_numbers<[1], [0], [0], [1], [0, 0, 1, 1], [], []>} : vector<8x216xbf16>, vector<216x256xbf16>, vector<8x256xf32> -> vector<8x256xf32>
    %c0_44 = arith.constant 0 : index
    %c0_45 = arith.constant 0 : index
    %104 = vector.load %arg6[%c0_44, %c0_45] : memref<8x1xf32, #tpu.memory_space<vmem>>, vector<8x1xf32>
    %105 = vector.broadcast %104 : vector<8x1xf32> to vector<8x256xf32>
    %106 = arith.mulf %103, %105 : vector<8x256xf32>
    %c0_46 = arith.constant 0 : index
    %c0_47 = arith.constant 0 : index
    %107 = vector.load %arg7[%c0_46, %c0_47] : memref<8x1xf32, #tpu.memory_space<vmem>>, vector<8x1xf32>
    %108 = vector.broadcast %107 : vector<8x1xf32> to vector<8x256xf32>
    %109 = arith.addf %106, %108 : vector<8x256xf32>
    %c0_48 = arith.constant 0 : index
    %c0_49 = arith.constant 0 : index
    %c0_50 = arith.constant 0 : index
    %c0_51 = arith.constant 0 : index
    %110 = vector.load %arg9[%c0_48, %c0_49, %c0_50, %c0_51] : memref<1x1x8x256xbf16, #tpu.memory_space<vmem>>, vector<1x1x8x256xbf16>
    %111 = vector.shape_cast %110 : vector<1x1x8x256xbf16> to vector<8x256xbf16>
    %112 = arith.extf %111 : vector<8x256xbf16> to vector<8x256xf32>
    %113 = arith.addf %109, %112 : vector<8x256xf32>
    %114 = vector.shape_cast %113 : vector<8x256xf32> to vector<1x1x8x256xf32>
    %115 = arith.truncf %114 : vector<1x1x8x256xf32> to vector<1x1x8x256xbf16>
    %c0_52 = arith.constant 0 : index
    %c0_53 = arith.constant 0 : index
    %c0_54 = arith.constant 0 : index
    %c0_55 = arith.constant 0 : index
    %116 = vector.load %arg10[%c0_52, %c0_53, %c0_54, %c0_55] : memref<1x1x8x256xbf16, #tpu.memory_space<vmem>>, vector<1x1x8x256xbf16>
    tpu.vector_store %arg10[%c0_52, %c0_53, %c0_54, %c0_55], %115 {strides = array<i32>} : memref<1x1x8x256xbf16, #tpu.memory_space<vmem>>, vector<1x1x8x256xbf16>,
    return
  }
  func.func @transform_0(%arg0: i32, %arg1: i32) -> (i32, i32, i32, i32) {
    %c-1_i32 = arith.constant -1 : i32
    %0 = arith.addi %arg1, %c-1_i32 : i32
    %c0_i32 = arith.constant 0 : i32
    %1 = arith.maxsi %0, %c0_i32 : i32
    %c7_i32 = arith.constant 7 : i32
    %2 = arith.minsi %1, %c7_i32 : i32
    %c0_i32_0 = arith.constant 0 : i32
    %c0_i32_1 = arith.constant 0 : i32
    %c0_i32_2 = arith.constant 0 : i32
    return %arg0, %2, %c0_i32_0, %c0_i32_1 : i32, i32, i32, i32
  }
  func.func @transform_1(%arg0: i32, %arg1: i32) -> (i32, i32, i32, i32) {
    %c0_i32 = arith.constant 0 : i32
    %0 = arith.addi %arg1, %c0_i32 : i32
    %c0_i32_0 = arith.constant 0 : i32
    %1 = arith.maxsi %0, %c0_i32_0 : i32
    %c7_i32 = arith.constant 7 : i32
    %2 = arith.minsi %1, %c7_i32 : i32
    %c0_i32_1 = arith.constant 0 : i32
    %c0_i32_2 = arith.constant 0 : i32
    %c0_i32_3 = arith.constant 0 : i32
    return %arg0, %2, %c0_i32_1, %c0_i32_2 : i32, i32, i32, i32
  }
  func.func @transform_2(%arg0: i32, %arg1: i32) -> (i32, i32, i32, i32) {
    %c1_i32 = arith.constant 1 : i32
    %0 = arith.addi %arg1, %c1_i32 : i32
    %c0_i32 = arith.constant 0 : i32
    %1 = arith.maxsi %0, %c0_i32 : i32
    %c7_i32 = arith.constant 7 : i32
    %2 = arith.minsi %1, %c7_i32 : i32
    %c0_i32_0 = arith.constant 0 : i32
    %c0_i32_1 = arith.constant 0 : i32
    %c0_i32_2 = arith.constant 0 : i32
    return %arg0, %2, %c0_i32_0, %c0_i32_1 : i32, i32, i32, i32
  }
  func.func @transform_3(%arg0: i32, %arg1: i32) -> (i32, i32) {
    %c0_i32 = arith.constant 0 : i32
    %c0_i32_0 = arith.constant 0 : i32
    %c0_i32_1 = arith.constant 0 : i32
    return %c0_i32, %c0_i32_0 : i32, i32
  }
  func.func @transform_4(%arg0: i32, %arg1: i32) -> (i32, i32) {
    %c0_i32 = arith.constant 0 : i32
    %c0_i32_0 = arith.constant 0 : i32
    %c0_i32_1 = arith.constant 0 : i32
    return %c0_i32, %c0_i32_0 : i32, i32
  }
  func.func @transform_5(%arg0: i32, %arg1: i32) -> (i32, i32) {
    %c0_i32 = arith.constant 0 : i32
    %c0_i32_0 = arith.constant 0 : i32
    %c0_i32_1 = arith.constant 0 : i32
    return %c0_i32, %c0_i32_0 : i32, i32
  }
  func.func @transform_6(%arg0: i32, %arg1: i32) -> (i32, i32) {
    %c0_i32 = arith.constant 0 : i32
    %c0_i32_0 = arith.constant 0 : i32
    %c0_i32_1 = arith.constant 0 : i32
    return %c0_i32, %c0_i32_0 : i32, i32
  }
  func.func @transform_7(%arg0: i32, %arg1: i32) -> (i32, i32, i32, i32) {
    %c0_i32 = arith.constant 0 : i32
    %c0_i32_0 = arith.constant 0 : i32
    %c0_i32_1 = arith.constant 0 : i32
    return %arg0, %arg1, %c0_i32, %c0_i32_0 : i32, i32, i32, i32
  }
  func.func @transform_8(%arg0: i32, %arg1: i32) -> (i32, i32, i32, i32) {
    %c0_i32 = arith.constant 0 : i32
    %c0_i32_0 = arith.constant 0 : i32
    %c0_i32_1 = arith.constant 0 : i32
    return %arg0, %arg1, %c0_i32, %c0_i32_0 : i32, i32, i32, i32
  }
}

module attributes {stable_mosaic.version = 11 : i64} {
  func.func @kernel(%arg0: i32, %arg1: i32, %arg2: memref<1x1x8x256xbf16, #tpu.memory_space<vmem>>, %arg3: memref<1x1x8x256xbf16, #tpu.memory_space<vmem>>, %arg4: memref<1x1x8x256xbf16, #tpu.memory_space<vmem>>, %arg5: memref<4x216xbf16, #tpu.memory_space<vmem>>, %arg6: memref<4x1xf32, #tpu.memory_space<vmem>>, %arg7: memref<4x1xf32, #tpu.memory_space<vmem>>, %arg8: memref<9x256xf32, #tpu.memory_space<vmem>>, %arg9: memref<1x1x4x256xf32, #tpu.memory_space<vmem>>) attributes {dimension_semantics = [#tpu.dimension_semantics<parallel>, #tpu.dimension_semantics<parallel>], iteration_bounds = array<i64: 2, 8>, scalar_prefetch = 0 : i64, scratch_operands = 0 : i64, tpu.core_type = #tpu.core_type<tc>, window_params = [{transform_indices = @transform_0, window_bounds = array<i64: 1, 1, 8, 256>}, {transform_indices = @transform_1, window_bounds = array<i64: 1, 1, 8, 256>}, {transform_indices = @transform_2, window_bounds = array<i64: 1, 1, 8, 256>}, {pipeline_mode = #tpu.pipeline_mode<synchronous>, transform_indices = @transform_3, window_bounds = array<i64: 4, 216>}, {pipeline_mode = #tpu.pipeline_mode<synchronous>, transform_indices = @transform_4, window_bounds = array<i64: 4, 1>}, {pipeline_mode = #tpu.pipeline_mode<synchronous>, transform_indices = @transform_5, window_bounds = array<i64: 4, 1>}, {pipeline_mode = #tpu.pipeline_mode<synchronous>, transform_indices = @transform_6, window_bounds = array<i64: 9, 256>}, {transform_indices = @transform_7, window_bounds = array<i64: 1, 1, 4, 256>}]} {
    %c1_i32 = arith.constant 1 : i32
    %0 = arith.cmpi sge, %arg1, %c1_i32 : i32
    %cst = arith.constant 1.000000e+00 : f32
    %cst_0 = arith.constant 0.000000e+00 : f32
    %1 = arith.select %0, %cst, %cst_0 : f32
    %c1_i32_1 = arith.constant 1 : i32
    %2 = arith.addi %arg1, %c1_i32_1 : i32
    %c8_i32 = arith.constant 8 : i32
    %3 = arith.cmpi slt, %2, %c8_i32 : i32
    %cst_2 = arith.constant 1.000000e+00 : f32
    %cst_3 = arith.constant 0.000000e+00 : f32
    %4 = arith.select %3, %cst_2, %cst_3 : f32
    %c0 = arith.constant 0 : index
    %c0_4 = arith.constant 0 : index
    %c0_5 = arith.constant 0 : index
    %c0_6 = arith.constant 0 : index
    %5 = vector.load %arg2[%c0, %c0_4, %c0_5, %c0_6] : memref<1x1x8x256xbf16, #tpu.memory_space<vmem>>, vector<1x1x8x256xbf16>
    %6 = vector.shape_cast %5 : vector<1x1x8x256xbf16> to vector<8x256xbf16>
    %7 = arith.extf %6 : vector<8x256xbf16> to vector<8x256xf32>
    %8 = vector.broadcast %1 : f32 to vector<8x256xf32>
    %9 = arith.mulf %7, %8 : vector<8x256xf32>
    %c0_7 = arith.constant 0 : index
    %c0_8 = arith.constant 0 : index
    %c0_9 = arith.constant 0 : index
    %c0_10 = arith.constant 0 : index
    %10 = vector.load %arg3[%c0_7, %c0_8, %c0_9, %c0_10] : memref<1x1x8x256xbf16, #tpu.memory_space<vmem>>, vector<1x1x8x256xbf16>
    %11 = vector.shape_cast %10 : vector<1x1x8x256xbf16> to vector<8x256xbf16>
    %12 = arith.extf %11 : vector<8x256xbf16> to vector<8x256xf32>
    %c0_11 = arith.constant 0 : index
    %c0_12 = arith.constant 0 : index
    %c0_13 = arith.constant 0 : index
    %c0_14 = arith.constant 0 : index
    %13 = vector.load %arg4[%c0_11, %c0_12, %c0_13, %c0_14] : memref<1x1x8x256xbf16, #tpu.memory_space<vmem>>, vector<1x1x8x256xbf16>
    %14 = vector.shape_cast %13 : vector<1x1x8x256xbf16> to vector<8x256xbf16>
    %15 = arith.extf %14 : vector<8x256xbf16> to vector<8x256xf32>
    %16 = vector.broadcast %4 : f32 to vector<8x256xf32>
    %17 = arith.mulf %15, %16 : vector<8x256xf32>
    %c0_15 = arith.constant 0 : index
    %c0_16 = arith.constant 0 : index
    %18 = vector.load %arg8[%c0_15, %c0_16] : memref<9x256xf32, #tpu.memory_space<vmem>>, vector<1x256xf32>
    %c1 = arith.constant 1 : index
    %c0_17 = arith.constant 0 : index
    %19 = vector.load %arg8[%c1, %c0_17] : memref<9x256xf32, #tpu.memory_space<vmem>>, vector<1x256xf32>
    %c2 = arith.constant 2 : index
    %c0_18 = arith.constant 0 : index
    %20 = vector.load %arg8[%c2, %c0_18] : memref<9x256xf32, #tpu.memory_space<vmem>>, vector<1x256xf32>
    %c3 = arith.constant 3 : index
    %c0_19 = arith.constant 0 : index
    %21 = vector.load %arg8[%c3, %c0_19] : memref<9x256xf32, #tpu.memory_space<vmem>>, vector<1x256xf32>
    %c5 = arith.constant 5 : index
    %c0_20 = arith.constant 0 : index
    %22 = vector.load %arg8[%c5, %c0_20] : memref<9x256xf32, #tpu.memory_space<vmem>>, vector<1x256xf32>
    %c6 = arith.constant 6 : index
    %c0_21 = arith.constant 0 : index
    %23 = vector.load %arg8[%c6, %c0_21] : memref<9x256xf32, #tpu.memory_space<vmem>>, vector<1x256xf32>
    %c7 = arith.constant 7 : index
    %c0_22 = arith.constant 0 : index
    %24 = vector.load %arg8[%c7, %c0_22] : memref<9x256xf32, #tpu.memory_space<vmem>>, vector<1x256xf32>
    %c8 = arith.constant 8 : index
    %c0_23 = arith.constant 0 : index
    %25 = vector.load %arg8[%c8, %c0_23] : memref<9x256xf32, #tpu.memory_space<vmem>>, vector<1x256xf32>
    %c17_i32 = arith.constant 17 : i32
    %26 = tpu.dynamic_rotate %9 by %c17_i32 dim 1 : vector<8x256xf32>, i32 -> vector<8x256xf32>
    %27 = vector.broadcast %18 : vector<1x256xf32> to vector<8x256xf32>
    %28 = arith.mulf %26, %27 : vector<8x256xf32>
    %c16_i32 = arith.constant 16 : i32
    %29 = tpu.dynamic_rotate %9 by %c16_i32 dim 1 : vector<8x256xf32>, i32 -> vector<8x256xf32>
    %30 = vector.broadcast %19 : vector<1x256xf32> to vector<8x256xf32>
    %31 = arith.mulf %29, %30 : vector<8x256xf32>
    %c15_i32 = arith.constant 15 : i32
    %32 = tpu.dynamic_rotate %9 by %c15_i32 dim 1 : vector<8x256xf32>, i32 -> vector<8x256xf32>
    %33 = vector.broadcast %20 : vector<1x256xf32> to vector<8x256xf32>
    %34 = arith.mulf %32, %33 : vector<8x256xf32>
    %c1_i32_24 = arith.constant 1 : i32
    %35 = tpu.dynamic_rotate %9 by %c1_i32_24 dim 1 : vector<8x256xf32>, i32 -> vector<8x256xf32>
    %36 = vector.broadcast %21 : vector<1x256xf32> to vector<8x256xf32>
    %37 = arith.mulf %35, %36 : vector<8x256xf32>
    %c255_i32 = arith.constant 255 : i32
    %38 = tpu.dynamic_rotate %9 by %c255_i32 dim 1 : vector<8x256xf32>, i32 -> vector<8x256xf32>
    %39 = vector.broadcast %22 : vector<1x256xf32> to vector<8x256xf32>
    %40 = arith.mulf %38, %39 : vector<8x256xf32>
    %c241_i32 = arith.constant 241 : i32
    %41 = tpu.dynamic_rotate %9 by %c241_i32 dim 1 : vector<8x256xf32>, i32 -> vector<8x256xf32>
    %42 = vector.broadcast %23 : vector<1x256xf32> to vector<8x256xf32>
    %43 = arith.mulf %41, %42 : vector<8x256xf32>
    %c240_i32 = arith.constant 240 : i32
    %44 = tpu.dynamic_rotate %9 by %c240_i32 dim 1 : vector<8x256xf32>, i32 -> vector<8x256xf32>
    %45 = vector.broadcast %24 : vector<1x256xf32> to vector<8x256xf32>
    %46 = arith.mulf %44, %45 : vector<8x256xf32>
    %c239_i32 = arith.constant 239 : i32
    %47 = tpu.dynamic_rotate %9 by %c239_i32 dim 1 : vector<8x256xf32>, i32 -> vector<8x256xf32>
    %48 = vector.broadcast %25 : vector<1x256xf32> to vector<8x256xf32>
    %49 = arith.mulf %47, %48 : vector<8x256xf32>
    %c17_i32_25 = arith.constant 17 : i32
    %50 = tpu.dynamic_rotate %12 by %c17_i32_25 dim 1 : vector<8x256xf32>, i32 -> vector<8x256xf32>
    %51 = vector.broadcast %18 : vector<1x256xf32> to vector<8x256xf32>
    %52 = arith.mulf %50, %51 : vector<8x256xf32>
    %c16_i32_26 = arith.constant 16 : i32
    %53 = tpu.dynamic_rotate %12 by %c16_i32_26 dim 1 : vector<8x256xf32>, i32 -> vector<8x256xf32>
    %54 = vector.broadcast %19 : vector<1x256xf32> to vector<8x256xf32>
    %55 = arith.mulf %53, %54 : vector<8x256xf32>
    %c15_i32_27 = arith.constant 15 : i32
    %56 = tpu.dynamic_rotate %12 by %c15_i32_27 dim 1 : vector<8x256xf32>, i32 -> vector<8x256xf32>
    %57 = vector.broadcast %20 : vector<1x256xf32> to vector<8x256xf32>
    %58 = arith.mulf %56, %57 : vector<8x256xf32>
    %c1_i32_28 = arith.constant 1 : i32
    %59 = tpu.dynamic_rotate %12 by %c1_i32_28 dim 1 : vector<8x256xf32>, i32 -> vector<8x256xf32>
    %60 = vector.broadcast %21 : vector<1x256xf32> to vector<8x256xf32>
    %61 = arith.mulf %59, %60 : vector<8x256xf32>
    %c255_i32_29 = arith.constant 255 : i32
    %62 = tpu.dynamic_rotate %12 by %c255_i32_29 dim 1 : vector<8x256xf32>, i32 -> vector<8x256xf32>
    %63 = vector.broadcast %22 : vector<1x256xf32> to vector<8x256xf32>
    %64 = arith.mulf %62, %63 : vector<8x256xf32>
    %c241_i32_30 = arith.constant 241 : i32
    %65 = tpu.dynamic_rotate %12 by %c241_i32_30 dim 1 : vector<8x256xf32>, i32 -> vector<8x256xf32>
    %66 = vector.broadcast %23 : vector<1x256xf32> to vector<8x256xf32>
    %67 = arith.mulf %65, %66 : vector<8x256xf32>
    %c240_i32_31 = arith.constant 240 : i32
    %68 = tpu.dynamic_rotate %12 by %c240_i32_31 dim 1 : vector<8x256xf32>, i32 -> vector<8x256xf32>
    %69 = vector.broadcast %24 : vector<1x256xf32> to vector<8x256xf32>
    %70 = arith.mulf %68, %69 : vector<8x256xf32>
    %c239_i32_32 = arith.constant 239 : i32
    %71 = tpu.dynamic_rotate %12 by %c239_i32_32 dim 1 : vector<8x256xf32>, i32 -> vector<8x256xf32>
    %72 = vector.broadcast %25 : vector<1x256xf32> to vector<8x256xf32>
    %73 = arith.mulf %71, %72 : vector<8x256xf32>
    %c17_i32_33 = arith.constant 17 : i32
    %74 = tpu.dynamic_rotate %17 by %c17_i32_33 dim 1 : vector<8x256xf32>, i32 -> vector<8x256xf32>
    %75 = vector.broadcast %18 : vector<1x256xf32> to vector<8x256xf32>
    %76 = arith.mulf %74, %75 : vector<8x256xf32>
    %c16_i32_34 = arith.constant 16 : i32
    %77 = tpu.dynamic_rotate %17 by %c16_i32_34 dim 1 : vector<8x256xf32>, i32 -> vector<8x256xf32>
    %78 = vector.broadcast %19 : vector<1x256xf32> to vector<8x256xf32>
    %79 = arith.mulf %77, %78 : vector<8x256xf32>
    %c15_i32_35 = arith.constant 15 : i32
    %80 = tpu.dynamic_rotate %17 by %c15_i32_35 dim 1 : vector<8x256xf32>, i32 -> vector<8x256xf32>
    %81 = vector.broadcast %20 : vector<1x256xf32> to vector<8x256xf32>
    %82 = arith.mulf %80, %81 : vector<8x256xf32>
    %c1_i32_36 = arith.constant 1 : i32
    %83 = tpu.dynamic_rotate %17 by %c1_i32_36 dim 1 : vector<8x256xf32>, i32 -> vector<8x256xf32>
    %84 = vector.broadcast %21 : vector<1x256xf32> to vector<8x256xf32>
    %85 = arith.mulf %83, %84 : vector<8x256xf32>
    %c255_i32_37 = arith.constant 255 : i32
    %86 = tpu.dynamic_rotate %17 by %c255_i32_37 dim 1 : vector<8x256xf32>, i32 -> vector<8x256xf32>
    %87 = vector.broadcast %22 : vector<1x256xf32> to vector<8x256xf32>
    %88 = arith.mulf %86, %87 : vector<8x256xf32>
    %c241_i32_38 = arith.constant 241 : i32
    %89 = tpu.dynamic_rotate %17 by %c241_i32_38 dim 1 : vector<8x256xf32>, i32 -> vector<8x256xf32>
    %90 = vector.broadcast %23 : vector<1x256xf32> to vector<8x256xf32>
    %91 = arith.mulf %89, %90 : vector<8x256xf32>
    %c240_i32_39 = arith.constant 240 : i32
    %92 = tpu.dynamic_rotate %17 by %c240_i32_39 dim 1 : vector<8x256xf32>, i32 -> vector<8x256xf32>
    %93 = vector.broadcast %24 : vector<1x256xf32> to vector<8x256xf32>
    %94 = arith.mulf %92, %93 : vector<8x256xf32>
    %c239_i32_40 = arith.constant 239 : i32
    %95 = tpu.dynamic_rotate %17 by %c239_i32_40 dim 1 : vector<8x256xf32>, i32 -> vector<8x256xf32>
    %96 = vector.broadcast %25 : vector<1x256xf32> to vector<8x256xf32>
    %97 = arith.mulf %95, %96 : vector<8x256xf32>
    %98 = tpu.concatenate %28, %31, %34, %37, %9, %40, %43, %46, %49, %52, %55, %58, %61, %12, %64, %67 in 0 : vector<8x256xf32>, vector<8x256xf32>, vector<8x256xf32>, vector<8x256xf32>, vector<8x256xf32>, vector<8x256xf32>, vector<8x256xf32>, vector<8x256xf32>, vector<8x256xf32>, vector<8x256xf32>, vector<8x256xf32>, vector<8x256xf32>, vector<8x256xf32>, vector<8x256xf32>, vector<8x256xf32>, vector<8x256xf32> -> vector<128x256xf32>
    %99 = tpu.concatenate %70, %73, %76, %79, %82, %85, %17, %88, %91, %94, %97 in 0 : vector<8x256xf32>, vector<8x256xf32>, vector<8x256xf32>, vector<8x256xf32>, vector<8x256xf32>, vector<8x256xf32>, vector<8x256xf32>, vector<8x256xf32>, vector<8x256xf32>, vector<8x256xf32>, vector<8x256xf32> -> vector<88x256xf32>
    %100 = tpu.concatenate %98, %99 in 0 : vector<128x256xf32>, vector<88x256xf32> -> vector<216x256xf32>
    %101 = arith.truncf %100 : vector<216x256xf32> to vector<216x256xbf16>
    %c0_41 = arith.constant 0 : index
    %c0_42 = arith.constant 0 : index
    %102 = vector.load %arg5[%c0_41, %c0_42] : memref<4x216xbf16, #tpu.memory_space<vmem>>, vector<4x216xbf16>
    %cst_43 = arith.constant dense<0.000000e+00> : vector<4x256xf32>
    %103 = tpu.matmul %102, %101, %cst_43 {dimension_numbers = #tpu.dot_dimension_numbers<[1], [0], [0], [1], [0, 0, 1, 1], [], []>} : vector<4x216xbf16>, vector<216x256xbf16>, vector<4x256xf32> -> vector<4x256xf32>
    %c0_44 = arith.constant 0 : index
    %c0_45 = arith.constant 0 : index
    %104 = vector.load %arg6[%c0_44, %c0_45] : memref<4x1xf32, #tpu.memory_space<vmem>>, vector<4x1xf32>
    %105 = vector.broadcast %104 : vector<4x1xf32> to vector<4x256xf32>
    %106 = arith.mulf %103, %105 : vector<4x256xf32>
    %c0_46 = arith.constant 0 : index
    %c0_47 = arith.constant 0 : index
    %107 = vector.load %arg7[%c0_46, %c0_47] : memref<4x1xf32, #tpu.memory_space<vmem>>, vector<4x1xf32>
    %108 = vector.broadcast %107 : vector<4x1xf32> to vector<4x256xf32>
    %109 = arith.addf %106, %108 : vector<4x256xf32>
    %110 = vector.shape_cast %109 : vector<4x256xf32> to vector<1x1x4x256xf32>
    %c0_48 = arith.constant 0 : index
    %c0_49 = arith.constant 0 : index
    %c0_50 = arith.constant 0 : index
    %c0_51 = arith.constant 0 : index
    %111 = vector.load %arg9[%c0_48, %c0_49, %c0_50, %c0_51] : memref<1x1x4x256xf32, #tpu.memory_space<vmem>>, vector<1x1x4x256xf32>
    tpu.vector_store %arg9[%c0_48, %c0_49, %c0_50, %c0_51], %110 {strides = array<i32>} : memref<1x1x4x256xf32, #tpu.memory_space<vmem>>, vector<1x1x4x256xf32>,
    return
  }
  func.func @transform_0(%arg0: i32, %arg1: i32) -> (i32, i32, i32, i32) {
    %c-1_i32 = arith.constant -1 : i32
    %0 = arith.addi %arg1, %c-1_i32 : i32
    %c0_i32 = arith.constant 0 : i32
    %1 = arith.maxsi %0, %c0_i32 : i32
    %c7_i32 = arith.constant 7 : i32
    %2 = arith.minsi %1, %c7_i32 : i32
    %c0_i32_0 = arith.constant 0 : i32
    %c0_i32_1 = arith.constant 0 : i32
    %c0_i32_2 = arith.constant 0 : i32
    return %arg0, %2, %c0_i32_0, %c0_i32_1 : i32, i32, i32, i32
  }
  func.func @transform_1(%arg0: i32, %arg1: i32) -> (i32, i32, i32, i32) {
    %c0_i32 = arith.constant 0 : i32
    %0 = arith.addi %arg1, %c0_i32 : i32
    %c0_i32_0 = arith.constant 0 : i32
    %1 = arith.maxsi %0, %c0_i32_0 : i32
    %c7_i32 = arith.constant 7 : i32
    %2 = arith.minsi %1, %c7_i32 : i32
    %c0_i32_1 = arith.constant 0 : i32
    %c0_i32_2 = arith.constant 0 : i32
    %c0_i32_3 = arith.constant 0 : i32
    return %arg0, %2, %c0_i32_1, %c0_i32_2 : i32, i32, i32, i32
  }
  func.func @transform_2(%arg0: i32, %arg1: i32) -> (i32, i32, i32, i32) {
    %c1_i32 = arith.constant 1 : i32
    %0 = arith.addi %arg1, %c1_i32 : i32
    %c0_i32 = arith.constant 0 : i32
    %1 = arith.maxsi %0, %c0_i32 : i32
    %c7_i32 = arith.constant 7 : i32
    %2 = arith.minsi %1, %c7_i32 : i32
    %c0_i32_0 = arith.constant 0 : i32
    %c0_i32_1 = arith.constant 0 : i32
    %c0_i32_2 = arith.constant 0 : i32
    return %arg0, %2, %c0_i32_0, %c0_i32_1 : i32, i32, i32, i32
  }
  func.func @transform_3(%arg0: i32, %arg1: i32) -> (i32, i32) {
    %c0_i32 = arith.constant 0 : i32
    %c0_i32_0 = arith.constant 0 : i32
    %c0_i32_1 = arith.constant 0 : i32
    return %c0_i32, %c0_i32_0 : i32, i32
  }
  func.func @transform_4(%arg0: i32, %arg1: i32) -> (i32, i32) {
    %c0_i32 = arith.constant 0 : i32
    %c0_i32_0 = arith.constant 0 : i32
    %c0_i32_1 = arith.constant 0 : i32
    return %c0_i32, %c0_i32_0 : i32, i32
  }
  func.func @transform_5(%arg0: i32, %arg1: i32) -> (i32, i32) {
    %c0_i32 = arith.constant 0 : i32
    %c0_i32_0 = arith.constant 0 : i32
    %c0_i32_1 = arith.constant 0 : i32
    return %c0_i32, %c0_i32_0 : i32, i32
  }
  func.func @transform_6(%arg0: i32, %arg1: i32) -> (i32, i32) {
    %c0_i32 = arith.constant 0 : i32
    %c0_i32_0 = arith.constant 0 : i32
    %c0_i32_1 = arith.constant 0 : i32
    return %c0_i32, %c0_i32_0 : i32, i32
  }
  func.func @transform_7(%arg0: i32, %arg1: i32) -> (i32, i32, i32, i32) {
    %c0_i32 = arith.constant 0 : i32
    %c0_i32_0 = arith.constant 0 : i32
    %c0_i32_1 = arith.constant 0 : i32
    return %arg0, %arg1, %c0_i32, %c0_i32_0 : i32, i32, i32, i32
  }
}

module attributes {stable_mosaic.version = 11 : i64} {
  func.func @kernel(%arg0: i32, %arg1: i32, %arg2: memref<1x1x8x256xbf16, #tpu.memory_space<vmem>>, %arg3: memref<1x1x8x256xbf16, #tpu.memory_space<vmem>>, %arg4: memref<1x1x8x256xbf16, #tpu.memory_space<vmem>>, %arg5: memref<8x216xbf16, #tpu.memory_space<vmem>>, %arg6: memref<8x1xf32, #tpu.memory_space<vmem>>, %arg7: memref<8x1xf32, #tpu.memory_space<vmem>>, %arg8: memref<9x256xf32, #tpu.memory_space<vmem>>, %arg9: memref<1x1x8x256xbf16, #tpu.memory_space<vmem>>, %arg10: memref<1x1x8x256xbf16, #tpu.memory_space<vmem>>) attributes {dimension_semantics = [#tpu.dimension_semantics<parallel>, #tpu.dimension_semantics<parallel>], iteration_bounds = array<i64: 2, 8>, scalar_prefetch = 0 : i64, scratch_operands = 0 : i64, tpu.core_type = #tpu.core_type<tc>, window_params = [{transform_indices = @transform_0, window_bounds = array<i64: 1, 1, 8, 256>}, {transform_indices = @transform_1, window_bounds = array<i64: 1, 1, 8, 256>}, {transform_indices = @transform_2, window_bounds = array<i64: 1, 1, 8, 256>}, {pipeline_mode = #tpu.pipeline_mode<synchronous>, transform_indices = @transform_3, window_bounds = array<i64: 8, 216>}, {pipeline_mode = #tpu.pipeline_mode<synchronous>, transform_indices = @transform_4, window_bounds = array<i64: 8, 1>}, {pipeline_mode = #tpu.pipeline_mode<synchronous>, transform_indices = @transform_5, window_bounds = array<i64: 8, 1>}, {pipeline_mode = #tpu.pipeline_mode<synchronous>, transform_indices = @transform_6, window_bounds = array<i64: 9, 256>}, {transform_indices = @transform_7, window_bounds = array<i64: 1, 1, 8, 256>}, {transform_indices = @transform_8, window_bounds = array<i64: 1, 1, 8, 256>}]} {
    %c2_i32 = arith.constant 2 : i32
    %0 = arith.cmpi sge, %arg1, %c2_i32 : i32
    %cst = arith.constant 1.000000e+00 : f32
    %cst_0 = arith.constant 0.000000e+00 : f32
    %1 = arith.select %0, %cst, %cst_0 : f32
    %c2_i32_1 = arith.constant 2 : i32
    %2 = arith.addi %arg1, %c2_i32_1 : i32
    %c8_i32 = arith.constant 8 : i32
    %3 = arith.cmpi slt, %2, %c8_i32 : i32
    %cst_2 = arith.constant 1.000000e+00 : f32
    %cst_3 = arith.constant 0.000000e+00 : f32
    %4 = arith.select %3, %cst_2, %cst_3 : f32
    %c0 = arith.constant 0 : index
    %c0_4 = arith.constant 0 : index
    %c0_5 = arith.constant 0 : index
    %c0_6 = arith.constant 0 : index
    %5 = vector.load %arg2[%c0, %c0_4, %c0_5, %c0_6] : memref<1x1x8x256xbf16, #tpu.memory_space<vmem>>, vector<1x1x8x256xbf16>
    %6 = vector.shape_cast %5 : vector<1x1x8x256xbf16> to vector<8x256xbf16>
    %7 = arith.extf %6 : vector<8x256xbf16> to vector<8x256xf32>
    %8 = vector.broadcast %1 : f32 to vector<8x256xf32>
    %9 = arith.mulf %7, %8 : vector<8x256xf32>
    %c0_7 = arith.constant 0 : index
    %c0_8 = arith.constant 0 : index
    %c0_9 = arith.constant 0 : index
    %c0_10 = arith.constant 0 : index
    %10 = vector.load %arg3[%c0_7, %c0_8, %c0_9, %c0_10] : memref<1x1x8x256xbf16, #tpu.memory_space<vmem>>, vector<1x1x8x256xbf16>
    %11 = vector.shape_cast %10 : vector<1x1x8x256xbf16> to vector<8x256xbf16>
    %12 = arith.extf %11 : vector<8x256xbf16> to vector<8x256xf32>
    %c0_11 = arith.constant 0 : index
    %c0_12 = arith.constant 0 : index
    %c0_13 = arith.constant 0 : index
    %c0_14 = arith.constant 0 : index
    %13 = vector.load %arg4[%c0_11, %c0_12, %c0_13, %c0_14] : memref<1x1x8x256xbf16, #tpu.memory_space<vmem>>, vector<1x1x8x256xbf16>
    %14 = vector.shape_cast %13 : vector<1x1x8x256xbf16> to vector<8x256xbf16>
    %15 = arith.extf %14 : vector<8x256xbf16> to vector<8x256xf32>
    %16 = vector.broadcast %4 : f32 to vector<8x256xf32>
    %17 = arith.mulf %15, %16 : vector<8x256xf32>
    %c0_15 = arith.constant 0 : index
    %c0_16 = arith.constant 0 : index
    %18 = vector.load %arg8[%c0_15, %c0_16] : memref<9x256xf32, #tpu.memory_space<vmem>>, vector<1x256xf32>
    %c1 = arith.constant 1 : index
    %c0_17 = arith.constant 0 : index
    %19 = vector.load %arg8[%c1, %c0_17] : memref<9x256xf32, #tpu.memory_space<vmem>>, vector<1x256xf32>
    %c2 = arith.constant 2 : index
    %c0_18 = arith.constant 0 : index
    %20 = vector.load %arg8[%c2, %c0_18] : memref<9x256xf32, #tpu.memory_space<vmem>>, vector<1x256xf32>
    %c3 = arith.constant 3 : index
    %c0_19 = arith.constant 0 : index
    %21 = vector.load %arg8[%c3, %c0_19] : memref<9x256xf32, #tpu.memory_space<vmem>>, vector<1x256xf32>
    %c5 = arith.constant 5 : index
    %c0_20 = arith.constant 0 : index
    %22 = vector.load %arg8[%c5, %c0_20] : memref<9x256xf32, #tpu.memory_space<vmem>>, vector<1x256xf32>
    %c6 = arith.constant 6 : index
    %c0_21 = arith.constant 0 : index
    %23 = vector.load %arg8[%c6, %c0_21] : memref<9x256xf32, #tpu.memory_space<vmem>>, vector<1x256xf32>
    %c7 = arith.constant 7 : index
    %c0_22 = arith.constant 0 : index
    %24 = vector.load %arg8[%c7, %c0_22] : memref<9x256xf32, #tpu.memory_space<vmem>>, vector<1x256xf32>
    %c8 = arith.constant 8 : index
    %c0_23 = arith.constant 0 : index
    %25 = vector.load %arg8[%c8, %c0_23] : memref<9x256xf32, #tpu.memory_space<vmem>>, vector<1x256xf32>
    %c34_i32 = arith.constant 34 : i32
    %26 = tpu.dynamic_rotate %9 by %c34_i32 dim 1 : vector<8x256xf32>, i32 -> vector<8x256xf32>
    %27 = vector.broadcast %18 : vector<1x256xf32> to vector<8x256xf32>
    %28 = arith.mulf %26, %27 : vector<8x256xf32>
    %c32_i32 = arith.constant 32 : i32
    %29 = tpu.dynamic_rotate %9 by %c32_i32 dim 1 : vector<8x256xf32>, i32 -> vector<8x256xf32>
    %30 = vector.broadcast %19 : vector<1x256xf32> to vector<8x256xf32>
    %31 = arith.mulf %29, %30 : vector<8x256xf32>
    %c30_i32 = arith.constant 30 : i32
    %32 = tpu.dynamic_rotate %9 by %c30_i32 dim 1 : vector<8x256xf32>, i32 -> vector<8x256xf32>
    %33 = vector.broadcast %20 : vector<1x256xf32> to vector<8x256xf32>
    %34 = arith.mulf %32, %33 : vector<8x256xf32>
    %c2_i32_24 = arith.constant 2 : i32
    %35 = tpu.dynamic_rotate %9 by %c2_i32_24 dim 1 : vector<8x256xf32>, i32 -> vector<8x256xf32>
    %36 = vector.broadcast %21 : vector<1x256xf32> to vector<8x256xf32>
    %37 = arith.mulf %35, %36 : vector<8x256xf32>
    %c254_i32 = arith.constant 254 : i32
    %38 = tpu.dynamic_rotate %9 by %c254_i32 dim 1 : vector<8x256xf32>, i32 -> vector<8x256xf32>
    %39 = vector.broadcast %22 : vector<1x256xf32> to vector<8x256xf32>
    %40 = arith.mulf %38, %39 : vector<8x256xf32>
    %c226_i32 = arith.constant 226 : i32
    %41 = tpu.dynamic_rotate %9 by %c226_i32 dim 1 : vector<8x256xf32>, i32 -> vector<8x256xf32>
    %42 = vector.broadcast %23 : vector<1x256xf32> to vector<8x256xf32>
    %43 = arith.mulf %41, %42 : vector<8x256xf32>
    %c224_i32 = arith.constant 224 : i32
    %44 = tpu.dynamic_rotate %9 by %c224_i32 dim 1 : vector<8x256xf32>, i32 -> vector<8x256xf32>
    %45 = vector.broadcast %24 : vector<1x256xf32> to vector<8x256xf32>
    %46 = arith.mulf %44, %45 : vector<8x256xf32>
    %c222_i32 = arith.constant 222 : i32
    %47 = tpu.dynamic_rotate %9 by %c222_i32 dim 1 : vector<8x256xf32>, i32 -> vector<8x256xf32>
    %48 = vector.broadcast %25 : vector<1x256xf32> to vector<8x256xf32>
    %49 = arith.mulf %47, %48 : vector<8x256xf32>
    %c34_i32_25 = arith.constant 34 : i32
    %50 = tpu.dynamic_rotate %12 by %c34_i32_25 dim 1 : vector<8x256xf32>, i32 -> vector<8x256xf32>
    %51 = vector.broadcast %18 : vector<1x256xf32> to vector<8x256xf32>
    %52 = arith.mulf %50, %51 : vector<8x256xf32>
    %c32_i32_26 = arith.constant 32 : i32
    %53 = tpu.dynamic_rotate %12 by %c32_i32_26 dim 1 : vector<8x256xf32>, i32 -> vector<8x256xf32>
    %54 = vector.broadcast %19 : vector<1x256xf32> to vector<8x256xf32>
    %55 = arith.mulf %53, %54 : vector<8x256xf32>
    %c30_i32_27 = arith.constant 30 : i32
    %56 = tpu.dynamic_rotate %12 by %c30_i32_27 dim 1 : vector<8x256xf32>, i32 -> vector<8x256xf32>
    %57 = vector.broadcast %20 : vector<1x256xf32> to vector<8x256xf32>
    %58 = arith.mulf %56, %57 : vector<8x256xf32>
    %c2_i32_28 = arith.constant 2 : i32
    %59 = tpu.dynamic_rotate %12 by %c2_i32_28 dim 1 : vector<8x256xf32>, i32 -> vector<8x256xf32>
    %60 = vector.broadcast %21 : vector<1x256xf32> to vector<8x256xf32>
    %61 = arith.mulf %59, %60 : vector<8x256xf32>
    %c254_i32_29 = arith.constant 254 : i32
    %62 = tpu.dynamic_rotate %12 by %c254_i32_29 dim 1 : vector<8x256xf32>, i32 -> vector<8x256xf32>
    %63 = vector.broadcast %22 : vector<1x256xf32> to vector<8x256xf32>
    %64 = arith.mulf %62, %63 : vector<8x256xf32>
    %c226_i32_30 = arith.constant 226 : i32
    %65 = tpu.dynamic_rotate %12 by %c226_i32_30 dim 1 : vector<8x256xf32>, i32 -> vector<8x256xf32>
    %66 = vector.broadcast %23 : vector<1x256xf32> to vector<8x256xf32>
    %67 = arith.mulf %65, %66 : vector<8x256xf32>
    %c224_i32_31 = arith.constant 224 : i32
    %68 = tpu.dynamic_rotate %12 by %c224_i32_31 dim 1 : vector<8x256xf32>, i32 -> vector<8x256xf32>
    %69 = vector.broadcast %24 : vector<1x256xf32> to vector<8x256xf32>
    %70 = arith.mulf %68, %69 : vector<8x256xf32>
    %c222_i32_32 = arith.constant 222 : i32
    %71 = tpu.dynamic_rotate %12 by %c222_i32_32 dim 1 : vector<8x256xf32>, i32 -> vector<8x256xf32>
    %72 = vector.broadcast %25 : vector<1x256xf32> to vector<8x256xf32>
    %73 = arith.mulf %71, %72 : vector<8x256xf32>
    %c34_i32_33 = arith.constant 34 : i32
    %74 = tpu.dynamic_rotate %17 by %c34_i32_33 dim 1 : vector<8x256xf32>, i32 -> vector<8x256xf32>
    %75 = vector.broadcast %18 : vector<1x256xf32> to vector<8x256xf32>
    %76 = arith.mulf %74, %75 : vector<8x256xf32>
    %c32_i32_34 = arith.constant 32 : i32
    %77 = tpu.dynamic_rotate %17 by %c32_i32_34 dim 1 : vector<8x256xf32>, i32 -> vector<8x256xf32>
    %78 = vector.broadcast %19 : vector<1x256xf32> to vector<8x256xf32>
    %79 = arith.mulf %77, %78 : vector<8x256xf32>
    %c30_i32_35 = arith.constant 30 : i32
    %80 = tpu.dynamic_rotate %17 by %c30_i32_35 dim 1 : vector<8x256xf32>, i32 -> vector<8x256xf32>
    %81 = vector.broadcast %20 : vector<1x256xf32> to vector<8x256xf32>
    %82 = arith.mulf %80, %81 : vector<8x256xf32>
    %c2_i32_36 = arith.constant 2 : i32
    %83 = tpu.dynamic_rotate %17 by %c2_i32_36 dim 1 : vector<8x256xf32>, i32 -> vector<8x256xf32>
    %84 = vector.broadcast %21 : vector<1x256xf32> to vector<8x256xf32>
    %85 = arith.mulf %83, %84 : vector<8x256xf32>
    %c254_i32_37 = arith.constant 254 : i32
    %86 = tpu.dynamic_rotate %17 by %c254_i32_37 dim 1 : vector<8x256xf32>, i32 -> vector<8x256xf32>
    %87 = vector.broadcast %22 : vector<1x256xf32> to vector<8x256xf32>
    %88 = arith.mulf %86, %87 : vector<8x256xf32>
    %c226_i32_38 = arith.constant 226 : i32
    %89 = tpu.dynamic_rotate %17 by %c226_i32_38 dim 1 : vector<8x256xf32>, i32 -> vector<8x256xf32>
    %90 = vector.broadcast %23 : vector<1x256xf32> to vector<8x256xf32>
    %91 = arith.mulf %89, %90 : vector<8x256xf32>
    %c224_i32_39 = arith.constant 224 : i32
    %92 = tpu.dynamic_rotate %17 by %c224_i32_39 dim 1 : vector<8x256xf32>, i32 -> vector<8x256xf32>
    %93 = vector.broadcast %24 : vector<1x256xf32> to vector<8x256xf32>
    %94 = arith.mulf %92, %93 : vector<8x256xf32>
    %c222_i32_40 = arith.constant 222 : i32
    %95 = tpu.dynamic_rotate %17 by %c222_i32_40 dim 1 : vector<8x256xf32>, i32 -> vector<8x256xf32>
    %96 = vector.broadcast %25 : vector<1x256xf32> to vector<8x256xf32>
    %97 = arith.mulf %95, %96 : vector<8x256xf32>
    %98 = tpu.concatenate %28, %31, %34, %37, %9, %40, %43, %46, %49, %52, %55, %58, %61, %12, %64, %67 in 0 : vector<8x256xf32>, vector<8x256xf32>, vector<8x256xf32>, vector<8x256xf32>, vector<8x256xf32>, vector<8x256xf32>, vector<8x256xf32>, vector<8x256xf32>, vector<8x256xf32>, vector<8x256xf32>, vector<8x256xf32>, vector<8x256xf32>, vector<8x256xf32>, vector<8x256xf32>, vector<8x256xf32>, vector<8x256xf32> -> vector<128x256xf32>
    %99 = tpu.concatenate %70, %73, %76, %79, %82, %85, %17, %88, %91, %94, %97 in 0 : vector<8x256xf32>, vector<8x256xf32>, vector<8x256xf32>, vector<8x256xf32>, vector<8x256xf32>, vector<8x256xf32>, vector<8x256xf32>, vector<8x256xf32>, vector<8x256xf32>, vector<8x256xf32>, vector<8x256xf32> -> vector<88x256xf32>
    %100 = tpu.concatenate %98, %99 in 0 : vector<128x256xf32>, vector<88x256xf32> -> vector<216x256xf32>
    %101 = arith.truncf %100 : vector<216x256xf32> to vector<216x256xbf16>
    %c0_41 = arith.constant 0 : index
    %c0_42 = arith.constant 0 : index
    %102 = vector.load %arg5[%c0_41, %c0_42] : memref<8x216xbf16, #tpu.memory_space<vmem>>, vector<8x216xbf16>
    %cst_43 = arith.constant dense<0.000000e+00> : vector<8x256xf32>
    %103 = tpu.matmul %102, %101, %cst_43 {dimension_numbers = #tpu.dot_dimension_numbers<[1], [0], [0], [1], [0, 0, 1, 1], [], []>} : vector<8x216xbf16>, vector<216x256xbf16>, vector<8x256xf32> -> vector<8x256xf32>
    %c0_44 = arith.constant 0 : index
    %c0_45 = arith.constant 0 : index
    %104 = vector.load %arg6[%c0_44, %c0_45] : memref<8x1xf32, #tpu.memory_space<vmem>>, vector<8x1xf32>
    %105 = vector.broadcast %104 : vector<8x1xf32> to vector<8x256xf32>
    %106 = arith.mulf %103, %105 : vector<8x256xf32>
    %c0_46 = arith.constant 0 : index
    %c0_47 = arith.constant 0 : index
    %107 = vector.load %arg7[%c0_46, %c0_47] : memref<8x1xf32, #tpu.memory_space<vmem>>, vector<8x1xf32>
    %108 = vector.broadcast %107 : vector<8x1xf32> to vector<8x256xf32>
    %109 = arith.addf %106, %108 : vector<8x256xf32>
    %c0_48 = arith.constant 0 : index
    %c0_49 = arith.constant 0 : index
    %c0_50 = arith.constant 0 : index
    %c0_51 = arith.constant 0 : index
    %110 = vector.load %arg9[%c0_48, %c0_49, %c0_50, %c0_51] : memref<1x1x8x256xbf16, #tpu.memory_space<vmem>>, vector<1x1x8x256xbf16>
    %111 = vector.shape_cast %110 : vector<1x1x8x256xbf16> to vector<8x256xbf16>
    %112 = arith.extf %111 : vector<8x256xbf16> to vector<8x256xf32>
    %113 = arith.addf %109, %112 : vector<8x256xf32>
    %cst_52 = arith.constant 0.000000e+00 : f32
    %114 = vector.broadcast %cst_52 : f32 to vector<8x256xf32>
    %115 = arith.maximumf %113, %114 : vector<8x256xf32>
    %116 = vector.shape_cast %115 : vector<8x256xf32> to vector<1x1x8x256xf32>
    %117 = arith.truncf %116 : vector<1x1x8x256xf32> to vector<1x1x8x256xbf16>
    %c0_53 = arith.constant 0 : index
    %c0_54 = arith.constant 0 : index
    %c0_55 = arith.constant 0 : index
    %c0_56 = arith.constant 0 : index
    %118 = vector.load %arg10[%c0_53, %c0_54, %c0_55, %c0_56] : memref<1x1x8x256xbf16, #tpu.memory_space<vmem>>, vector<1x1x8x256xbf16>
    tpu.vector_store %arg10[%c0_53, %c0_54, %c0_55, %c0_56], %117 {strides = array<i32>} : memref<1x1x8x256xbf16, #tpu.memory_space<vmem>>, vector<1x1x8x256xbf16>,
    return
  }
  func.func @transform_0(%arg0: i32, %arg1: i32) -> (i32, i32, i32, i32) {
    %c-2_i32 = arith.constant -2 : i32
    %0 = arith.addi %arg1, %c-2_i32 : i32
    %c0_i32 = arith.constant 0 : i32
    %1 = arith.maxsi %0, %c0_i32 : i32
    %c7_i32 = arith.constant 7 : i32
    %2 = arith.minsi %1, %c7_i32 : i32
    %c0_i32_0 = arith.constant 0 : i32
    %c0_i32_1 = arith.constant 0 : i32
    %c0_i32_2 = arith.constant 0 : i32
    return %arg0, %2, %c0_i32_0, %c0_i32_1 : i32, i32, i32, i32
  }
  func.func @transform_1(%arg0: i32, %arg1: i32) -> (i32, i32, i32, i32) {
    %c0_i32 = arith.constant 0 : i32
    %0 = arith.addi %arg1, %c0_i32 : i32
    %c0_i32_0 = arith.constant 0 : i32
    %1 = arith.maxsi %0, %c0_i32_0 : i32
    %c7_i32 = arith.constant 7 : i32
    %2 = arith.minsi %1, %c7_i32 : i32
    %c0_i32_1 = arith.constant 0 : i32
    %c0_i32_2 = arith.constant 0 : i32
    %c0_i32_3 = arith.constant 0 : i32
    return %arg0, %2, %c0_i32_1, %c0_i32_2 : i32, i32, i32, i32
  }
  func.func @transform_2(%arg0: i32, %arg1: i32) -> (i32, i32, i32, i32) {
    %c2_i32 = arith.constant 2 : i32
    %0 = arith.addi %arg1, %c2_i32 : i32
    %c0_i32 = arith.constant 0 : i32
    %1 = arith.maxsi %0, %c0_i32 : i32
    %c7_i32 = arith.constant 7 : i32
    %2 = arith.minsi %1, %c7_i32 : i32
    %c0_i32_0 = arith.constant 0 : i32
    %c0_i32_1 = arith.constant 0 : i32
    %c0_i32_2 = arith.constant 0 : i32
    return %arg0, %2, %c0_i32_0, %c0_i32_1 : i32, i32, i32, i32
  }
  func.func @transform_3(%arg0: i32, %arg1: i32) -> (i32, i32) {
    %c0_i32 = arith.constant 0 : i32
    %c0_i32_0 = arith.constant 0 : i32
    %c0_i32_1 = arith.constant 0 : i32
    return %c0_i32, %c0_i32_0 : i32, i32
  }
  func.func @transform_4(%arg0: i32, %arg1: i32) -> (i32, i32) {
    %c0_i32 = arith.constant 0 : i32
    %c0_i32_0 = arith.constant 0 : i32
    %c0_i32_1 = arith.constant 0 : i32
    return %c0_i32, %c0_i32_0 : i32, i32
  }
  func.func @transform_5(%arg0: i32, %arg1: i32) -> (i32, i32) {
    %c0_i32 = arith.constant 0 : i32
    %c0_i32_0 = arith.constant 0 : i32
    %c0_i32_1 = arith.constant 0 : i32
    return %c0_i32, %c0_i32_0 : i32, i32
  }
  func.func @transform_6(%arg0: i32, %arg1: i32) -> (i32, i32) {
    %c0_i32 = arith.constant 0 : i32
    %c0_i32_0 = arith.constant 0 : i32
    %c0_i32_1 = arith.constant 0 : i32
    return %c0_i32, %c0_i32_0 : i32, i32
  }
  func.func @transform_7(%arg0: i32, %arg1: i32) -> (i32, i32, i32, i32) {
    %c0_i32 = arith.constant 0 : i32
    %c0_i32_0 = arith.constant 0 : i32
    %c0_i32_1 = arith.constant 0 : i32
    return %arg0, %arg1, %c0_i32, %c0_i32_0 : i32, i32, i32, i32
  }
  func.func @transform_8(%arg0: i32, %arg1: i32) -> (i32, i32, i32, i32) {
    %c0_i32 = arith.constant 0 : i32
    %c0_i32_0 = arith.constant 0 : i32
    %c0_i32_1 = arith.constant 0 : i32
    return %arg0, %arg1, %c0_i32, %c0_i32_0 : i32, i32, i32, i32
  }
}

</mosaic_0001>

<bundles_post_ra>
// kernel: segmentation_head_forward.8
= control target key start
LH: loop header
LB: loop body
LE: loop exit
PB: predicated region body
PF: predicated region fallthrough
CT: control target
= control target key end

     0   :  { %s1428_s27 = smov 0   ;;  %s1430_s28 = smov 0   ;;  %s1854_s0 = inlined_call_operand.vmem [shape: bf16[2,8,8,256], index: 0, kind: input, shape index: {}, may-alias: {0,1,2}]   ;;  %s1855_s1 = inlined_call_operand.vmem [shape: bf16[2,8,8,256], index: 1, kind: input, shape index: {}, may-alias: {0,1,2}]   ;;  %s1856_s2 = inlined_call_operand.vmem [shape: bf16[2,8,8,256], index: 2, kind: input, shape index: {}, may-alias: {0,1,2}]   ;;  %s1857_s3 = inlined_call_operand.vmem [shape: bf16[8,216], index: 3, kind: input, shape index: {}]   ;;  %s1858_s4 = inlined_call_operand.vmem [shape: f32[8,1], index: 4, kind: input, shape index: {}]   ;;  %s1859_s5 = inlined_call_operand.vmem [shape: f32[8,1], index: 5, kind: input, shape index: {}]   ;;  %s1860_s6 = inlined_call_operand.vmem [shape: f32[9,256], index: 6, kind: input, shape index: {}]   ;;  %s1861_s7 = inlined_call_operand.vmem [shape: bf16[2,8,8,256], index: 7, kind: input, shape index: {}]   ;;  %s1862_s8 = inlined_call_operand.vmem [shape: bf16[2,8,8,256], index: 8, kind: output, shape index: {}]  }
   0x1   :  { %s1432_s29 = smov 0   ;;  %s1434_s30 = smov 0  }
   0x2   :  { %s1436_s9 = smov 0  }
   0x3 LB: > { %s27_s10 = sadd.s32 1, %s1364_s29  ;;  %s30_s11 = sadd.s32 1, %s1368_s30  ;;  %s1372_s9 = sphi %s1436_s9, %s18_s9   ;;  %s1368_s30 = sphi %s1434_s30, %s1869_s30   ;;  %s1364_s29 = sphi %s1432_s29, %s1868_s29   ;;  %s1360_s28 = sphi %s1430_s28, %s1867_s28   ;;  %s1356_s27 = sphi %s1428_s27, %s1866_s27  }
   0x4   : > { %p28_p0 = scmp.ge.s32.totalorder %s27_s10, 8  ;;  %p1177_p1 = scmp.ge.s32.totalorder %s1372_s9, 1 }
   0x5   : > { %p386_p2 = scmp.lt.s32.totalorder %s1372_s9, 17 }
   0x6   : > { %s1871_s10 = smov (%p28_p0, %s27_s10), 0  ;;  %s1873_s11 = smov (!%p28_p0, %s30_s11), %s1368_s30 }
   0x7   : > { %p387_p3 = pnand %p1177_p1, %p386_p2  ;;  %p32_p4 = scmp.ge.s32.totalorder %s1873_s11, 2 }
   0x8   : > { %s469_s12 = sadd.s32 (!%p387_p3), 4294967295, %s1356_s27  ;;  %p474_p5 = scmp.lt.s32.totalorder (!%p387_p3), %s1360_s28, 1  ;;  %v1571_v16 = vld [vmem:[%s1857_s3] sm:$0xff] (!%p387_p3)  ;;  %vm903_vm0 = vcmask (!%p387_p3), 719872   ;;  %v1382_v18 = vmov (!%p387_p3), 0   ;;  %v582_v21 = vlaneseq (!%p387_p3)  ;;  %vm907_vm9 = vcmask (!%p387_p3), 1043456  }
   0x9   : > { %s1875_s11 = smov (%p32_p4, %s1873_s11), 0  ;;  %390 = sbr.rel (%p387_p3) target bundleno = 452 (0x1c4), region = 52 }
   0xa   : > { %p470_p6 = scmp.gt.s32.totalorder (!%p387_p3), %s469_s12, 0  ;;  %p1178_p7 = scmp.lt.s32.totalorder (!%p387_p3), %s469_s12, 7  ;;  %v1216_v17 = vcombine.high (!%p387_p3), %v1571_v16, %v1571_v16  ;;  %1330 = vset.pattern.permute.xlu0 (!%p387_p3), %v1382_v18  ;;  %1331 = vset.pattern.permute.xlu1 (!%p387_p3), %v1382_v18  ;;  %v955_v19 = vld [vmem:[%s1858_s4] sm:$0xff] (!%p387_p3)  ;;  %v589_v22 = vshrl.u32 (!%p387_p3), %v582_v21, 7  ;;  %v1589_v23 = vand.u32 (!%p387_p3), 127, %v582_v21 }
   0xb   : > { %p543_p8 = scmp.ge.s32.totalorder (!%p387_p3), %s1356_s27, 1  ;;  %p488_p10 = scmp.gt.s32.totalorder (!%p387_p3), %s1356_s27, 0  ;;  %v963_v20 = vld [vmem:[%s1859_s5] sm:$0xff] (!%p387_p3) }
   0xc   : > { %p1186_p11 = scmp.lt.s32.totalorder (!%p387_p3), %s1356_s27, 7  ;;  %s1374_s22 = smov (!%p387_p3), 16   ;;  %1218 = vmatprep.mubr.msk.bf16.mxu0 (!%p387_p3), %vm903_vm0, %v1216_v17  ;;  %v1591_v24 = vsub.s32 (!%p387_p3), 0, %v589_v22  ;;  %v1593_v25 = vsub.s32 (!%p387_p3), 1, %v589_v22  ;;  %vm604_vm1 = vcmp.lt.s32.totalorder (!%p387_p3), %v1589_v23, 16  ;;  %vm584_vm2 = vcmp.lt.s32.totalorder (!%p387_p3), %v1589_v23, 17 }
   0xd   : > { %s1375_s23 = smov (!%p387_p3), 17   ;;  %s1482_s24 = sadd.s32 (!%p387_p3), 1, %s1356_s27  ;;  %v1208_v26 = vld [vmem:[%s1860_s6 + $0x1] ss:$8 sm:$0x3] (!%p387_p3)  ;;  %vm624_vm3 = vcmp.lt.s32.totalorder (!%p387_p3), %v1589_v23, 15 }
   0xe   : > { %p506_p13 = scmp.gt.s32.totalorder (!%p387_p3), %s1482_s24, 0  ;;  %s1376_s25 = smov (!%p387_p3), 15   ;;  %v563_v27 = vld [vmem:[%s1860_s6] ss:$8 sm:$0x3] (!%p387_p3)  ;;  %v1604_v30 = vrot.slane (!%p387_p3), %v1208_v26, %v1591_v24  ;;  %v1613_v33 = vrot.slane (!%p387_p3), %v1208_v26, %v1593_v25  ;;  %vm644_vm4 = vcmp.lt.s32.totalorder (!%p387_p3), %v1589_v23, 1 }
   0xf   : > { %p1194_p0 = scmp.lt.s32.totalorder (!%p387_p3), %s1482_s24, 7  ;;  %p546_p2 = scmp.lt.s32.totalorder (!%p387_p3), %s1482_s24, 8  ;;  %v1607_v31 = vrot.slane (!%p387_p3), %v563_v27, %v1591_v24  ;;  %v1610_v32 = vrot.slane (!%p387_p3), %v563_v27, %v1593_v25  ;;  %v1209_v42 = vld [vmem:[%s1860_s6 + $0x2] ss:$8 sm:$0x3] (!%p387_p3)  ;;  %vm664_vm5 = vcmp.lt.s32.totalorder (!%p387_p3), %v1589_v23, 127 }
  0x10   : > { %s1877_s12 = smov (!%p470_p6, %s469_s12), 0  ;;  %s1879_s28 = smov (!%p474_p5, %s1360_s28), 1  ;;  %v1210_v45 = vld [vmem:[%s1860_s6 + $0x3] ss:$8 sm:$0x3]  ;;  %v1635_v50 = vrot.slane %v1209_v42, %v1591_v24  ;;  %v1638_v51 = vrot.slane %v1209_v42, %v1593_v25  ;;  %vm684_vm6 = vcmp.lt.s32.totalorder %v1589_v23, 113 }
  0x11   : > { %s1881_s12 = smov (!%p1178_p7, %s1877_s12), 7  ;;  %s1462_s13 = sshll.u32 %s1879_s28, 4  ;;  %v1642_v52 = vrot.slane %v1210_v45, %v1591_v24  ;;  %v1645_v53 = vrot.slane %v1210_v45, %v1593_v25  ;;  %v1211_v54 = vld [vmem:[%s1860_s6 + $0x5] ss:$8 sm:$0x3]  ;;  %vm704_vm7 = vcmp.lt.s32.totalorder %v1589_v23, 112 }
  0x12   : > { %p476_p9 = scmp.lt.s32.totalorder %s1881_s12, 7  ;;  %v1660_v61 = vrot.slane %v1211_v54, %v1591_v24  ;;  %v1663_v62 = vrot.slane %v1211_v54, %v1593_v25  ;;  %v1214_v45 = vld [vmem:[%s1860_s6 + $0x10] ss:$8 sm:$0x3]  ;;  %vm724_vm8 = vcmp.lt.s32.totalorder %v1589_v23, 111 }
  0x13   : > { %s544_s14 = scalar_select %p543_p8, 1.0, 0.0  ;;  %v1717_v54 = vrot.slane %v1214_v45, %v1593_v25 }
  0x14   : > { %s1883_s12 = smov (!%p476_p9, %s1881_s12), 7 }
  0x15   : > { %s1183_s15 = sshll.u32 %s1883_s12, 1  ;;  %v551_v1 = vstv %s544_s14  ;;  %s1377_s12 = smov 1  }
  0x16   : > { %s480_s16 = sadd.s32 %s1462_s13, %s1183_s15 }
  0x17   : > { %s1185_s17 = sshll.u32 %s480_s16, 2  ;;  %s1378_s16 = smov 127  }
  0x18   : > { %s482_s20 = scalar_lea.vmem %s1854_s0, %s1185_s17 }
  0x19   : > { %v548_v0 = vld [vmem:[%s482_s20] sm:$0xff]  ;;  %s489_s21 = scalar_select %p488_p10, %s1356_s27, 0 }
  0x1a   : > { %v549_v2 = vunpack.c.l.bf16 %v548_v0  ;;  %v550_v3 = vunpack.c.h.bf16 %v548_v0  ;;  %s507_s26 = scalar_select %p506_p13, %s1482_s24, 0 }
  0x1b   : > { %s1885_s21 = smov (!%p1186_p11, %s489_s21), 7  ;;  %s1379_s20 = smov 113  }
  0x1c   : > { %v1471_v4 = vmul.f32 %v551_v1, %v549_v2  ;;  %v1479_v5 = vmul.f32 %v551_v1, %v550_v3  ;;  %p494_p12 = scmp.lt.s32.totalorder %s1885_s21, 7  ;;  %s1889_s26 = smov (!%p1194_p0, %s507_s26), 7 }
  0x1d   : > { %p512_p1 = scmp.lt.s32.totalorder %s1889_s26, 7  ;;  %s1865_s24 = smov 112  }
  0x1e   : > { %600 = vrot.lane.b32.xlu1 %v1471_v4, %s1374_s22  ;;  %578 = vrot.lane.b32.xlu0 %v1471_v4, %s1375_s23  ;;  %s1887_s21 = smov (!%p494_p12, %s1885_s21), 7  ;;  %s1893_s27 = smov (!%p1186_p11, %s1356_s27), 7 }
  0x1f   : > { %s1191_s28 = sshll.u32 %s1887_s21, 1  ;;  %s1891_s26 = smov (!%p512_p1, %s1889_s26), 7 }
  0x20   : > { %s498_s14 = sadd.s32 %s1191_s28, %s1462_s13  ;;  %s1863_s21 = smov 112  }
  0x21   : > { %s1193_s15 = sshll.u32 %s498_s14, 2  ;;  %s1199_s28 = sshll.u32 %s1891_s26, 1 }
  0x22   : > { %602 = vrot.lane.b32.xlu1 %v1479_v5, %s1374_s22  ;;  %580 = vrot.lane.b32.xlu0 %v1479_v5, %s1375_s23  ;;  %s500_s19 = scalar_lea.vmem %s1855_s1, %s1193_s15  ;;  %s1381_s14 = smov 111  }
  0x23   : > { %v1511_v6 = vld [vmem:[%s500_s19] sm:$0xff]  ;;  %s516_s15 = sadd.s32 %s1199_s28, %s1462_s13  ;;  %s1202_s28 = sshll.u32 %s1893_s27, 1 }
  0x24   : > { %v555_v7 = vunpack.c.l.bf16 %v1511_v6  ;;  %v556_v8 = vunpack.c.h.bf16 %v1511_v6  ;;  %s1201_s17 = sshll.u32 %s516_s15, 2 }
  0x25   : > { %s518_s19 = scalar_lea.vmem %s1856_s2, %s1201_s17 }
  0x26   : > { %622 = vrot.lane.b32.xlu1 %v1479_v5, %s1376_s25  ;;  %620 = vrot.lane.b32.xlu0 %v1471_v4, %s1376_s25  ;;  %v1295_v9 = vpack.i.bf16 %v556_v8, %v555_v7  ;;  %v557_v10 = vld [vmem:[%s518_s19] sm:$0xff] }
  0x27   : > { %v559_v11 = vunpack.c.h.bf16 %v557_v10  ;;  %v558_v12 = vunpack.c.l.bf16 %v557_v10 }
  0x2a   : > { %642 = vrot.lane.b32.xlu1 %v1479_v5, %s1377_s12  ;;  %640 = vrot.lane.b32.xlu0 %v1471_v4, %s1377_s12 }
  0x2e   : > { %662 = vrot.lane.b32.xlu1 %v1479_v5, %s1378_s16  ;;  %660 = vrot.lane.b32.xlu0 %v1471_v4, %s1378_s16 }
  0x32   : > { %682 = vrot.lane.b32.xlu1 %v1479_v5, %s1379_s20  ;;  %680 = vrot.lane.b32.xlu0 %v1471_v4, %s1379_s20 }
  0x36   : > { %702 = vrot.lane.b32.xlu1 %v1479_v5, %s1863_s21  ;;  %700 = vrot.lane.b32.xlu0 %v1471_v4, %s1863_s21  ;;  %s547_s21 = scalar_select %p546_p2, 1.0, 0.0 }
  0x38   : > { %v560_v13 = vstv %s547_s21 }
  0x39   : > { %v1540_v14 = vmul.f32 %v560_v13, %v559_v11  ;;  %v1542_v15 = vmul.f32 %v560_v13, %v558_v12 }
  0x3a   : > { %722 = vrot.lane.b32.xlu1 %v1479_v5, %s1381_s14  ;;  %720 = vrot.lane.b32.xlu0 %v1471_v4, %s1381_s14 }
  0x3e   : > { %1296 = vrot.lane.b32.xlu1 %v1295_v9, %s1374_s22  ;;  %1291 = vrot.lane.b32.xlu0 %v1295_v9, %s1375_s23 }
  0x42   : > { %1306 = vrot.lane.b32.xlu1 %v1295_v9, %s1377_s12  ;;  %1301 = vrot.lane.b32.xlu0 %v1295_v9, %s1376_s25 }
  0x46   : > { %1316 = vrot.lane.b32.xlu1 %v1295_v9, %s1379_s20  ;;  %1311 = vrot.lane.b32.xlu0 %v1295_v9, %s1378_s16 }
  0x4a   : > { %1326 = vrot.lane.b32.xlu1 %v1295_v9, %s1381_s14  ;;  %1321 = vrot.lane.b32.xlu0 %v1295_v9, %s1865_s24 }
  0x4e   : > { %806 = vrot.lane.b32.xlu1 %v1540_v14, %s1375_s23  ;;  %804 = vrot.lane.b32.xlu0 %v1542_v15, %s1375_s23 }
  0x52   : > { %814 = vrot.lane.b32.xlu1 %v1540_v14, %s1374_s22  ;;  %812 = vrot.lane.b32.xlu0 %v1542_v15, %s1374_s22 }
  0x56   : > { %822 = vrot.lane.b32.xlu1 %v1540_v14, %s1376_s25  ;;  %820 = vrot.lane.b32.xlu0 %v1542_v15, %s1376_s25 }
  0x5a   : > { %830 = vrot.lane.b32.xlu1 %v1540_v14, %s1377_s12  ;;  %828 = vrot.lane.b32.xlu0 %v1542_v15, %s1377_s12 }
  0x5e   : > { %838 = vrot.lane.b32.xlu1 %v1540_v14, %s1378_s16  ;;  %836 = vrot.lane.b32.xlu0 %v1542_v15, %s1378_s16 }
  0x62   : > { %846 = vrot.lane.b32.xlu1 %v1540_v14, %s1379_s20  ;;  %844 = vrot.lane.b32.xlu0 %v1542_v15, %s1379_s20 }
  0x66   : > { %854 = vrot.lane.b32.xlu1 %v1540_v14, %s1865_s24  ;;  %852 = vrot.lane.b32.xlu0 %v1542_v15, %s1865_s24 }
  0x6a   : > { %862 = vrot.lane.b32.xlu1 %v1540_v14, %s1381_s14  ;;  %860 = vrot.lane.b32.xlu0 %v1542_v15, %s1381_s14  ;;  %s530_s14 = sadd.s32 %s1202_s28, %s1462_s13 }
  0x6b   : > { %s1204_s15 = sshll.u32 %s530_s14, 2 }
  0x6c   : > { %s532_s18 = scalar_lea.vmem %s1861_s7, %s1204_s15  ;;  %s541_s19 = scalar_lea.vmem %s1862_s8, %s1204_s15 }
  0x6e   : > { %958 = vperm.xlu0 %1330, %v955_v19   ;;  %966 = vperm.xlu1 %1331, %v963_v20   ;;  %v1212_v19 = vld [vmem:[%s1860_s6 + $0x6] ss:$8 sm:$0x3]  ;;  %v1213_v20 = vld [vmem:[%s1860_s6 + $0x7] ss:$8 sm:$0x3] }
  0x90   : > { %v601_v28 = vpop.permute.xlu1 %600  ;;  %v579_v29 = vpop.permute.xlu0 %578 }
  0x94   : > { %v603_v34 = vpop.permute.xlu1 %602  ;;  %v581_v35 = vpop.permute.xlu0 %580 }
  0x95   : > { %v605_v36 = vsel %vm604_vm1, %v601_v28, %v603_v34  ;;  %v606_v37 = vsel %vm604_vm1, %v603_v34, %v601_v28  ;;  %v585_v38 = vsel %vm584_vm2, %v579_v29, %v581_v35  ;;  %v586_v39 = vsel %vm584_vm2, %v581_v35, %v579_v29 }
  0x96   : > { %v618_v40 = vmul.f32 %v1604_v30, %v606_v37  ;;  %v598_v41 = vmul.f32 %v1607_v31, %v586_v39  ;;  %v599_v43 = vmul.f32 %v1610_v32, %v585_v38  ;;  %v619_v44 = vmul.f32 %v1613_v33, %v605_v36 }
  0x97   : > { %v1685_v28 = vrot.slane %v1212_v19, %v1591_v24  ;;  %v1688_v29 = vrot.slane %v1212_v19, %v1593_v25  ;;  %v1692_v34 = vrot.slane %v1213_v20, %v1591_v24  ;;  %v1695_v35 = vrot.slane %v1213_v20, %v1593_v25 }
  0x98   : > { %v623_v46 = vpop.permute.xlu1 %622  ;;  %v621_v47 = vpop.permute.xlu0 %620  ;;  %v869_v48 = vpack.c.bf16 %v619_v44, %v599_v43  ;;  %v868_v49 = vpack.c.bf16 %v618_v40, %v598_v41 }
  0x99   : > { %v625_v55 = vsel %vm624_vm3, %v621_v47, %v623_v46  ;;  %v626_v56 = vsel %vm624_vm3, %v623_v46, %v621_v47 }
  0x9a   : > { %914 = vmatprep.subr.bf16.mxu0 %v869_v48  ;;  %v638_v63 = vmul.f32 %v1635_v50, %v626_v56  ;;  %v639_v0 = vmul.f32 %v1638_v51, %v625_v55 }
  0x9b   : > { %915 = vmatpush1.bf16.msra.mxu0 %v868_v49  ;;  %v1714_v49 = vrot.slane %v1214_v45, %v1591_v24 }
  0x9c   : > { %v643_v57 = vpop.permute.xlu1 %642  ;;  %v641_v58 = vpop.permute.xlu0 %640 }
  0x9d   : > { %v645_v59 = vsel %vm644_vm4, %v641_v58, %v643_v57  ;;  %v646_v60 = vsel %vm644_vm4, %v643_v57, %v641_v58 }
  0x9e   : > { %v658_v1 = vmul.f32 %v1642_v52, %v646_v60  ;;  %v659_v2 = vmul.f32 %v1645_v53, %v645_v59 }
  0xa0   : > { %v663_v3 = vpop.permute.xlu1 %662  ;;  %v661_v9 = vpop.permute.xlu0 %660  ;;  %v871_v10 = vpack.c.bf16 %v659_v2, %v639_v0  ;;  %v870_v11 = vpack.c.bf16 %v658_v1, %v638_v63 }
  0xa1   : > { %v665_v12 = vsel %vm664_vm5, %v661_v9, %v663_v3  ;;  %v666_v13 = vsel %vm664_vm5, %v663_v3, %v661_v9 }
  0xa2   : > { %v678_v17 = vmul.f32 %v1660_v61, %v665_v12  ;;  %v679_v18 = vmul.f32 %v1663_v62, %v666_v13  ;;  %916 = vmatprep.subr.bf16.mxu0 %v871_v10 }
  0xa3   : > { %917 = vmatpush1.bf16.msra.mxu0 %v870_v11 }
  0xa4   : > { %v683_v21 = vpop.permute.xlu1 %682  ;;  %v681_v22 = vpop.permute.xlu0 %680  ;;  %v873_v26 = vpack.c.bf16 %v679_v18, %v1479_v5  ;;  %v872_v27 = vpack.c.bf16 %v678_v17, %v1471_v4 }
  0xa5   : > { %v685_v5 = vsel %vm684_vm6, %v681_v22, %v683_v21  ;;  %v686_v4 = vsel %vm684_vm6, %v683_v21, %v681_v22 }
  0xa6   : > { %918 = vmatprep.subr.bf16.mxu0 %v873_v26  ;;  %v698_v40 = vmul.f32 %v1685_v28, %v685_v5  ;;  %v699_v41 = vmul.f32 %v1688_v29, %v686_v4 }
  0xa7   : > { %919 = vmatpush1.bf16.msra.mxu0 %v872_v27 }
  0xa8   : > { %v703_v36 = vpop.permute.xlu1 %702  ;;  %v701_v37 = vpop.permute.xlu0 %700 }
  0xa9   : > { %v705_v38 = vsel %vm704_vm7, %v701_v37, %v703_v36  ;;  %v706_v39 = vsel %vm704_vm7, %v703_v36, %v701_v37 }
  0xaa   : > { %v718_v42 = vmul.f32 %v1692_v34, %v705_v38  ;;  %v719_v43 = vmul.f32 %v1695_v35, %v706_v39 }
  0xac   : > { %v723_v44 = vpop.permute.xlu1 %722  ;;  %v721_v46 = vpop.permute.xlu0 %720  ;;  %v875_v47 = vpack.c.bf16 %v719_v43, %v699_v41  ;;  %v874_v48 = vpack.c.bf16 %v718_v42, %v698_v40 }
  0xad   : > { %v725_v55 = vsel %vm724_vm8, %v721_v46, %v723_v44  ;;  %v726_v56 = vsel %vm724_vm8, %v723_v44, %v721_v46 }
  0xae   : > { %920 = vmatprep.subr.bf16.mxu0 %v875_v47  ;;  %v738_v1 = vmul.f32 %v1714_v49, %v725_v55  ;;  %v739_v3 = vmul.f32 %v1717_v54, %v726_v56 }
  0xaf   : > { %921 = vmatpush1.bf16.msra.mxu0 %v874_v48 }
  0xb0   : > { %v1297_v57 = vpop.permute.xlu1 %1296  ;;  %v1292_v58 = vpop.permute.xlu0 %1291 }
  0xb1   : > { %v1299_v59 = vunpack.i.h.bf16 %v1297_v57  ;;  %v1298_v60 = vunpack.i.l.bf16 %v1297_v57  ;;  %v1294_v63 = vunpack.i.h.bf16 %v1292_v58  ;;  %v1293_v0 = vunpack.i.l.bf16 %v1292_v58 }
  0xb3   : > { %v752_v24 = vsel %vm604_vm1, %v1298_v60, %v1299_v59  ;;  %v744_v25 = vsel %vm584_vm2, %v1293_v0, %v1294_v63  ;;  %v745_v2 = vsel %vm584_vm2, %v1294_v63, %v1293_v0  ;;  %v753_v9 = vsel %vm604_vm1, %v1299_v59, %v1298_v60 }
  0xb4   : > { %v1307_v10 = vpop.permute.xlu1 %1306  ;;  %v1302_v11 = vpop.permute.xlu0 %1301  ;;  %v747_v12 = vmul.f32 %v744_v25, %v1610_v32  ;;  %v746_v13 = vmul.f32 %v745_v2, %v1607_v31  ;;  %v755_v26 = vmul.f32 %v752_v24, %v1613_v33  ;;  %v754_v40 = vmul.f32 %v753_v9, %v1604_v30 }
  0xb5   : > { %v1309_v17 = vunpack.i.h.bf16 %v1307_v10  ;;  %v1308_v18 = vunpack.i.l.bf16 %v1307_v10  ;;  %v1304_v19 = vunpack.i.h.bf16 %v1302_v11  ;;  %v1303_v20 = vunpack.i.l.bf16 %v1302_v11 }
  0xb6   : > { %v877_v21 = vpack.c.bf16 %v747_v12, %v739_v3  ;;  %v876_v22 = vpack.c.bf16 %v746_v13, %v738_v1 }
  0xb7   : > { %v768_v27 = vsel %vm644_vm4, %v1308_v18, %v1309_v17  ;;  %v769_v5 = vsel %vm644_vm4, %v1309_v17, %v1308_v18  ;;  %v760_v4 = vsel %vm624_vm3, %v1303_v20, %v1304_v19  ;;  %v761_v36 = vsel %vm624_vm3, %v1304_v19, %v1303_v20 }
  0xb8   : > { %v1317_v37 = vpop.permute.xlu1 %1316  ;;  %v1312_v38 = vpop.permute.xlu0 %1311  ;;  %922 = vmatprep.subr.bf16.mxu0 %v877_v21  ;;  %v763_v39 = vmul.f32 %v760_v4, %v1638_v51  ;;  %v762_v41 = vmul.f32 %v761_v36, %v1635_v50  ;;  %v771_v42 = vmul.f32 %v768_v27, %v1645_v53  ;;  %v770_v55 = vmul.f32 %v769_v5, %v1642_v52 }
  0xb9   : > { %v1319_v43 = vunpack.i.h.bf16 %v1317_v37  ;;  %v1318_v44 = vunpack.i.l.bf16 %v1317_v37  ;;  %v1314_v45 = vunpack.i.h.bf16 %v1312_v38  ;;  %v1313_v46 = vunpack.i.l.bf16 %v1312_v38  ;;  %923 = vmatpush1.bf16.msra.mxu0 %v876_v22 }
  0xba   : > { %v879_v47 = vpack.c.bf16 %v763_v39, %v755_v26  ;;  %v878_v48 = vpack.c.bf16 %v762_v41, %v754_v40  ;;  %v881_v0 = vpack.c.bf16 %v556_v8, %v771_v42  ;;  %v880_v10 = vpack.c.bf16 %v555_v7, %v770_v55 }
  0xbb   : > { %v785_v56 = vsel %vm684_vm6, %v1319_v43, %v1318_v44  ;;  %v776_v57 = vsel %vm664_vm5, %v1313_v46, %v1314_v45  ;;  %v777_v58 = vsel %vm664_vm5, %v1314_v45, %v1313_v46  ;;  %v784_v59 = vsel %vm684_vm6, %v1318_v44, %v1319_v43 }
  0xbc   : > { %v1327_v60 = vpop.permute.xlu1 %1326  ;;  %v1322_v63 = vpop.permute.xlu0 %1321  ;;  %924 = vmatprep.subr.bf16.mxu0 %v879_v47  ;;  %v779_v1 = vmul.f32 %v777_v58, %v1663_v62  ;;  %v787_v24 = vmul.f32 %v785_v56, %v1688_v29  ;;  %v778_v11 = vmul.f32 %v776_v57, %v1660_v61  ;;  %v786_v17 = vmul.f32 %v784_v59, %v1685_v28 }
  0xbd   : > { %v1329_v25 = vunpack.i.h.bf16 %v1327_v60  ;;  %v1328_v2 = vunpack.i.l.bf16 %v1327_v60  ;;  %v1324_v3 = vunpack.i.h.bf16 %v1322_v63  ;;  %v1323_v9 = vunpack.i.l.bf16 %v1322_v63  ;;  %925 = vmatpush1.bf16.msra.mxu0 %v878_v48 }
  0xbe   : > { %926 = vmatprep.subr.bf16.mxu0 %v881_v0  ;;  %v883_v13 = vpack.c.bf16 %v787_v24, %v779_v1  ;;  %v882_v26 = vpack.c.bf16 %v786_v17, %v778_v11 }
  0xbf   : > { %v801_v12 = vsel %vm724_vm8, %v1329_v25, %v1328_v2  ;;  %v793_v8 = vsel %vm704_vm7, %v1324_v3, %v1323_v9  ;;  %v800_v18 = vsel %vm724_vm8, %v1328_v2, %v1329_v25  ;;  %v792_v19 = vsel %vm704_vm7, %v1323_v9, %v1324_v3 }
  0xc0   : > { %v807_v20 = vpop.permute.xlu1 %806  ;;  %v805_v6 = vpop.permute.xlu0 %804  ;;  %v795_v7 = vmul.f32 %v793_v8, %v1695_v35  ;;  %v803_v21 = vmul.f32 %v801_v12, %v1717_v54  ;;  %v794_v27 = vmul.f32 %v792_v19, %v1692_v34  ;;  %v802_v5 = vmul.f32 %v800_v18, %v1714_v49 }
  0xc1   : > { %927 = vmatpush1.bf16.msra.mxu0 %v880_v10  ;;  %v808_v22 = vsel %vm584_vm2, %v805_v6, %v807_v20  ;;  %v809_v40 = vsel %vm584_vm2, %v807_v20, %v805_v6 }
  0xc2   : > { %928 = vmatprep.subr.bf16.mxu0 %v883_v13  ;;  %v885_v37 = vpack.c.bf16 %v803_v21, %v795_v7  ;;  %v811_v41 = vmul.f32 %v808_v22, %v1610_v32  ;;  %v884_v44 = vpack.c.bf16 %v802_v5, %v794_v27  ;;  %v810_v48 = vmul.f32 %v809_v40, %v1607_v31 }
  0xc3   : > { %v1215_v27 = vcombine.low %v1571_v16, %v1571_v16 }
  0xc4   : > { %v815_v4 = vpop.permute.xlu1 %814  ;;  %v813_v36 = vpop.permute.xlu0 %812 }
  0xc5   : > { %v816_v38 = vsel %vm604_vm1, %v813_v36, %v815_v4  ;;  %v817_v39 = vsel %vm604_vm1, %v815_v4, %v813_v36  ;;  %929 = vmatpush1.bf16.msra.mxu0 %v882_v26 }
  0xc6   : > { %v819_v42 = vmul.f32 %v816_v38, %v1613_v33  ;;  %930 = vmatprep.subr.bf16.mxu0 %v885_v37  ;;  %v818_v43 = vmul.f32 %v817_v39, %v1604_v30 }
  0xc8   : > { %v823_v45 = vpop.permute.xlu1 %822  ;;  %v821_v46 = vpop.permute.xlu0 %820  ;;  %v887_v47 = vpack.c.bf16 %v819_v42, %v811_v41  ;;  %v886_v32 = vpack.c.bf16 %v818_v43, %v810_v48 }
  0xc9   : > { %931 = vmatpush1.bf16.msra.mxu0 %v884_v44  ;;  %v824_v55 = vsel %vm624_vm3, %v821_v46, %v823_v45  ;;  %v825_v56 = vsel %vm624_vm3, %v823_v45, %v821_v46 }
  0xca   : > { %932 = vmatprep.subr.bf16.mxu0 %v887_v47  ;;  %v826_v31 = vmul.f32 %v825_v56, %v1635_v50  ;;  %v827_v59 = vmul.f32 %v824_v55, %v1638_v51 }
  0xcc   : > { %v831_v57 = vpop.permute.xlu1 %830  ;;  %v829_v33 = vpop.permute.xlu0 %828 }
  0xcd   : > { %v832_v30 = vsel %vm644_vm4, %v829_v33, %v831_v57  ;;  %v833_v58 = vsel %vm644_vm4, %v831_v57, %v829_v33  ;;  %933 = vmatpush1.bf16.msra.mxu0 %v886_v32 }
  0xce   : > { %v834_v60 = vmul.f32 %v833_v58, %v1642_v52  ;;  %v835_v63 = vmul.f32 %v832_v30, %v1645_v53 }
  0xd0   : > { %v839_v0 = vpop.permute.xlu1 %838  ;;  %v837_v1 = vpop.permute.xlu0 %836  ;;  %v889_v24 = vpack.c.bf16 %v835_v63, %v827_v59  ;;  %v888_v25 = vpack.c.bf16 %v834_v60, %v826_v31 }
  0xd1   : > { %v840_v2 = vsel %vm664_vm5, %v837_v1, %v839_v0  ;;  %v841_v3 = vsel %vm664_vm5, %v839_v0, %v837_v1 }
  0xd2   : > { %v842_v9 = vmul.f32 %v840_v2, %v1660_v61  ;;  %v843_v50 = vmul.f32 %v841_v3, %v1663_v62  ;;  %934 = vmatprep.subr.bf16.mxu0 %v889_v24 }
  0xd3   : > { %935 = vmatpush1.bf16.msra.mxu0 %v888_v25 }
  0xd4   : > { %v847_v51 = vpop.permute.xlu1 %846  ;;  %v845_v52 = vpop.permute.xlu0 %844  ;;  %v891_v53 = vpack.c.bf16 %v843_v50, %v1540_v14  ;;  %v890_v10 = vpack.c.bf16 %v842_v9, %v1542_v15 }
  0xd5   : > { %v848_v11 = vsel %vm684_vm6, %v845_v52, %v847_v51  ;;  %v849_v12 = vsel %vm684_vm6, %v847_v51, %v845_v52 }
  0xd6   : > { %936 = vmatprep.subr.bf16.mxu0 %v891_v53  ;;  %v850_v14 = vmul.f32 %v848_v11, %v1685_v28  ;;  %v851_v15 = vmul.f32 %v849_v12, %v1688_v29 }
  0xd7   : > { %937 = vmatpush1.bf16.msra.mxu0 %v890_v10 }
  0xd8   : > { %v855_v8 = vpop.permute.xlu1 %854  ;;  %v853_v61 = vpop.permute.xlu0 %852 }
  0xd9   : > { %v856_v62 = vsel %vm704_vm7, %v853_v61, %v855_v8  ;;  %v857_v13 = vsel %vm704_vm7, %v855_v8, %v853_v61 }
  0xda   : > { %v858_v17 = vmul.f32 %v856_v62, %v1692_v34  ;;  %v859_v18 = vmul.f32 %v857_v13, %v1695_v35 }
  0xdc   : > { %v863_v19 = vpop.permute.xlu1 %862  ;;  %v861_v20 = vpop.permute.xlu0 %860  ;;  %v893_v6 = vpack.c.bf16 %v859_v18, %v851_v15  ;;  %v892_v7 = vpack.c.bf16 %v858_v17, %v850_v14 }
  0xdd   : > { %v864_v21 = vsel %vm724_vm8, %v861_v20, %v863_v19  ;;  %v865_v22 = vsel %vm724_vm8, %v863_v19, %v861_v20 }
  0xde   : > { %v866_v28 = vmul.f32 %v864_v21, %v1714_v49  ;;  %v867_v29 = vmul.f32 %v865_v22, %v1717_v54  ;;  %938 = vmatprep.subr.bf16.mxu0 %v893_v6  ;;  %v971_v49 = vld [vmem:[%s532_s18] sm:$0xff] }
  0xdf   : > { %939 = vmatpush1.bf16.msra.mxu0 %v892_v7  ;;  %v972_v37 = vunpack.c.l.bf16 %v971_v49  ;;  %v973_v16 = vunpack.c.h.bf16 %v971_v49 }
  0xe0   : > { %v894_v34 = vpack.c.bf16 %v866_v28, %v866_v28  ;;  %v895_v35 = vpack.c.bf16 %v867_v29, %v867_v29 }
  0xe2   : > { %1217 = vmatprep.subr.msk.bf16.mxu0 %vm907_vm9, %v895_v35  ;;  %v909_v26 = vsel %vm907_vm9, %v894_v34, 0 }
  0xe3   : > { %941 = vmatpush1.bf16.msra.mxu0 %v909_v26 }
  0xe6   : > { %947 = vmatmul.mubr.bf16.vlgmr.msra.gmra.mrb[0].mxu0 %v1215_v27 }
  0xed   : > { %v959_v23 = vpop.permute.xlu0 %958  ;;  %v967_v5 = vpop.permute.xlu1 %966 }
 0x1b9   : > { %v948_v54 = vpop.f32.mrb[0].mxu0 }
 0x1ba   : > { %v961_v4 = vmul.f32 %v959_v23, %v948_v54  ;;  %v950_v36 = vpop.f32.mrb[1].mxu0 }
 0x1bb   : > { %v962_v38 = vmul.f32 %v959_v23, %v950_v36  ;;  %v952_v39 = vpop.f32.mrb[2].mxu0 }
 0x1bc   : > { %v969_v40 = vadd.f32 %v967_v5, %v961_v4  ;;  %v953_v41 = vpop.f32.mrb[3].mxu0 }
 0x1bd   : > { %v970_v42 = vadd.f32 %v967_v5, %v962_v38 }
 0x1be   : > { %v974_v43 = vadd.f32 %v972_v37, %v969_v40 }
 0x1bf   : > { %v975_v44 = vadd.f32 %v973_v16, %v970_v42 }
 0x1c1   : > { %v1240_v45 = vpack.c.bf16 %v975_v44, %v974_v43 }
 0x1c3   : > { %984 = vst [vmem:[%s541_s19] sm:$0xff] %v1240_v45 }
 0x1c4 PF: > { %s18_s9 = sadd.s32 1, %s1372_s9   ;;  %s1866_s27 = smov %s1364_s29 }
 0x1c5   : > { %p15_p3 = scmp.ge.s32.totalorder %s18_s9, 18   ;;  %s1867_s28 = smov %s1368_s30 }
 0x1c6   : > { %s1868_s29 = smov %s1871_s10  ;;  %s1869_s30 = smov %s1875_s11 }
 0x1c7   :  { %17 = sbr.rel (!%p15_p3) target bundleno = 3 (0x3), region = 98 }

// kernel: segmentation_head_forward.7
= control target key start
LH: loop header
LB: loop body
LE: loop exit
PB: predicated region body
PF: predicated region fallthrough
CT: control target
= control target key end

     0   :  { %s1335_s24 = smov 0   ;;  %s1337_s25 = smov 0   ;;  %s1758_s0 = inlined_call_operand.vmem [shape: bf16[2,8,8,256], index: 0, kind: input, shape index: {}, may-alias: {0,1,2}]   ;;  %s1759_s1 = inlined_call_operand.vmem [shape: bf16[2,8,8,256], index: 1, kind: input, shape index: {}, may-alias: {0,1,2}]   ;;  %s1760_s2 = inlined_call_operand.vmem [shape: bf16[2,8,8,256], index: 2, kind: input, shape index: {}, may-alias: {0,1,2}]   ;;  %s1761_s3 = inlined_call_operand.vmem [shape: bf16[8,216], index: 3, kind: input, shape index: {}]   ;;  %s1762_s4 = inlined_call_operand.vmem [shape: f32[8,1], index: 4, kind: input, shape index: {}]   ;;  %s1763_s5 = inlined_call_operand.vmem [shape: f32[8,1], index: 5, kind: input, shape index: {}]   ;;  %s1764_s6 = inlined_call_operand.vmem [shape: f32[9,256], index: 6, kind: input, shape index: {}]   ;;  %s1765_s7 = inlined_call_operand.vmem [shape: bf16[2,8,8,256], index: 7, kind: output, shape index: {}]  }
   0x1   :  { %s1339_s26 = smov 0   ;;  %s1341_s27 = smov 0  }
   0x2   :  { %s1343_s28 = smov 0  }
   0x3 LB: > { %s26_s29 = sadd.s32 1, %s1276_s26  ;;  %s29_s30 = sadd.s32 1, %s1280_s27  ;;  %s1284_s28 = sphi %s1343_s28, %s17_s28   ;;  %s1280_s27 = sphi %s1341_s27, %s1769_s27   ;;  %s1276_s26 = sphi %s1339_s26, %s1768_s26   ;;  %s1272_s25 = sphi %s1337_s25, %s1767_s25   ;;  %s1268_s24 = sphi %s1335_s24, %s1766_s24  }
   0x4   : > { %p27_p0 = scmp.ge.s32.totalorder %s26_s29, 8  ;;  %p1092_p1 = scmp.ge.s32.totalorder %s1284_s28, 1 }
   0x5   : > { %p345_p2 = scmp.lt.s32.totalorder %s1284_s28, 17 }
   0x6   : > { %s1771_s29 = smov (%p27_p0, %s26_s29), 0  ;;  %s1773_s30 = smov (!%p27_p0, %s29_s30), %s1280_s27 }
   0x7   : > { %p346_p3 = pnand %p1092_p1, %p345_p2  ;;  %p31_p4 = scmp.ge.s32.totalorder %s1773_s30, 2 }
   0x8   : > { %s417_s8 = sadd.s32 (!%p346_p3), 4294967295, %s1268_s24  ;;  %p422_p5 = scmp.lt.s32.totalorder (!%p346_p3), %s1272_s25, 1  ;;  %v1478_v16 = vld [vmem:[%s1761_s3] sm:$0xff] (!%p346_p3)  ;;  %vm842_vm0 = vcmask (!%p346_p3), 719872   ;;  %v1294_v18 = vmov (!%p346_p3), 0   ;;  %v521_v21 = vlaneseq (!%p346_p3)  ;;  %vm846_vm9 = vcmask (!%p346_p3), 1043456  }
   0x9   : > { %s1775_s30 = smov (%p31_p4, %s1773_s30), 0  ;;  %349 = sbr.rel (%p346_p3) target bundleno = 452 (0x1c4), region = 48 }
   0xa   : > { %p418_p6 = scmp.gt.s32.totalorder (!%p346_p3), %s417_s8, 0  ;;  %p1093_p7 = scmp.lt.s32.totalorder (!%p346_p3), %s417_s8, 7  ;;  %v1128_v17 = vcombine.high (!%p346_p3), %v1478_v16, %v1478_v16  ;;  %1242 = vset.pattern.permute.xlu0 (!%p346_p3), %v1294_v18  ;;  %1243 = vset.pattern.permute.xlu1 (!%p346_p3), %v1294_v18  ;;  %v894_v19 = vld [vmem:[%s1762_s4] sm:$0xff] (!%p346_p3)  ;;  %v528_v22 = vshrl.u32 (!%p346_p3), %v521_v21, 7  ;;  %v1496_v23 = vand.u32 (!%p346_p3), 127, %v521_v21 }
   0xb   : > { %p482_p8 = scmp.ge.s32.totalorder (!%p346_p3), %s1268_s24, 1  ;;  %p436_p10 = scmp.gt.s32.totalorder (!%p346_p3), %s1268_s24, 0  ;;  %v902_v20 = vld [vmem:[%s1763_s5] sm:$0xff] (!%p346_p3) }
   0xc   : > { %p1101_p11 = scmp.lt.s32.totalorder (!%p346_p3), %s1268_s24, 7  ;;  %s1286_s18 = smov (!%p346_p3), 16   ;;  %1130 = vmatprep.mubr.msk.bf16.mxu0 (!%p346_p3), %vm842_vm0, %v1128_v17  ;;  %v1498_v24 = vsub.s32 (!%p346_p3), 0, %v528_v22  ;;  %v1500_v25 = vsub.s32 (!%p346_p3), 1, %v528_v22  ;;  %vm543_vm1 = vcmp.lt.s32.totalorder (!%p346_p3), %v1496_v23, 16  ;;  %vm523_vm2 = vcmp.lt.s32.totalorder (!%p346_p3), %v1496_v23, 17 }
   0xd   : > { %s1287_s19 = smov (!%p346_p3), 17   ;;  %s1389_s20 = sadd.s32 (!%p346_p3), 1, %s1268_s24  ;;  %v1120_v26 = vld [vmem:[%s1764_s6 + $0x1] ss:$8 sm:$0x3] (!%p346_p3)  ;;  %vm563_vm3 = vcmp.lt.s32.totalorder (!%p346_p3), %v1496_v23, 15 }
   0xe   : > { %p454_p13 = scmp.gt.s32.totalorder (!%p346_p3), %s1389_s20, 0  ;;  %s1288_s21 = smov (!%p346_p3), 15   ;;  %v502_v27 = vld [vmem:[%s1764_s6] ss:$8 sm:$0x3] (!%p346_p3)  ;;  %v1511_v30 = vrot.slane (!%p346_p3), %v1120_v26, %v1498_v24  ;;  %v1520_v33 = vrot.slane (!%p346_p3), %v1120_v26, %v1500_v25  ;;  %vm583_vm4 = vcmp.lt.s32.totalorder (!%p346_p3), %v1496_v23, 1 }
   0xf   : > { %p1109_p0 = scmp.lt.s32.totalorder (!%p346_p3), %s1389_s20, 7  ;;  %s1291_s15 = smov (!%p346_p3), 113   ;;  %v1514_v31 = vrot.slane (!%p346_p3), %v502_v27, %v1498_v24  ;;  %v1517_v32 = vrot.slane (!%p346_p3), %v502_v27, %v1500_v25  ;;  %v1121_v42 = vld [vmem:[%s1764_s6 + $0x2] ss:$8 sm:$0x3] (!%p346_p3)  ;;  %vm603_vm5 = vcmp.lt.s32.totalorder (!%p346_p3), %v1496_v23, 127 }
  0x10   : > { %s1777_s8 = smov (!%p418_p6, %s417_s8), 0  ;;  %s1779_s25 = smov (!%p422_p5, %s1272_s25), 1  ;;  %v1122_v45 = vld [vmem:[%s1764_s6 + $0x3] ss:$8 sm:$0x3]  ;;  %v1542_v50 = vrot.slane %v1121_v42, %v1498_v24  ;;  %v1545_v51 = vrot.slane %v1121_v42, %v1500_v25  ;;  %vm623_vm6 = vcmp.lt.s32.totalorder %v1496_v23, 113 }
  0x11   : > { %s1781_s8 = smov (!%p1093_p7, %s1777_s8), 7  ;;  %s1369_s9 = sshll.u32 %s1779_s25, 4  ;;  %v1549_v52 = vrot.slane %v1122_v45, %v1498_v24  ;;  %v1552_v53 = vrot.slane %v1122_v45, %v1500_v25  ;;  %v1123_v54 = vld [vmem:[%s1764_s6 + $0x5] ss:$8 sm:$0x3]  ;;  %vm643_vm7 = vcmp.lt.s32.totalorder %v1496_v23, 112 }
  0x12   : > { %p424_p9 = scmp.lt.s32.totalorder %s1781_s8, 7  ;;  %s1289_s25 = smov 1   ;;  %v1567_v61 = vrot.slane %v1123_v54, %v1498_v24  ;;  %v1570_v62 = vrot.slane %v1123_v54, %v1500_v25  ;;  %v1126_v45 = vld [vmem:[%s1764_s6 + $0x10] ss:$8 sm:$0x3]  ;;  %vm663_vm8 = vcmp.lt.s32.totalorder %v1496_v23, 111 }
  0x13   : > { %s483_s10 = scalar_select %p482_p8, 1.0, 0.0  ;;  %v1624_v54 = vrot.slane %v1126_v45, %v1500_v25 }
  0x14   : > { %s1783_s8 = smov (!%p424_p9, %s1781_s8), 7  ;;  %p485_p2 = scmp.lt.s32.totalorder %s1389_s20, 8 }
  0x15   : > { %s1098_s11 = sshll.u32 %s1783_s8, 1  ;;  %v490_v1 = vstv %s483_s10 }
  0x16   : > { %s428_s12 = sadd.s32 %s1369_s9, %s1098_s11  ;;  %s1290_s11 = smov 127  }
  0x17   : > { %s1100_s13 = sshll.u32 %s428_s12, 2 }
  0x18   : > { %s430_s16 = scalar_lea.vmem %s1758_s0, %s1100_s13 }
  0x19   : > { %v487_v0 = vld [vmem:[%s430_s16] sm:$0xff]  ;;  %s437_s17 = scalar_select %p436_p10, %s1268_s24, 0 }
  0x1a   : > { %v488_v2 = vunpack.c.l.bf16 %v487_v0  ;;  %v489_v3 = vunpack.c.h.bf16 %v487_v0  ;;  %s455_s22 = scalar_select %p454_p13, %s1389_s20, 0 }
  0x1b   : > { %s1785_s17 = smov (!%p1101_p11, %s437_s17), 7  ;;  %s1292_s16 = smov 112  }
  0x1c   : > { %v1378_v4 = vmul.f32 %v490_v1, %v488_v2  ;;  %v1386_v5 = vmul.f32 %v490_v1, %v489_v3  ;;  %p442_p12 = scmp.lt.s32.totalorder %s1785_s17, 7  ;;  %s1789_s22 = smov (!%p1109_p0, %s455_s22), 7 }
  0x1d   : > { %p460_p1 = scmp.lt.s32.totalorder %s1789_s22, 7  ;;  %s1793_s24 = smov (!%p1101_p11, %s1268_s24), 7 }
  0x1e   : > { %539 = vrot.lane.b32.xlu1 %v1378_v4, %s1286_s18  ;;  %517 = vrot.lane.b32.xlu0 %v1378_v4, %s1287_s19  ;;  %s1787_s17 = smov (!%p442_p12, %s1785_s17), 7 }
  0x1f   : > { %s1106_s23 = sshll.u32 %s1787_s17, 1  ;;  %s1791_s22 = smov (!%p460_p1, %s1789_s22), 7 }
  0x20   : > { %s446_s8 = sadd.s32 %s1106_s23, %s1369_s9  ;;  %s1114_s17 = sshll.u32 %s1791_s22, 1 }
  0x21   : > { %s1108_s10 = sshll.u32 %s446_s8, 2  ;;  %s1293_s23 = smov 111  }
  0x22   : > { %541 = vrot.lane.b32.xlu1 %v1386_v5, %s1286_s18  ;;  %519 = vrot.lane.b32.xlu0 %v1386_v5, %s1287_s19  ;;  %s448_s14 = scalar_lea.vmem %s1759_s1, %s1108_s10  ;;  %s464_s8 = sadd.s32 %s1114_s17, %s1369_s9 }
  0x23   : > { %v1418_v6 = vld [vmem:[%s448_s14] sm:$0xff]  ;;  %s1116_s10 = sshll.u32 %s464_s8, 2 }
  0x24   : > { %v494_v7 = vunpack.c.l.bf16 %v1418_v6  ;;  %v495_v8 = vunpack.c.h.bf16 %v1418_v6  ;;  %s466_s13 = scalar_lea.vmem %s1760_s2, %s1116_s10 }
  0x25   : > { %s486_s14 = scalar_select %p485_p2, 1.0, 0.0  ;;  %v496_v10 = vld [vmem:[%s466_s13] sm:$0xff] }
  0x26   : > { %561 = vrot.lane.b32.xlu1 %v1386_v5, %s1288_s21  ;;  %559 = vrot.lane.b32.xlu0 %v1378_v4, %s1288_s21  ;;  %v1207_v9 = vpack.i.bf16 %v495_v8, %v494_v7  ;;  %v498_v11 = vunpack.c.h.bf16 %v496_v10  ;;  %v497_v12 = vunpack.c.l.bf16 %v496_v10 }
  0x27   : > { %v499_v13 = vstv %s486_s14 }
  0x28   : > { %v1447_v14 = vmul.f32 %v499_v13, %v498_v11  ;;  %v1449_v15 = vmul.f32 %v499_v13, %v497_v12 }
  0x2a   : > { %581 = vrot.lane.b32.xlu1 %v1386_v5, %s1289_s25  ;;  %579 = vrot.lane.b32.xlu0 %v1378_v4, %s1289_s25 }
  0x2e   : > { %601 = vrot.lane.b32.xlu1 %v1386_v5, %s1290_s11  ;;  %599 = vrot.lane.b32.xlu0 %v1378_v4, %s1290_s11 }
  0x32   : > { %621 = vrot.lane.b32.xlu1 %v1386_v5, %s1291_s15  ;;  %619 = vrot.lane.b32.xlu0 %v1378_v4, %s1291_s15 }
  0x36   : > { %641 = vrot.lane.b32.xlu1 %v1386_v5, %s1292_s16  ;;  %639 = vrot.lane.b32.xlu0 %v1378_v4, %s1292_s16 }
  0x3a   : > { %661 = vrot.lane.b32.xlu1 %v1386_v5, %s1293_s23  ;;  %659 = vrot.lane.b32.xlu0 %v1378_v4, %s1293_s23 }
  0x3e   : > { %1208 = vrot.lane.b32.xlu1 %v1207_v9, %s1286_s18  ;;  %1203 = vrot.lane.b32.xlu0 %v1207_v9, %s1287_s19 }
  0x42   : > { %1218 = vrot.lane.b32.xlu1 %v1207_v9, %s1289_s25  ;;  %1213 = vrot.lane.b32.xlu0 %v1207_v9, %s1288_s21 }
  0x46   : > { %1228 = vrot.lane.b32.xlu1 %v1207_v9, %s1291_s15  ;;  %1223 = vrot.lane.b32.xlu0 %v1207_v9, %s1290_s11 }
  0x4a   : > { %1238 = vrot.lane.b32.xlu1 %v1207_v9, %s1293_s23  ;;  %1233 = vrot.lane.b32.xlu0 %v1207_v9, %s1292_s16 }
  0x4e   : > { %745 = vrot.lane.b32.xlu1 %v1447_v14, %s1287_s19  ;;  %743 = vrot.lane.b32.xlu0 %v1449_v15, %s1287_s19 }
  0x52   : > { %753 = vrot.lane.b32.xlu1 %v1447_v14, %s1286_s18  ;;  %751 = vrot.lane.b32.xlu0 %v1449_v15, %s1286_s18 }
  0x56   : > { %761 = vrot.lane.b32.xlu1 %v1447_v14, %s1288_s21  ;;  %759 = vrot.lane.b32.xlu0 %v1449_v15, %s1288_s21 }
  0x5a   : > { %769 = vrot.lane.b32.xlu1 %v1447_v14, %s1289_s25  ;;  %767 = vrot.lane.b32.xlu0 %v1449_v15, %s1289_s25 }
  0x5e   : > { %777 = vrot.lane.b32.xlu1 %v1447_v14, %s1290_s11  ;;  %775 = vrot.lane.b32.xlu0 %v1449_v15, %s1290_s11 }
  0x62   : > { %785 = vrot.lane.b32.xlu1 %v1447_v14, %s1291_s15  ;;  %783 = vrot.lane.b32.xlu0 %v1449_v15, %s1291_s15  ;;  %s1117_s15 = sshll.u32 %s1793_s24, 1 }
  0x66   : > { %793 = vrot.lane.b32.xlu1 %v1447_v14, %s1292_s16  ;;  %791 = vrot.lane.b32.xlu0 %v1449_v15, %s1292_s16  ;;  %s478_s16 = sadd.s32 %s1117_s15, %s1369_s9 }
  0x67   : > { %s1119_s17 = sshll.u32 %s478_s16, 2 }
  0x68   : > { %s480_s10 = scalar_lea.vmem %s1765_s7, %s1119_s17 }
  0x6a   : > { %801 = vrot.lane.b32.xlu1 %v1447_v14, %s1293_s23  ;;  %799 = vrot.lane.b32.xlu0 %v1449_v15, %s1293_s23 }
  0x6e   : > { %897 = vperm.xlu0 %1242, %v894_v19   ;;  %905 = vperm.xlu1 %1243, %v902_v20   ;;  %v1124_v19 = vld [vmem:[%s1764_s6 + $0x6] ss:$8 sm:$0x3]  ;;  %v1125_v20 = vld [vmem:[%s1764_s6 + $0x7] ss:$8 sm:$0x3] }
  0x90   : > { %v540_v28 = vpop.permute.xlu1 %539  ;;  %v518_v29 = vpop.permute.xlu0 %517 }
  0x94   : > { %v542_v34 = vpop.permute.xlu1 %541  ;;  %v520_v35 = vpop.permute.xlu0 %519 }
  0x95   : > { %v544_v36 = vsel %vm543_vm1, %v540_v28, %v542_v34  ;;  %v545_v37 = vsel %vm543_vm1, %v542_v34, %v540_v28  ;;  %v524_v38 = vsel %vm523_vm2, %v518_v29, %v520_v35  ;;  %v525_v39 = vsel %vm523_vm2, %v520_v35, %v518_v29 }
  0x96   : > { %v557_v40 = vmul.f32 %v1511_v30, %v545_v37  ;;  %v537_v41 = vmul.f32 %v1514_v31, %v525_v39  ;;  %v538_v43 = vmul.f32 %v1517_v32, %v524_v38  ;;  %v558_v44 = vmul.f32 %v1520_v33, %v544_v36 }
  0x97   : > { %v1592_v28 = vrot.slane %v1124_v19, %v1498_v24  ;;  %v1595_v29 = vrot.slane %v1124_v19, %v1500_v25  ;;  %v1599_v34 = vrot.slane %v1125_v20, %v1498_v24  ;;  %v1602_v35 = vrot.slane %v1125_v20, %v1500_v25 }
  0x98   : > { %v562_v46 = vpop.permute.xlu1 %561  ;;  %v560_v47 = vpop.permute.xlu0 %559  ;;  %v808_v48 = vpack.c.bf16 %v558_v44, %v538_v43  ;;  %v807_v49 = vpack.c.bf16 %v557_v40, %v537_v41 }
  0x99   : > { %v564_v55 = vsel %vm563_vm3, %v560_v47, %v562_v46  ;;  %v565_v56 = vsel %vm563_vm3, %v562_v46, %v560_v47 }
  0x9a   : > { %853 = vmatprep.subr.bf16.mxu0 %v808_v48  ;;  %v577_v63 = vmul.f32 %v1542_v50, %v565_v56  ;;  %v578_v0 = vmul.f32 %v1545_v51, %v564_v55 }
  0x9b   : > { %854 = vmatpush1.bf16.msra.mxu0 %v807_v49  ;;  %v1621_v49 = vrot.slane %v1126_v45, %v1498_v24 }
  0x9c   : > { %v582_v57 = vpop.permute.xlu1 %581  ;;  %v580_v58 = vpop.permute.xlu0 %579 }
  0x9d   : > { %v584_v59 = vsel %vm583_vm4, %v580_v58, %v582_v57  ;;  %v585_v60 = vsel %vm583_vm4, %v582_v57, %v580_v58 }
  0x9e   : > { %v597_v1 = vmul.f32 %v1549_v52, %v585_v60  ;;  %v598_v2 = vmul.f32 %v1552_v53, %v584_v59 }
  0xa0   : > { %v602_v3 = vpop.permute.xlu1 %601  ;;  %v600_v9 = vpop.permute.xlu0 %599  ;;  %v810_v10 = vpack.c.bf16 %v598_v2, %v578_v0  ;;  %v809_v11 = vpack.c.bf16 %v597_v1, %v577_v63 }
  0xa1   : > { %v604_v12 = vsel %vm603_vm5, %v600_v9, %v602_v3  ;;  %v605_v13 = vsel %vm603_vm5, %v602_v3, %v600_v9 }
  0xa2   : > { %v617_v17 = vmul.f32 %v1567_v61, %v604_v12  ;;  %v618_v18 = vmul.f32 %v1570_v62, %v605_v13  ;;  %855 = vmatprep.subr.bf16.mxu0 %v810_v10 }
  0xa3   : > { %856 = vmatpush1.bf16.msra.mxu0 %v809_v11 }
  0xa4   : > { %v622_v21 = vpop.permute.xlu1 %621  ;;  %v620_v22 = vpop.permute.xlu0 %619  ;;  %v812_v26 = vpack.c.bf16 %v618_v18, %v1386_v5  ;;  %v811_v27 = vpack.c.bf16 %v617_v17, %v1378_v4 }
  0xa5   : > { %v624_v5 = vsel %vm623_vm6, %v620_v22, %v622_v21  ;;  %v625_v4 = vsel %vm623_vm6, %v622_v21, %v620_v22 }
  0xa6   : > { %857 = vmatprep.subr.bf16.mxu0 %v812_v26  ;;  %v637_v40 = vmul.f32 %v1592_v28, %v624_v5  ;;  %v638_v41 = vmul.f32 %v1595_v29, %v625_v4 }
  0xa7   : > { %858 = vmatpush1.bf16.msra.mxu0 %v811_v27 }
  0xa8   : > { %v642_v36 = vpop.permute.xlu1 %641  ;;  %v640_v37 = vpop.permute.xlu0 %639 }
  0xa9   : > { %v644_v38 = vsel %vm643_vm7, %v640_v37, %v642_v36  ;;  %v645_v39 = vsel %vm643_vm7, %v642_v36, %v640_v37 }
  0xaa   : > { %v657_v42 = vmul.f32 %v1599_v34, %v644_v38  ;;  %v658_v43 = vmul.f32 %v1602_v35, %v645_v39 }
  0xac   : > { %v662_v44 = vpop.permute.xlu1 %661  ;;  %v660_v46 = vpop.permute.xlu0 %659  ;;  %v814_v47 = vpack.c.bf16 %v658_v43, %v638_v41  ;;  %v813_v48 = vpack.c.bf16 %v657_v42, %v637_v40 }
  0xad   : > { %v664_v55 = vsel %vm663_vm8, %v660_v46, %v662_v44  ;;  %v665_v56 = vsel %vm663_vm8, %v662_v44, %v660_v46 }
  0xae   : > { %859 = vmatprep.subr.bf16.mxu0 %v814_v47  ;;  %v677_v1 = vmul.f32 %v1621_v49, %v664_v55  ;;  %v678_v3 = vmul.f32 %v1624_v54, %v665_v56 }
  0xaf   : > { %860 = vmatpush1.bf16.msra.mxu0 %v813_v48 }
  0xb0   : > { %v1209_v57 = vpop.permute.xlu1 %1208  ;;  %v1204_v58 = vpop.permute.xlu0 %1203 }
  0xb1   : > { %v1211_v59 = vunpack.i.h.bf16 %v1209_v57  ;;  %v1210_v60 = vunpack.i.l.bf16 %v1209_v57  ;;  %v1206_v63 = vunpack.i.h.bf16 %v1204_v58  ;;  %v1205_v0 = vunpack.i.l.bf16 %v1204_v58 }
  0xb3   : > { %v691_v24 = vsel %vm543_vm1, %v1210_v60, %v1211_v59  ;;  %v683_v25 = vsel %vm523_vm2, %v1205_v0, %v1206_v63  ;;  %v684_v2 = vsel %vm523_vm2, %v1206_v63, %v1205_v0  ;;  %v692_v9 = vsel %vm543_vm1, %v1211_v59, %v1210_v60 }
  0xb4   : > { %v1219_v10 = vpop.permute.xlu1 %1218  ;;  %v1214_v11 = vpop.permute.xlu0 %1213  ;;  %v686_v12 = vmul.f32 %v683_v25, %v1517_v32  ;;  %v685_v13 = vmul.f32 %v684_v2, %v1514_v31  ;;  %v694_v26 = vmul.f32 %v691_v24, %v1520_v33  ;;  %v693_v40 = vmul.f32 %v692_v9, %v1511_v30 }
  0xb5   : > { %v1221_v17 = vunpack.i.h.bf16 %v1219_v10  ;;  %v1220_v18 = vunpack.i.l.bf16 %v1219_v10  ;;  %v1216_v19 = vunpack.i.h.bf16 %v1214_v11  ;;  %v1215_v20 = vunpack.i.l.bf16 %v1214_v11 }
  0xb6   : > { %v816_v21 = vpack.c.bf16 %v686_v12, %v678_v3  ;;  %v815_v22 = vpack.c.bf16 %v685_v13, %v677_v1 }
  0xb7   : > { %v707_v27 = vsel %vm583_vm4, %v1220_v18, %v1221_v17  ;;  %v708_v5 = vsel %vm583_vm4, %v1221_v17, %v1220_v18  ;;  %v699_v4 = vsel %vm563_vm3, %v1215_v20, %v1216_v19  ;;  %v700_v36 = vsel %vm563_vm3, %v1216_v19, %v1215_v20 }
  0xb8   : > { %v1229_v37 = vpop.permute.xlu1 %1228  ;;  %v1224_v38 = vpop.permute.xlu0 %1223  ;;  %861 = vmatprep.subr.bf16.mxu0 %v816_v21  ;;  %v702_v39 = vmul.f32 %v699_v4, %v1545_v51  ;;  %v701_v41 = vmul.f32 %v700_v36, %v1542_v50  ;;  %v710_v42 = vmul.f32 %v707_v27, %v1552_v53  ;;  %v709_v55 = vmul.f32 %v708_v5, %v1549_v52 }
  0xb9   : > { %v1231_v43 = vunpack.i.h.bf16 %v1229_v37  ;;  %v1230_v44 = vunpack.i.l.bf16 %v1229_v37  ;;  %v1226_v45 = vunpack.i.h.bf16 %v1224_v38  ;;  %v1225_v46 = vunpack.i.l.bf16 %v1224_v38  ;;  %862 = vmatpush1.bf16.msra.mxu0 %v815_v22 }
  0xba   : > { %v818_v47 = vpack.c.bf16 %v702_v39, %v694_v26  ;;  %v817_v48 = vpack.c.bf16 %v701_v41, %v693_v40  ;;  %v820_v0 = vpack.c.bf16 %v495_v8, %v710_v42  ;;  %v819_v10 = vpack.c.bf16 %v494_v7, %v709_v55 }
  0xbb   : > { %v724_v56 = vsel %vm623_vm6, %v1231_v43, %v1230_v44  ;;  %v715_v57 = vsel %vm603_vm5, %v1225_v46, %v1226_v45  ;;  %v716_v58 = vsel %vm603_vm5, %v1226_v45, %v1225_v46  ;;  %v723_v59 = vsel %vm623_vm6, %v1230_v44, %v1231_v43 }
  0xbc   : > { %v1239_v60 = vpop.permute.xlu1 %1238  ;;  %v1234_v63 = vpop.permute.xlu0 %1233  ;;  %863 = vmatprep.subr.bf16.mxu0 %v818_v47  ;;  %v718_v1 = vmul.f32 %v716_v58, %v1570_v62  ;;  %v726_v24 = vmul.f32 %v724_v56, %v1595_v29  ;;  %v717_v11 = vmul.f32 %v715_v57, %v1567_v61  ;;  %v725_v17 = vmul.f32 %v723_v59, %v1592_v28 }
  0xbd   : > { %v1241_v25 = vunpack.i.h.bf16 %v1239_v60  ;;  %v1240_v2 = vunpack.i.l.bf16 %v1239_v60  ;;  %v1236_v3 = vunpack.i.h.bf16 %v1234_v63  ;;  %v1235_v9 = vunpack.i.l.bf16 %v1234_v63  ;;  %864 = vmatpush1.bf16.msra.mxu0 %v817_v48 }
  0xbe   : > { %865 = vmatprep.subr.bf16.mxu0 %v820_v0  ;;  %v822_v13 = vpack.c.bf16 %v726_v24, %v718_v1  ;;  %v821_v26 = vpack.c.bf16 %v725_v17, %v717_v11 }
  0xbf   : > { %v740_v12 = vsel %vm663_vm8, %v1241_v25, %v1240_v2  ;;  %v732_v8 = vsel %vm643_vm7, %v1236_v3, %v1235_v9  ;;  %v739_v18 = vsel %vm663_vm8, %v1240_v2, %v1241_v25  ;;  %v731_v19 = vsel %vm643_vm7, %v1235_v9, %v1236_v3 }
  0xc0   : > { %v746_v20 = vpop.permute.xlu1 %745  ;;  %v744_v6 = vpop.permute.xlu0 %743  ;;  %v734_v7 = vmul.f32 %v732_v8, %v1602_v35  ;;  %v742_v21 = vmul.f32 %v740_v12, %v1624_v54  ;;  %v733_v27 = vmul.f32 %v731_v19, %v1599_v34  ;;  %v741_v5 = vmul.f32 %v739_v18, %v1621_v49 }
  0xc1   : > { %866 = vmatpush1.bf16.msra.mxu0 %v819_v10  ;;  %v747_v22 = vsel %vm523_vm2, %v744_v6, %v746_v20  ;;  %v748_v40 = vsel %vm523_vm2, %v746_v20, %v744_v6 }
  0xc2   : > { %867 = vmatprep.subr.bf16.mxu0 %v822_v13  ;;  %v824_v37 = vpack.c.bf16 %v742_v21, %v734_v7  ;;  %v750_v41 = vmul.f32 %v747_v22, %v1517_v32  ;;  %v823_v44 = vpack.c.bf16 %v741_v5, %v733_v27  ;;  %v749_v48 = vmul.f32 %v748_v40, %v1514_v31 }
  0xc3   : > { %v1127_v27 = vcombine.low %v1478_v16, %v1478_v16 }
  0xc4   : > { %v754_v4 = vpop.permute.xlu1 %753  ;;  %v752_v36 = vpop.permute.xlu0 %751 }
  0xc5   : > { %v755_v38 = vsel %vm543_vm1, %v752_v36, %v754_v4  ;;  %v756_v39 = vsel %vm543_vm1, %v754_v4, %v752_v36  ;;  %868 = vmatpush1.bf16.msra.mxu0 %v821_v26 }
  0xc6   : > { %v758_v42 = vmul.f32 %v755_v38, %v1520_v33  ;;  %869 = vmatprep.subr.bf16.mxu0 %v824_v37  ;;  %v757_v43 = vmul.f32 %v756_v39, %v1511_v30 }
  0xc8   : > { %v762_v45 = vpop.permute.xlu1 %761  ;;  %v760_v46 = vpop.permute.xlu0 %759  ;;  %v826_v47 = vpack.c.bf16 %v758_v42, %v750_v41  ;;  %v825_v32 = vpack.c.bf16 %v757_v43, %v749_v48 }
  0xc9   : > { %870 = vmatpush1.bf16.msra.mxu0 %v823_v44  ;;  %v763_v55 = vsel %vm563_vm3, %v760_v46, %v762_v45  ;;  %v764_v56 = vsel %vm563_vm3, %v762_v45, %v760_v46 }
  0xca   : > { %871 = vmatprep.subr.bf16.mxu0 %v826_v47  ;;  %v765_v31 = vmul.f32 %v764_v56, %v1542_v50  ;;  %v766_v59 = vmul.f32 %v763_v55, %v1545_v51 }
  0xcc   : > { %v770_v57 = vpop.permute.xlu1 %769  ;;  %v768_v33 = vpop.permute.xlu0 %767 }
  0xcd   : > { %v771_v30 = vsel %vm583_vm4, %v768_v33, %v770_v57  ;;  %v772_v58 = vsel %vm583_vm4, %v770_v57, %v768_v33  ;;  %872 = vmatpush1.bf16.msra.mxu0 %v825_v32 }
  0xce   : > { %v773_v60 = vmul.f32 %v772_v58, %v1549_v52  ;;  %v774_v63 = vmul.f32 %v771_v30, %v1552_v53 }
  0xd0   : > { %v778_v0 = vpop.permute.xlu1 %777  ;;  %v776_v1 = vpop.permute.xlu0 %775  ;;  %v828_v24 = vpack.c.bf16 %v774_v63, %v766_v59  ;;  %v827_v25 = vpack.c.bf16 %v773_v60, %v765_v31 }
  0xd1   : > { %v779_v2 = vsel %vm603_vm5, %v776_v1, %v778_v0  ;;  %v780_v3 = vsel %vm603_vm5, %v778_v0, %v776_v1 }
  0xd2   : > { %v781_v9 = vmul.f32 %v779_v2, %v1567_v61  ;;  %v782_v50 = vmul.f32 %v780_v3, %v1570_v62  ;;  %873 = vmatprep.subr.bf16.mxu0 %v828_v24 }
  0xd3   : > { %874 = vmatpush1.bf16.msra.mxu0 %v827_v25 }
  0xd4   : > { %v786_v51 = vpop.permute.xlu1 %785  ;;  %v784_v52 = vpop.permute.xlu0 %783  ;;  %v830_v53 = vpack.c.bf16 %v782_v50, %v1447_v14  ;;  %v829_v10 = vpack.c.bf16 %v781_v9, %v1449_v15 }
  0xd5   : > { %v787_v11 = vsel %vm623_vm6, %v784_v52, %v786_v51  ;;  %v788_v12 = vsel %vm623_vm6, %v786_v51, %v784_v52 }
  0xd6   : > { %875 = vmatprep.subr.bf16.mxu0 %v830_v53  ;;  %v789_v14 = vmul.f32 %v787_v11, %v1592_v28  ;;  %v790_v15 = vmul.f32 %v788_v12, %v1595_v29 }
  0xd7   : > { %876 = vmatpush1.bf16.msra.mxu0 %v829_v10 }
  0xd8   : > { %v794_v8 = vpop.permute.xlu1 %793  ;;  %v792_v61 = vpop.permute.xlu0 %791 }
  0xd9   : > { %v795_v62 = vsel %vm643_vm7, %v792_v61, %v794_v8  ;;  %v796_v13 = vsel %vm643_vm7, %v794_v8, %v792_v61 }
  0xda   : > { %v797_v17 = vmul.f32 %v795_v62, %v1599_v34  ;;  %v798_v18 = vmul.f32 %v796_v13, %v1602_v35 }
  0xdc   : > { %v802_v19 = vpop.permute.xlu1 %801  ;;  %v800_v20 = vpop.permute.xlu0 %799  ;;  %v832_v6 = vpack.c.bf16 %v798_v18, %v790_v15  ;;  %v831_v7 = vpack.c.bf16 %v797_v17, %v789_v14 }
  0xdd   : > { %v803_v21 = vsel %vm663_vm8, %v800_v20, %v802_v19  ;;  %v804_v22 = vsel %vm663_vm8, %v802_v19, %v800_v20 }
  0xde   : > { %v805_v28 = vmul.f32 %v803_v21, %v1621_v49  ;;  %v806_v29 = vmul.f32 %v804_v22, %v1624_v54  ;;  %877 = vmatprep.subr.bf16.mxu0 %v832_v6 }
  0xdf   : > { %878 = vmatpush1.bf16.msra.mxu0 %v831_v7 }
  0xe0   : > { %v833_v34 = vpack.c.bf16 %v805_v28, %v805_v28  ;;  %v834_v35 = vpack.c.bf16 %v806_v29, %v806_v29 }
  0xe2   : > { %1129 = vmatprep.subr.msk.bf16.mxu0 %vm846_vm9, %v834_v35  ;;  %v848_v26 = vsel %vm846_vm9, %v833_v34, 0 }
  0xe3   : > { %880 = vmatpush1.bf16.msra.mxu0 %v848_v26 }
  0xe6   : > { %886 = vmatmul.mubr.bf16.vlgmr.msra.gmra.mrb[0].mxu0 %v1127_v27 }
  0xed   : > { %v898_v23 = vpop.permute.xlu0 %897  ;;  %v906_v5 = vpop.permute.xlu1 %905 }
 0x1b9   : > { %v887_v49 = vpop.f32.mrb[0].mxu0 }
 0x1ba   : > { %v900_v54 = vmul.f32 %v898_v23, %v887_v49  ;;  %v889_v4 = vpop.f32.mrb[1].mxu0 }
 0x1bb   : > { %v901_v36 = vmul.f32 %v898_v23, %v889_v4  ;;  %v891_v37 = vpop.f32.mrb[2].mxu0 }
 0x1bc   : > { %v908_v38 = vadd.f32 %v906_v5, %v900_v54  ;;  %v892_v39 = vpop.f32.mrb[3].mxu0 }
 0x1bd   : > { %v909_v40 = vadd.f32 %v906_v5, %v901_v36 }
 0x1be   : > { %v910_v41 = vmax.f32 %v908_v38, 0.0 }
 0x1bf   : > { %v911_v42 = vmax.f32 %v909_v40, 0.0 }
 0x1c1   : > { %v1152_v16 = vpack.c.bf16 %v911_v42, %v910_v41 }
 0x1c3   : > { %920 = vst [vmem:[%s480_s10] sm:$0xff] %v1152_v16 }
 0x1c4 PF: > { %s17_s28 = sadd.s32 1, %s1284_s28   ;;  %s1766_s24 = smov %s1276_s26 }
 0x1c5   : > { %p14_p3 = scmp.ge.s32.totalorder %s17_s28, 18   ;;  %s1767_s25 = smov %s1280_s27 }
 0x1c6   : > { %s1768_s26 = smov %s1771_s29  ;;  %s1769_s27 = smov %s1775_s30 }
 0x1c7   :  { %16 = sbr.rel (!%p14_p3) target bundleno = 3 (0x3), region = 91 }

// kernel: segmentation_head_forward.9
= control target key start
LH: loop header
LB: loop body
LE: loop exit
PB: predicated region body
PF: predicated region fallthrough
CT: control target
= control target key end

     0   :  { %s1335_s24 = smov 0   ;;  %s1337_s25 = smov 0   ;;  %s1758_s0 = inlined_call_operand.vmem [shape: bf16[2,8,8,256], index: 0, kind: input, shape index: {}, may-alias: {0,1,2}]   ;;  %s1759_s1 = inlined_call_operand.vmem [shape: bf16[2,8,8,256], index: 1, kind: input, shape index: {}, may-alias: {0,1,2}]   ;;  %s1760_s2 = inlined_call_operand.vmem [shape: bf16[2,8,8,256], index: 2, kind: input, shape index: {}, may-alias: {0,1,2}]   ;;  %s1761_s3 = inlined_call_operand.vmem [shape: bf16[8,216], index: 3, kind: input, shape index: {}]   ;;  %s1762_s4 = inlined_call_operand.vmem [shape: f32[8,1], index: 4, kind: input, shape index: {}]   ;;  %s1763_s5 = inlined_call_operand.vmem [shape: f32[8,1], index: 5, kind: input, shape index: {}]   ;;  %s1764_s6 = inlined_call_operand.vmem [shape: f32[9,256], index: 6, kind: input, shape index: {}]   ;;  %s1765_s7 = inlined_call_operand.vmem [shape: bf16[2,8,8,256], index: 7, kind: output, shape index: {}]  }
   0x1   :  { %s1339_s26 = smov 0   ;;  %s1341_s27 = smov 0  }
   0x2   :  { %s1343_s28 = smov 0  }
   0x3 LB: > { %s26_s29 = sadd.s32 1, %s1276_s26  ;;  %s29_s30 = sadd.s32 1, %s1280_s27  ;;  %s1284_s28 = sphi %s1343_s28, %s17_s28   ;;  %s1280_s27 = sphi %s1341_s27, %s1769_s27   ;;  %s1276_s26 = sphi %s1339_s26, %s1768_s26   ;;  %s1272_s25 = sphi %s1337_s25, %s1767_s25   ;;  %s1268_s24 = sphi %s1335_s24, %s1766_s24  }
   0x4   : > { %p27_p0 = scmp.ge.s32.totalorder %s26_s29, 8  ;;  %p1092_p1 = scmp.ge.s32.totalorder %s1284_s28, 1 }
   0x5   : > { %p345_p2 = scmp.lt.s32.totalorder %s1284_s28, 17 }
   0x6   : > { %s1771_s29 = smov (%p27_p0, %s26_s29), 0  ;;  %s1773_s30 = smov (!%p27_p0, %s29_s30), %s1280_s27 }
   0x7   : > { %p346_p3 = pnand %p1092_p1, %p345_p2  ;;  %p31_p4 = scmp.ge.s32.totalorder %s1773_s30, 2 }
   0x8   : > { %s417_s8 = sadd.s32 (!%p346_p3), 4294967294, %s1268_s24  ;;  %p422_p5 = scmp.lt.s32.totalorder (!%p346_p3), %s1272_s25, 1  ;;  %v1478_v16 = vld [vmem:[%s1761_s3] sm:$0xff] (!%p346_p3)  ;;  %vm842_vm0 = vcmask (!%p346_p3), 719872   ;;  %v1294_v18 = vmov (!%p346_p3), 0   ;;  %v521_v21 = vlaneseq (!%p346_p3)  ;;  %vm846_vm9 = vcmask (!%p346_p3), 1043456  }
   0x9   : > { %s1775_s30 = smov (%p31_p4, %s1773_s30), 0  ;;  %349 = sbr.rel (%p346_p3) target bundleno = 452 (0x1c4), region = 48 }
   0xa   : > { %p418_p6 = scmp.gt.s32.totalorder (!%p346_p3), %s417_s8, 0  ;;  %p1093_p7 = scmp.lt.s32.totalorder (!%p346_p3), %s417_s8, 7  ;;  %v1128_v17 = vcombine.high (!%p346_p3), %v1478_v16, %v1478_v16  ;;  %1242 = vset.pattern.permute.xlu0 (!%p346_p3), %v1294_v18  ;;  %1243 = vset.pattern.permute.xlu1 (!%p346_p3), %v1294_v18  ;;  %v894_v19 = vld [vmem:[%s1762_s4] sm:$0xff] (!%p346_p3)  ;;  %v528_v22 = vshrl.u32 (!%p346_p3), %v521_v21, 7  ;;  %v1496_v23 = vand.u32 (!%p346_p3), 127, %v521_v21 }
   0xb   : > { %p482_p8 = scmp.ge.s32.totalorder (!%p346_p3), %s1268_s24, 2  ;;  %p436_p10 = scmp.gt.s32.totalorder (!%p346_p3), %s1268_s24, 0  ;;  %v902_v20 = vld [vmem:[%s1763_s5] sm:$0xff] (!%p346_p3) }
   0xc   : > { %p1101_p11 = scmp.lt.s32.totalorder (!%p346_p3), %s1268_s24, 7  ;;  %s1286_s18 = smov (!%p346_p3), 32   ;;  %1130 = vmatprep.mubr.msk.bf16.mxu0 (!%p346_p3), %vm842_vm0, %v1128_v17  ;;  %v1498_v24 = vsub.s32 (!%p346_p3), 0, %v528_v22  ;;  %v1500_v25 = vsub.s32 (!%p346_p3), 1, %v528_v22  ;;  %vm543_vm1 = vcmp.lt.s32.totalorder (!%p346_p3), %v1496_v23, 32  ;;  %vm523_vm2 = vcmp.lt.s32.totalorder (!%p346_p3), %v1496_v23, 34 }
   0xd   : > { %s1287_s19 = smov (!%p346_p3), 34   ;;  %s1389_s20 = sadd.s32 (!%p346_p3), 2, %s1268_s24  ;;  %v1120_v26 = vld [vmem:[%s1764_s6 + $0x1] ss:$8 sm:$0x3] (!%p346_p3)  ;;  %vm563_vm3 = vcmp.lt.s32.totalorder (!%p346_p3), %v1496_v23, 30 }
   0xe   : > { %p454_p13 = scmp.gt.s32.totalorder (!%p346_p3), %s1389_s20, 0  ;;  %s1288_s21 = smov (!%p346_p3), 30   ;;  %v502_v27 = vld [vmem:[%s1764_s6] ss:$8 sm:$0x3] (!%p346_p3)  ;;  %v1511_v30 = vrot.slane (!%p346_p3), %v1120_v26, %v1498_v24  ;;  %v1520_v33 = vrot.slane (!%p346_p3), %v1120_v26, %v1500_v25  ;;  %vm583_vm4 = vcmp.lt.s32.totalorder (!%p346_p3), %v1496_v23, 2 }
   0xf   : > { %p1109_p0 = scmp.lt.s32.totalorder (!%p346_p3), %s1389_s20, 7  ;;  %s1291_s15 = smov (!%p346_p3), 98   ;;  %v1514_v31 = vrot.slane (!%p346_p3), %v502_v27, %v1498_v24  ;;  %v1517_v32 = vrot.slane (!%p346_p3), %v502_v27, %v1500_v25  ;;  %v1121_v42 = vld [vmem:[%s1764_s6 + $0x2] ss:$8 sm:$0x3] (!%p346_p3)  ;;  %vm603_vm5 = vcmp.lt.s32.totalorder (!%p346_p3), %v1496_v23, 126 }
  0x10   : > { %s1777_s8 = smov (!%p418_p6, %s417_s8), 0  ;;  %s1779_s25 = smov (!%p422_p5, %s1272_s25), 1  ;;  %v1122_v45 = vld [vmem:[%s1764_s6 + $0x3] ss:$8 sm:$0x3]  ;;  %v1542_v50 = vrot.slane %v1121_v42, %v1498_v24  ;;  %v1545_v51 = vrot.slane %v1121_v42, %v1500_v25  ;;  %vm623_vm6 = vcmp.lt.s32.totalorder %v1496_v23, 98 }
  0x11   : > { %s1781_s8 = smov (!%p1093_p7, %s1777_s8), 7  ;;  %s1369_s9 = sshll.u32 %s1779_s25, 4  ;;  %v1549_v52 = vrot.slane %v1122_v45, %v1498_v24  ;;  %v1552_v53 = vrot.slane %v1122_v45, %v1500_v25  ;;  %v1123_v54 = vld [vmem:[%s1764_s6 + $0x5] ss:$8 sm:$0x3]  ;;  %vm643_vm7 = vcmp.lt.s32.totalorder %v1496_v23, 96 }
  0x12   : > { %p424_p9 = scmp.lt.s32.totalorder %s1781_s8, 7  ;;  %s1289_s25 = smov 2   ;;  %v1567_v61 = vrot.slane %v1123_v54, %v1498_v24  ;;  %v1570_v62 = vrot.slane %v1123_v54, %v1500_v25  ;;  %v1126_v45 = vld [vmem:[%s1764_s6 + $0x10] ss:$8 sm:$0x3]  ;;  %vm663_vm8 = vcmp.lt.s32.totalorder %v1496_v23, 94 }
  0x13   : > { %s483_s10 = scalar_select %p482_p8, 1.0, 0.0  ;;  %v1624_v54 = vrot.slane %v1126_v45, %v1500_v25 }
  0x14   : > { %s1783_s8 = smov (!%p424_p9, %s1781_s8), 7  ;;  %p485_p2 = scmp.lt.s32.totalorder %s1389_s20, 8 }
  0x15   : > { %s1098_s11 = sshll.u32 %s1783_s8, 1  ;;  %v490_v1 = vstv %s483_s10 }
  0x16   : > { %s428_s12 = sadd.s32 %s1369_s9, %s1098_s11  ;;  %s1290_s11 = smov 126  }
  0x17   : > { %s1100_s13 = sshll.u32 %s428_s12, 2 }
  0x18   : > { %s430_s16 = scalar_lea.vmem %s1758_s0, %s1100_s13 }
  0x19   : > { %v487_v0 = vld [vmem:[%s430_s16] sm:$0xff]  ;;  %s437_s17 = scalar_select %p436_p10, %s1268_s24, 0 }
  0x1a   : > { %v488_v2 = vunpack.c.l.bf16 %v487_v0  ;;  %v489_v3 = vunpack.c.h.bf16 %v487_v0  ;;  %s455_s22 = scalar_select %p454_p13, %s1389_s20, 0 }
  0x1b   : > { %s1785_s17 = smov (!%p1101_p11, %s437_s17), 7  ;;  %s1292_s16 = smov 96  }
  0x1c   : > { %v1378_v4 = vmul.f32 %v490_v1, %v488_v2  ;;  %v1386_v5 = vmul.f32 %v490_v1, %v489_v3  ;;  %p442_p12 = scmp.lt.s32.totalorder %s1785_s17, 7  ;;  %s1789_s22 = smov (!%p1109_p0, %s455_s22), 7 }
  0x1d   : > { %p460_p1 = scmp.lt.s32.totalorder %s1789_s22, 7  ;;  %s1793_s24 = smov (!%p1101_p11, %s1268_s24), 7 }
  0x1e   : > { %539 = vrot.lane.b32.xlu1 %v1378_v4, %s1286_s18  ;;  %517 = vrot.lane.b32.xlu0 %v1378_v4, %s1287_s19  ;;  %s1787_s17 = smov (!%p442_p12, %s1785_s17), 7 }
  0x1f   : > { %s1106_s23 = sshll.u32 %s1787_s17, 1  ;;  %s1791_s22 = smov (!%p460_p1, %s1789_s22), 7 }
  0x20   : > { %s446_s8 = sadd.s32 %s1106_s23, %s1369_s9  ;;  %s1114_s17 = sshll.u32 %s1791_s22, 1 }
  0x21   : > { %s1108_s10 = sshll.u32 %s446_s8, 2  ;;  %s1293_s23 = smov 94  }
  0x22   : > { %541 = vrot.lane.b32.xlu1 %v1386_v5, %s1286_s18  ;;  %519 = vrot.lane.b32.xlu0 %v1386_v5, %s1287_s19  ;;  %s448_s14 = scalar_lea.vmem %s1759_s1, %s1108_s10  ;;  %s464_s8 = sadd.s32 %s1114_s17, %s1369_s9 }
  0x23   : > { %v1418_v6 = vld [vmem:[%s448_s14] sm:$0xff]  ;;  %s1116_s10 = sshll.u32 %s464_s8, 2 }
  0x24   : > { %v494_v7 = vunpack.c.l.bf16 %v1418_v6  ;;  %v495_v8 = vunpack.c.h.bf16 %v1418_v6  ;;  %s466_s13 = scalar_lea.vmem %s1760_s2, %s1116_s10 }
  0x25   : > { %s486_s14 = scalar_select %p485_p2, 1.0, 0.0  ;;  %v496_v10 = vld [vmem:[%s466_s13] sm:$0xff] }
  0x26   : > { %561 = vrot.lane.b32.xlu1 %v1386_v5, %s1288_s21  ;;  %559 = vrot.lane.b32.xlu0 %v1378_v4, %s1288_s21  ;;  %v1207_v9 = vpack.i.bf16 %v495_v8, %v494_v7  ;;  %v498_v11 = vunpack.c.h.bf16 %v496_v10  ;;  %v497_v12 = vunpack.c.l.bf16 %v496_v10 }
  0x27   : > { %v499_v13 = vstv %s486_s14 }
  0x28   : > { %v1447_v14 = vmul.f32 %v499_v13, %v498_v11  ;;  %v1449_v15 = vmul.f32 %v499_v13, %v497_v12 }
  0x2a   : > { %581 = vrot.lane.b32.xlu1 %v1386_v5, %s1289_s25  ;;  %579 = vrot.lane.b32.xlu0 %v1378_v4, %s1289_s25 }
  0x2e   : > { %601 = vrot.lane.b32.xlu1 %v1386_v5, %s1290_s11  ;;  %599 = vrot.lane.b32.xlu0 %v1378_v4, %s1290_s11 }
  0x32   : > { %621 = vrot.lane.b32.xlu1 %v1386_v5, %s1291_s15  ;;  %619 = vrot.lane.b32.xlu0 %v1378_v4, %s1291_s15 }
  0x36   : > { %641 = vrot.lane.b32.xlu1 %v1386_v5, %s1292_s16  ;;  %639 = vrot.lane.b32.xlu0 %v1378_v4, %s1292_s16 }
  0x3a   : > { %661 = vrot.lane.b32.xlu1 %v1386_v5, %s1293_s23  ;;  %659 = vrot.lane.b32.xlu0 %v1378_v4, %s1293_s23 }
  0x3e   : > { %1208 = vrot.lane.b32.xlu1 %v1207_v9, %s1286_s18  ;;  %1203 = vrot.lane.b32.xlu0 %v1207_v9, %s1287_s19 }
  0x42   : > { %1218 = vrot.lane.b32.xlu1 %v1207_v9, %s1289_s25  ;;  %1213 = vrot.lane.b32.xlu0 %v1207_v9, %s1288_s21 }
  0x46   : > { %1228 = vrot.lane.b32.xlu1 %v1207_v9, %s1291_s15  ;;  %1223 = vrot.lane.b32.xlu0 %v1207_v9, %s1290_s11 }
  0x4a   : > { %1238 = vrot.lane.b32.xlu1 %v1207_v9, %s1293_s23  ;;  %1233 = vrot.lane.b32.xlu0 %v1207_v9, %s1292_s16 }
  0x4e   : > { %745 = vrot.lane.b32.xlu1 %v1447_v14, %s1287_s19  ;;  %743 = vrot.lane.b32.xlu0 %v1449_v15, %s1287_s19 }
  0x52   : > { %753 = vrot.lane.b32.xlu1 %v1447_v14, %s1286_s18  ;;  %751 = vrot.lane.b32.xlu0 %v1449_v15, %s1286_s18 }
  0x56   : > { %761 = vrot.lane.b32.xlu1 %v1447_v14, %s1288_s21  ;;  %759 = vrot.lane.b32.xlu0 %v1449_v15, %s1288_s21 }
  0x5a   : > { %769 = vrot.lane.b32.xlu1 %v1447_v14, %s1289_s25  ;;  %767 = vrot.lane.b32.xlu0 %v1449_v15, %s1289_s25 }
  0x5e   : > { %777 = vrot.lane.b32.xlu1 %v1447_v14, %s1290_s11  ;;  %775 = vrot.lane.b32.xlu0 %v1449_v15, %s1290_s11 }
  0x62   : > { %785 = vrot.lane.b32.xlu1 %v1447_v14, %s1291_s15  ;;  %783 = vrot.lane.b32.xlu0 %v1449_v15, %s1291_s15  ;;  %s1117_s15 = sshll.u32 %s1793_s24, 1 }
  0x66   : > { %793 = vrot.lane.b32.xlu1 %v1447_v14, %s1292_s16  ;;  %791 = vrot.lane.b32.xlu0 %v1449_v15, %s1292_s16  ;;  %s478_s16 = sadd.s32 %s1117_s15, %s1369_s9 }
  0x67   : > { %s1119_s17 = sshll.u32 %s478_s16, 2 }
  0x68   : > { %s480_s10 = scalar_lea.vmem %s1765_s7, %s1119_s17 }
  0x6a   : > { %801 = vrot.lane.b32.xlu1 %v1447_v14, %s1293_s23  ;;  %799 = vrot.lane.b32.xlu0 %v1449_v15, %s1293_s23 }
  0x6e   : > { %897 = vperm.xlu0 %1242, %v894_v19   ;;  %905 = vperm.xlu1 %1243, %v902_v20   ;;  %v1124_v19 = vld [vmem:[%s1764_s6 + $0x6] ss:$8 sm:$0x3]  ;;  %v1125_v20 = vld [vmem:[%s1764_s6 + $0x7] ss:$8 sm:$0x3] }
  0x90   : > { %v540_v28 = vpop.permute.xlu1 %539  ;;  %v518_v29 = vpop.permute.xlu0 %517 }
  0x94   : > { %v542_v34 = vpop.permute.xlu1 %541  ;;  %v520_v35 = vpop.permute.xlu0 %519 }
  0x95   : > { %v544_v36 = vsel %vm543_vm1, %v540_v28, %v542_v34  ;;  %v545_v37 = vsel %vm543_vm1, %v542_v34, %v540_v28  ;;  %v524_v38 = vsel %vm523_vm2, %v518_v29, %v520_v35  ;;  %v525_v39 = vsel %vm523_vm2, %v520_v35, %v518_v29 }
  0x96   : > { %v557_v40 = vmul.f32 %v1511_v30, %v545_v37  ;;  %v537_v41 = vmul.f32 %v1514_v31, %v525_v39  ;;  %v538_v43 = vmul.f32 %v1517_v32, %v524_v38  ;;  %v558_v44 = vmul.f32 %v1520_v33, %v544_v36 }
  0x97   : > { %v1592_v28 = vrot.slane %v1124_v19, %v1498_v24  ;;  %v1595_v29 = vrot.slane %v1124_v19, %v1500_v25  ;;  %v1599_v34 = vrot.slane %v1125_v20, %v1498_v24  ;;  %v1602_v35 = vrot.slane %v1125_v20, %v1500_v25 }
  0x98   : > { %v562_v46 = vpop.permute.xlu1 %561  ;;  %v560_v47 = vpop.permute.xlu0 %559  ;;  %v808_v48 = vpack.c.bf16 %v558_v44, %v538_v43  ;;  %v807_v49 = vpack.c.bf16 %v557_v40, %v537_v41 }
  0x99   : > { %v564_v55 = vsel %vm563_vm3, %v560_v47, %v562_v46  ;;  %v565_v56 = vsel %vm563_vm3, %v562_v46, %v560_v47 }
  0x9a   : > { %853 = vmatprep.subr.bf16.mxu0 %v808_v48  ;;  %v577_v63 = vmul.f32 %v1542_v50, %v565_v56  ;;  %v578_v0 = vmul.f32 %v1545_v51, %v564_v55 }
  0x9b   : > { %854 = vmatpush1.bf16.msra.mxu0 %v807_v49  ;;  %v1621_v49 = vrot.slane %v1126_v45, %v1498_v24 }
  0x9c   : > { %v582_v57 = vpop.permute.xlu1 %581  ;;  %v580_v58 = vpop.permute.xlu0 %579 }
  0x9d   : > { %v584_v59 = vsel %vm583_vm4, %v580_v58, %v582_v57  ;;  %v585_v60 = vsel %vm583_vm4, %v582_v57, %v580_v58 }
  0x9e   : > { %v597_v1 = vmul.f32 %v1549_v52, %v585_v60  ;;  %v598_v2 = vmul.f32 %v1552_v53, %v584_v59 }
  0xa0   : > { %v602_v3 = vpop.permute.xlu1 %601  ;;  %v600_v9 = vpop.permute.xlu0 %599  ;;  %v810_v10 = vpack.c.bf16 %v598_v2, %v578_v0  ;;  %v809_v11 = vpack.c.bf16 %v597_v1, %v577_v63 }
  0xa1   : > { %v604_v12 = vsel %vm603_vm5, %v600_v9, %v602_v3  ;;  %v605_v13 = vsel %vm603_vm5, %v602_v3, %v600_v9 }
  0xa2   : > { %v617_v17 = vmul.f32 %v1567_v61, %v604_v12  ;;  %v618_v18 = vmul.f32 %v1570_v62, %v605_v13  ;;  %855 = vmatprep.subr.bf16.mxu0 %v810_v10 }
  0xa3   : > { %856 = vmatpush1.bf16.msra.mxu0 %v809_v11 }
  0xa4   : > { %v622_v21 = vpop.permute.xlu1 %621  ;;  %v620_v22 = vpop.permute.xlu0 %619  ;;  %v812_v26 = vpack.c.bf16 %v618_v18, %v1386_v5  ;;  %v811_v27 = vpack.c.bf16 %v617_v17, %v1378_v4 }
  0xa5   : > { %v624_v5 = vsel %vm623_vm6, %v620_v22, %v622_v21  ;;  %v625_v4 = vsel %vm623_vm6, %v622_v21, %v620_v22 }
  0xa6   : > { %857 = vmatprep.subr.bf16.mxu0 %v812_v26  ;;  %v637_v40 = vmul.f32 %v1592_v28, %v624_v5  ;;  %v638_v41 = vmul.f32 %v1595_v29, %v625_v4 }
  0xa7   : > { %858 = vmatpush1.bf16.msra.mxu0 %v811_v27 }
  0xa8   : > { %v642_v36 = vpop.permute.xlu1 %641  ;;  %v640_v37 = vpop.permute.xlu0 %639 }
  0xa9   : > { %v644_v38 = vsel %vm643_vm7, %v640_v37, %v642_v36  ;;  %v645_v39 = vsel %vm643_vm7, %v642_v36, %v640_v37 }
  0xaa   : > { %v657_v42 = vmul.f32 %v1599_v34, %v644_v38  ;;  %v658_v43 = vmul.f32 %v1602_v35, %v645_v39 }
  0xac   : > { %v662_v44 = vpop.permute.xlu1 %661  ;;  %v660_v46 = vpop.permute.xlu0 %659  ;;  %v814_v47 = vpack.c.bf16 %v658_v43, %v638_v41  ;;  %v813_v48 = vpack.c.bf16 %v657_v42, %v637_v40 }
  0xad   : > { %v664_v55 = vsel %vm663_vm8, %v660_v46, %v662_v44  ;;  %v665_v56 = vsel %vm663_vm8, %v662_v44, %v660_v46 }
  0xae   : > { %859 = vmatprep.subr.bf16.mxu0 %v814_v47  ;;  %v677_v1 = vmul.f32 %v1621_v49, %v664_v55  ;;  %v678_v3 = vmul.f32 %v1624_v54, %v665_v56 }
  0xaf   : > { %860 = vmatpush1.bf16.msra.mxu0 %v813_v48 }
  0xb0   : > { %v1209_v57 = vpop.permute.xlu1 %1208  ;;  %v1204_v58 = vpop.permute.xlu0 %1203 }
  0xb1   : > { %v1211_v59 = vunpack.i.h.bf16 %v1209_v57  ;;  %v1210_v60 = vunpack.i.l.bf16 %v1209_v57  ;;  %v1206_v63 = vunpack.i.h.bf16 %v1204_v58  ;;  %v1205_v0 = vunpack.i.l.bf16 %v1204_v58 }
  0xb3   : > { %v691_v24 = vsel %vm543_vm1, %v1210_v60, %v1211_v59  ;;  %v683_v25 = vsel %vm523_vm2, %v1205_v0, %v1206_v63  ;;  %v684_v2 = vsel %vm523_vm2, %v1206_v63, %v1205_v0  ;;  %v692_v9 = vsel %vm543_vm1, %v1211_v59, %v1210_v60 }
  0xb4   : > { %v1219_v10 = vpop.permute.xlu1 %1218  ;;  %v1214_v11 = vpop.permute.xlu0 %1213  ;;  %v686_v12 = vmul.f32 %v683_v25, %v1517_v32  ;;  %v685_v13 = vmul.f32 %v684_v2, %v1514_v31  ;;  %v694_v26 = vmul.f32 %v691_v24, %v1520_v33  ;;  %v693_v40 = vmul.f32 %v692_v9, %v1511_v30 }
  0xb5   : > { %v1221_v17 = vunpack.i.h.bf16 %v1219_v10  ;;  %v1220_v18 = vunpack.i.l.bf16 %v1219_v10  ;;  %v1216_v19 = vunpack.i.h.bf16 %v1214_v11  ;;  %v1215_v20 = vunpack.i.l.bf16 %v1214_v11 }
  0xb6   : > { %v816_v21 = vpack.c.bf16 %v686_v12, %v678_v3  ;;  %v815_v22 = vpack.c.bf16 %v685_v13, %v677_v1 }
  0xb7   : > { %v707_v27 = vsel %vm583_vm4, %v1220_v18, %v1221_v17  ;;  %v708_v5 = vsel %vm583_vm4, %v1221_v17, %v1220_v18  ;;  %v699_v4 = vsel %vm563_vm3, %v1215_v20, %v1216_v19  ;;  %v700_v36 = vsel %vm563_vm3, %v1216_v19, %v1215_v20 }
  0xb8   : > { %v1229_v37 = vpop.permute.xlu1 %1228  ;;  %v1224_v38 = vpop.permute.xlu0 %1223  ;;  %861 = vmatprep.subr.bf16.mxu0 %v816_v21  ;;  %v702_v39 = vmul.f32 %v699_v4, %v1545_v51  ;;  %v701_v41 = vmul.f32 %v700_v36, %v1542_v50  ;;  %v710_v42 = vmul.f32 %v707_v27, %v1552_v53  ;;  %v709_v55 = vmul.f32 %v708_v5, %v1549_v52 }
  0xb9   : > { %v1231_v43 = vunpack.i.h.bf16 %v1229_v37  ;;  %v1230_v44 = vunpack.i.l.bf16 %v1229_v37  ;;  %v1226_v45 = vunpack.i.h.bf16 %v1224_v38  ;;  %v1225_v46 = vunpack.i.l.bf16 %v1224_v38  ;;  %862 = vmatpush1.bf16.msra.mxu0 %v815_v22 }
  0xba   : > { %v818_v47 = vpack.c.bf16 %v702_v39, %v694_v26  ;;  %v817_v48 = vpack.c.bf16 %v701_v41, %v693_v40  ;;  %v820_v0 = vpack.c.bf16 %v495_v8, %v710_v42  ;;  %v819_v10 = vpack.c.bf16 %v494_v7, %v709_v55 }
  0xbb   : > { %v724_v56 = vsel %vm623_vm6, %v1231_v43, %v1230_v44  ;;  %v715_v57 = vsel %vm603_vm5, %v1225_v46, %v1226_v45  ;;  %v716_v58 = vsel %vm603_vm5, %v1226_v45, %v1225_v46  ;;  %v723_v59 = vsel %vm623_vm6, %v1230_v44, %v1231_v43 }
  0xbc   : > { %v1239_v60 = vpop.permute.xlu1 %1238  ;;  %v1234_v63 = vpop.permute.xlu0 %1233  ;;  %863 = vmatprep.subr.bf16.mxu0 %v818_v47  ;;  %v718_v1 = vmul.f32 %v716_v58, %v1570_v62  ;;  %v726_v24 = vmul.f32 %v724_v56, %v1595_v29  ;;  %v717_v11 = vmul.f32 %v715_v57, %v1567_v61  ;;  %v725_v17 = vmul.f32 %v723_v59, %v1592_v28 }
  0xbd   : > { %v1241_v25 = vunpack.i.h.bf16 %v1239_v60  ;;  %v1240_v2 = vunpack.i.l.bf16 %v1239_v60  ;;  %v1236_v3 = vunpack.i.h.bf16 %v1234_v63  ;;  %v1235_v9 = vunpack.i.l.bf16 %v1234_v63  ;;  %864 = vmatpush1.bf16.msra.mxu0 %v817_v48 }
  0xbe   : > { %865 = vmatprep.subr.bf16.mxu0 %v820_v0  ;;  %v822_v13 = vpack.c.bf16 %v726_v24, %v718_v1  ;;  %v821_v26 = vpack.c.bf16 %v725_v17, %v717_v11 }
  0xbf   : > { %v740_v12 = vsel %vm663_vm8, %v1241_v25, %v1240_v2  ;;  %v732_v8 = vsel %vm643_vm7, %v1236_v3, %v1235_v9  ;;  %v739_v18 = vsel %vm663_vm8, %v1240_v2, %v1241_v25  ;;  %v731_v19 = vsel %vm643_vm7, %v1235_v9, %v1236_v3 }
  0xc0   : > { %v746_v20 = vpop.permute.xlu1 %745  ;;  %v744_v6 = vpop.permute.xlu0 %743  ;;  %v734_v7 = vmul.f32 %v732_v8, %v1602_v35  ;;  %v742_v21 = vmul.f32 %v740_v12, %v1624_v54  ;;  %v733_v27 = vmul.f32 %v731_v19, %v1599_v34  ;;  %v741_v5 = vmul.f32 %v739_v18, %v1621_v49 }
  0xc1   : > { %866 = vmatpush1.bf16.msra.mxu0 %v819_v10  ;;  %v747_v22 = vsel %vm523_vm2, %v744_v6, %v746_v20  ;;  %v748_v40 = vsel %vm523_vm2, %v746_v20, %v744_v6 }
  0xc2   : > { %867 = vmatprep.subr.bf16.mxu0 %v822_v13  ;;  %v824_v37 = vpack.c.bf16 %v742_v21, %v734_v7  ;;  %v750_v41 = vmul.f32 %v747_v22, %v1517_v32  ;;  %v823_v44 = vpack.c.bf16 %v741_v5, %v733_v27  ;;  %v749_v48 = vmul.f32 %v748_v40, %v1514_v31 }
  0xc3   : > { %v1127_v27 = vcombine.low %v1478_v16, %v1478_v16 }
  0xc4   : > { %v754_v4 = vpop.permute.xlu1 %753  ;;  %v752_v36 = vpop.permute.xlu0 %751 }
  0xc5   : > { %v755_v38 = vsel %vm543_vm1, %v752_v36, %v754_v4  ;;  %v756_v39 = vsel %vm543_vm1, %v754_v4, %v752_v36  ;;  %868 = vmatpush1.bf16.msra.mxu0 %v821_v26 }
  0xc6   : > { %v758_v42 = vmul.f32 %v755_v38, %v1520_v33  ;;  %869 = vmatprep.subr.bf16.mxu0 %v824_v37  ;;  %v757_v43 = vmul.f32 %v756_v39, %v1511_v30 }
  0xc8   : > { %v762_v45 = vpop.permute.xlu1 %761  ;;  %v760_v46 = vpop.permute.xlu0 %759  ;;  %v826_v47 = vpack.c.bf16 %v758_v42, %v750_v41  ;;  %v825_v32 = vpack.c.bf16 %v757_v43, %v749_v48 }
  0xc9   : > { %870 = vmatpush1.bf16.msra.mxu0 %v823_v44  ;;  %v763_v55 = vsel %vm563_vm3, %v760_v46, %v762_v45  ;;  %v764_v56 = vsel %vm563_vm3, %v762_v45, %v760_v46 }
  0xca   : > { %871 = vmatprep.subr.bf16.mxu0 %v826_v47  ;;  %v765_v31 = vmul.f32 %v764_v56, %v1542_v50  ;;  %v766_v59 = vmul.f32 %v763_v55, %v1545_v51 }
  0xcc   : > { %v770_v57 = vpop.permute.xlu1 %769  ;;  %v768_v33 = vpop.permute.xlu0 %767 }
  0xcd   : > { %v771_v30 = vsel %vm583_vm4, %v768_v33, %v770_v57  ;;  %v772_v58 = vsel %vm583_vm4, %v770_v57, %v768_v33  ;;  %872 = vmatpush1.bf16.msra.mxu0 %v825_v32 }
  0xce   : > { %v773_v60 = vmul.f32 %v772_v58, %v1549_v52  ;;  %v774_v63 = vmul.f32 %v771_v30, %v1552_v53 }
  0xd0   : > { %v778_v0 = vpop.permute.xlu1 %777  ;;  %v776_v1 = vpop.permute.xlu0 %775  ;;  %v828_v24 = vpack.c.bf16 %v774_v63, %v766_v59  ;;  %v827_v25 = vpack.c.bf16 %v773_v60, %v765_v31 }
  0xd1   : > { %v779_v2 = vsel %vm603_vm5, %v776_v1, %v778_v0  ;;  %v780_v3 = vsel %vm603_vm5, %v778_v0, %v776_v1 }
  0xd2   : > { %v781_v9 = vmul.f32 %v779_v2, %v1567_v61  ;;  %v782_v50 = vmul.f32 %v780_v3, %v1570_v62  ;;  %873 = vmatprep.subr.bf16.mxu0 %v828_v24 }
  0xd3   : > { %874 = vmatpush1.bf16.msra.mxu0 %v827_v25 }
  0xd4   : > { %v786_v51 = vpop.permute.xlu1 %785  ;;  %v784_v52 = vpop.permute.xlu0 %783  ;;  %v830_v53 = vpack.c.bf16 %v782_v50, %v1447_v14  ;;  %v829_v10 = vpack.c.bf16 %v781_v9, %v1449_v15 }
  0xd5   : > { %v787_v11 = vsel %vm623_vm6, %v784_v52, %v786_v51  ;;  %v788_v12 = vsel %vm623_vm6, %v786_v51, %v784_v52 }
  0xd6   : > { %875 = vmatprep.subr.bf16.mxu0 %v830_v53  ;;  %v789_v14 = vmul.f32 %v787_v11, %v1592_v28  ;;  %v790_v15 = vmul.f32 %v788_v12, %v1595_v29 }
  0xd7   : > { %876 = vmatpush1.bf16.msra.mxu0 %v829_v10 }
  0xd8   : > { %v794_v8 = vpop.permute.xlu1 %793  ;;  %v792_v61 = vpop.permute.xlu0 %791 }
  0xd9   : > { %v795_v62 = vsel %vm643_vm7, %v792_v61, %v794_v8  ;;  %v796_v13 = vsel %vm643_vm7, %v794_v8, %v792_v61 }
  0xda   : > { %v797_v17 = vmul.f32 %v795_v62, %v1599_v34  ;;  %v798_v18 = vmul.f32 %v796_v13, %v1602_v35 }
  0xdc   : > { %v802_v19 = vpop.permute.xlu1 %801  ;;  %v800_v20 = vpop.permute.xlu0 %799  ;;  %v832_v6 = vpack.c.bf16 %v798_v18, %v790_v15  ;;  %v831_v7 = vpack.c.bf16 %v797_v17, %v789_v14 }
  0xdd   : > { %v803_v21 = vsel %vm663_vm8, %v800_v20, %v802_v19  ;;  %v804_v22 = vsel %vm663_vm8, %v802_v19, %v800_v20 }
  0xde   : > { %v805_v28 = vmul.f32 %v803_v21, %v1621_v49  ;;  %v806_v29 = vmul.f32 %v804_v22, %v1624_v54  ;;  %877 = vmatprep.subr.bf16.mxu0 %v832_v6 }
  0xdf   : > { %878 = vmatpush1.bf16.msra.mxu0 %v831_v7 }
  0xe0   : > { %v833_v34 = vpack.c.bf16 %v805_v28, %v805_v28  ;;  %v834_v35 = vpack.c.bf16 %v806_v29, %v806_v29 }
  0xe2   : > { %1129 = vmatprep.subr.msk.bf16.mxu0 %vm846_vm9, %v834_v35  ;;  %v848_v26 = vsel %vm846_vm9, %v833_v34, 0 }
  0xe3   : > { %880 = vmatpush1.bf16.msra.mxu0 %v848_v26 }
  0xe6   : > { %886 = vmatmul.mubr.bf16.vlgmr.msra.gmra.mrb[0].mxu0 %v1127_v27 }
  0xed   : > { %v898_v23 = vpop.permute.xlu0 %897  ;;  %v906_v5 = vpop.permute.xlu1 %905 }
 0x1b9   : > { %v887_v49 = vpop.f32.mrb[0].mxu0 }
 0x1ba   : > { %v900_v54 = vmul.f32 %v898_v23, %v887_v49  ;;  %v889_v4 = vpop.f32.mrb[1].mxu0 }
 0x1bb   : > { %v901_v36 = vmul.f32 %v898_v23, %v889_v4  ;;  %v891_v37 = vpop.f32.mrb[2].mxu0 }
 0x1bc   : > { %v908_v38 = vadd.f32 %v906_v5, %v900_v54  ;;  %v892_v39 = vpop.f32.mrb[3].mxu0 }
 0x1bd   : > { %v909_v40 = vadd.f32 %v906_v5, %v901_v36 }
 0x1be   : > { %v910_v41 = vmax.f32 %v908_v38, 0.0 }
 0x1bf   : > { %v911_v42 = vmax.f32 %v909_v40, 0.0 }
 0x1c1   : > { %v1152_v16 = vpack.c.bf16 %v911_v42, %v910_v41 }
 0x1c3   : > { %920 = vst [vmem:[%s480_s10] sm:$0xff] %v1152_v16 }
 0x1c4 PF: > { %s17_s28 = sadd.s32 1, %s1284_s28   ;;  %s1766_s24 = smov %s1276_s26 }
 0x1c5   : > { %p14_p3 = scmp.ge.s32.totalorder %s17_s28, 18   ;;  %s1767_s25 = smov %s1280_s27 }
 0x1c6   : > { %s1768_s26 = smov %s1771_s29  ;;  %s1769_s27 = smov %s1775_s30 }
 0x1c7   :  { %16 = sbr.rel (!%p14_p3) target bundleno = 3 (0x3), region = 91 }

// kernel: segmentation_head_forward.6
= control target key start
LH: loop header
LB: loop body
LE: loop exit
PB: predicated region body
PF: predicated region fallthrough
CT: control target
= control target key end

     0   :  { %s1440_s24 = smov 0   ;;  %s1442_s25 = smov 0   ;;  %s1936_s0 = inlined_call_operand.vmem [shape: f32[2,8,1,256], index: 0, kind: input, shape index: {}, may-alias: {0,1,2}]   ;;  %s1937_s1 = inlined_call_operand.vmem [shape: f32[2,8,1,256], index: 1, kind: input, shape index: {}, may-alias: {0,1,2}]   ;;  %s1938_s2 = inlined_call_operand.vmem [shape: f32[2,8,1,256], index: 2, kind: input, shape index: {}, may-alias: {0,1,2}]   ;;  %s1939_s3 = inlined_call_operand.vmem [shape: bf16[8,27], index: 3, kind: input, shape index: {}]   ;;  %s1940_s4 = inlined_call_operand.vmem [shape: f32[8,1], index: 4, kind: input, shape index: {}]   ;;  %s1941_s5 = inlined_call_operand.vmem [shape: f32[8,1], index: 5, kind: input, shape index: {}]   ;;  %s1942_s6 = inlined_call_operand.vmem [shape: f32[9,256], index: 6, kind: input, shape index: {}]   ;;  %s1943_s7 = inlined_call_operand.vmem [shape: bf16[2,8,8,256], index: 7, kind: output, shape index: {}]  }
   0x1   :  { %s1444_s26 = smov 0   ;;  %s1446_s27 = smov 0  }
   0x2   :  { %s1448_s28 = smov 0  }
   0x3 LB: > { %s26_s29 = sadd.s32 1, %s1380_s26  ;;  %s29_s30 = sadd.s32 1, %s1384_s27  ;;  %s1388_s28 = sphi %s1448_s28, %s17_s28   ;;  %s1384_s27 = sphi %s1446_s27, %s1947_s27   ;;  %s1380_s26 = sphi %s1444_s26, %s1946_s26   ;;  %s1376_s25 = sphi %s1442_s25, %s1945_s25   ;;  %s1372_s24 = sphi %s1440_s24, %s1944_s24  }
   0x4   : > { %p27_p0 = scmp.ge.s32.totalorder %s26_s29, 8  ;;  %p1243_p1 = scmp.ge.s32.totalorder %s1388_s28, 1 }
   0x5   : > { %p342_p2 = scmp.lt.s32.totalorder %s1388_s28, 17 }
   0x6   : > { %s1949_s29 = smov (%p27_p0, %s26_s29), 0  ;;  %s1951_s30 = smov (!%p27_p0, %s29_s30), %s1384_s27 }
   0x7   : > { %p343_p3 = pnand %p1243_p1, %p342_p2  ;;  %p31_p4 = scmp.ge.s32.totalorder %s1951_s30, 2 }
   0x8   : > { %p416_p5 = scmp.lt.s32.totalorder (!%p343_p3), %s1376_s25, 1  ;;  %p429_p6 = scmp.gt.s32.totalorder (!%p343_p3), %s1372_s24, 0  ;;  %v501_v0 = vlaneseq (!%p343_p3)  ;;  %v1398_v17 = vmov (!%p343_p3), 0   ;;  %v1062_v18 = vld [vmem:[%s1941_s5] sm:$0xff] (!%p343_p3)  ;;  %vm895_vm3 = vcmask (!%p343_p3), 1040384   ;;  %vm898_vm4 = vcmask (!%p343_p3), 1041408  }
   0x9   : > { %s1953_s30 = smov (%p31_p4, %s1951_s30), 0  ;;  %346 = sbr.rel (%p343_p3) target bundleno = 471 (0x1d7), region = 48 }
   0xa   : > { %p1251_p7 = scmp.lt.s32.totalorder (!%p343_p3), %s1372_s24, 7  ;;  %s411_s9 = sadd.s32 (!%p343_p3), 4294967295, %s1372_s24  ;;  %v502_v1 = vshrl.u32 (!%p343_p3), %v501_v0, 7  ;;  %1045 = vmatprep.mubr.bf16.mxu0 (!%p343_p3), %v1398_v17  ;;  %1348 = vset.pattern.permute.xlu0 (!%p343_p3), %v1398_v17  ;;  %v1054_v19 = vld [vmem:[%s1940_s4] sm:$0xff] (!%p343_p3)  ;;  %v1610_v20 = vand.u32 (!%p343_p3), 127, %v501_v0  ;;  %vm901_vm7 = vcmask (!%p343_p3), 1042432  }
   0xb   : > { %p412_p9 = scmp.gt.s32.totalorder (!%p343_p3), %s411_s9, 0  ;;  %p1244_p10 = scmp.lt.s32.totalorder (!%p343_p3), %s411_s9, 7  ;;  %1349 = vset.pattern.permute.xlu1 (!%p343_p3), %v1398_v17  ;;  %v485_v21 = vld [vmem:[%s1942_s6] ss:$8 sm:$0x3] (!%p343_p3)  ;;  %vm904_vm8 = vcmask (!%p343_p3), 1043456  }
   0xc   : > { %v1481_v2 = vsub.s32 (!%p343_p3), 0, %v502_v1  ;;  %p473_p11 = scmp.ge.s32.totalorder (!%p343_p3), %s1372_s24, 1  ;;  %v1488_v3 = vsub.s32 (!%p343_p3), 1, %v502_v1  ;;  %s1491_s16 = sadd.s32 (!%p343_p3), 1, %s1372_s24  ;;  %vm517_vm0 = vcmp.lt.s32.totalorder (!%p343_p3), %v1610_v20, 17  ;;  %vm537_vm1 = vcmp.lt.s32.totalorder (!%p343_p3), %v1610_v20, 16 }
   0xd   : > { %p446_p13 = scmp.gt.s32.totalorder (!%p343_p3), %s1491_s16, 0  ;;  %s1390_s17 = smov (!%p343_p3), 16   ;;  %v1268_v25 = vld [vmem:[%s1942_s6 + $0x1] ss:$8 sm:$0x3] (!%p343_p3)  ;;  %vm557_vm2 = vcmp.lt.s32.totalorder (!%p343_p3), %v1610_v20, 15 }
   0xe   : > { %s1391_s18 = smov (!%p343_p3), 17   ;;  %p1258_p0 = scmp.lt.s32.totalorder (!%p343_p3), %s1491_s16, 7  ;;  %v1617_v23 = vrot.slane (!%p343_p3), %v485_v21, %v1481_v2  ;;  %v1620_v24 = vrot.slane (!%p343_p3), %v485_v21, %v1488_v3  ;;  %v1637_v32 = vrot.slane (!%p343_p3), %v1268_v25, %v1481_v2  ;;  %v1640_v33 = vrot.slane (!%p343_p3), %v1268_v25, %v1488_v3  ;;  %v1269_v41 = vld [vmem:[%s1942_s6 + $0x2] ss:$8 sm:$0x3] (!%p343_p3) }
   0xf   : > { %p476_p2 = scmp.lt.s32.totalorder (!%p343_p3), %s1491_s16, 8  ;;  %s1394_s14 = smov (!%p343_p3), 111   ;;  %v1663_v48 = vrot.slane (!%p343_p3), %v1269_v41, %v1481_v2  ;;  %v1666_v49 = vrot.slane (!%p343_p3), %v1269_v41, %v1488_v3  ;;  %v1270_v56 = vld [vmem:[%s1942_s6 + $0x3] ss:$8 sm:$0x3] (!%p343_p3)  ;;  %vm577_vm5 = vcmp.lt.s32.totalorder (!%p343_p3), %v1610_v20, 1 }
  0x10   : > { %s430_s8 = scalar_select %p429_p6, %s1372_s24, 0  ;;  %v1683_v60 = vrot.slane %v1270_v56, %v1481_v2  ;;  %v1686_v61 = vrot.slane %v1270_v56, %v1488_v3  ;;  %vm657_vm6 = vcmp.lt.s32.totalorder %v1610_v20, 111  ;;  %vm597_vm9 = vcmp.lt.s32.totalorder %v1610_v20, 127 }
  0x11   : > { %s1955_s25 = smov (!%p416_p5, %s1376_s25), 1  ;;  %s1961_s9 = smov (!%p412_p9, %s411_s9), 0  ;;  %vm637_vm10 = vcmp.lt.s32.totalorder %v1610_v20, 112  ;;  %vm907_vm11 = vcmask 1044480   ;;  %vm617_vm12 = vcmp.lt.s32.totalorder %v1610_v20, 113  ;;  %vm910_vm13 = vcmask 1045504  }
  0x12   : > { %s1957_s8 = smov (!%p1251_p7, %s430_s8), 7  ;;  %s1479_s10 = sshll.u32 %s1955_s25, 4  ;;  %vm913_vm14 = vcmask 1046528   ;;  %vm1001_vm15 = vcmask 220160  }
  0x13   : > { %p435_p8 = scmp.lt.s32.totalorder %s1957_s8, 7  ;;  %s1963_s9 = smov (!%p1244_p10, %s1961_s9), 7 }
  0x14   : > { %p418_p12 = scmp.lt.s32.totalorder %s1963_s9, 7  ;;  %s1397_s23 = smov 113  }
  0x15   : > { %s1959_s8 = smov (!%p435_p8, %s1957_s8), 7  ;;  %s1971_s24 = smov (!%p1251_p7, %s1372_s24), 7 }
  0x16   : > { %s1256_s11 = sshll.u32 %s1959_s8, 1  ;;  %s1965_s9 = smov (!%p418_p12, %s1963_s9), 7 }
  0x17   : > { %s439_s12 = sadd.s32 %s1256_s11, %s1479_s10  ;;  %s1249_s21 = sshll.u32 %s1965_s9, 1 }
  0x18   : > { %s440_s15 = scalar_lea.vmem %s1937_s1, %s439_s12  ;;  %s422_s22 = sadd.s32 %s1479_s10, %s1249_s21 }
  0x19   : > { %v481_v4 = vld [vmem:[%s440_s15] sm:$0x3]  ;;  %s474_s19 = scalar_select %p473_p11, 1.0, 0.0 }
  0x1a   : > { %v1494_v5 = vrot.slane %v481_v4, %v1481_v2  ;;  %v1502_v6 = vrot.slane %v481_v4, %v1488_v3  ;;  %s447_s20 = scalar_select %p446_p13, %s1491_s16, 0 }
  0x1b   : > { %v479_v7 = vstv %s474_s19  ;;  %s423_s8 = scalar_lea.vmem %s1936_s0, %s422_s22  ;;  %s1392_s9 = smov 15  }
  0x1c   : > { %692 = vrot.lane.b32.xlu0 %v1494_v5, %s1390_s17  ;;  %684 = vrot.lane.b32.xlu1 %v1494_v5, %s1391_s18  ;;  %v478_v8 = vld [vmem:[%s423_s8] sm:$0x3]  ;;  %s1967_s20 = smov (!%p1258_p0, %s447_s20), 7  ;;  %s1393_s11 = smov 1  }
  0x1d   : > { %v480_v9 = vmul.f32 %v479_v7, %v478_v8  ;;  %p452_p1 = scmp.lt.s32.totalorder %s1967_s20, 7  ;;  %s1395_s16 = smov 127  }
  0x1e   : > { %s477_s15 = scalar_select %p476_p2, 1.0, 0.0 }
  0x1f   : > { %v1517_v10 = vrot.slane %v480_v9, %v1481_v2  ;;  %v1520_v11 = vrot.slane %v480_v9, %v1488_v3  ;;  %s1969_s20 = smov (!%p452_p1, %s1967_s20), 7  ;;  %v1274_v9 = vld [vmem:[%s1942_s6 + $0x10] ss:$8 sm:$0x3] }
  0x20   : > { %686 = vrot.lane.b32.xlu1 %v1502_v6, %s1391_s18  ;;  %s1263_s12 = sshll.u32 %s1969_s20, 1  ;;  %v483_v13 = vstv %s477_s15  ;;  %s1396_s20 = smov 112  }
  0x21   : > { %533 = vrot.lane.b32.xlu0 %v1517_v10, %s1390_s17  ;;  %s456_s13 = sadd.s32 %s1263_s12, %s1479_s10  ;;  %s1265_s12 = sshll.u32 %s1971_s24, 1 }
  0x22   : > { %s457_s22 = scalar_lea.vmem %s1938_s2, %s456_s13  ;;  %s469_s13 = sadd.s32 %s1265_s12, %s1479_s10 }
  0x23   : > { %v482_v12 = vld [vmem:[%s457_s22] sm:$0x3] }
  0x24   : > { %694 = vrot.lane.b32.xlu1 %v1502_v6, %s1390_s17  ;;  %v484_v14 = vmul.f32 %v483_v13, %v482_v12 }
  0x25   : > { %535 = vrot.lane.b32.xlu0 %v1520_v11, %s1390_s17 }
  0x26   : > { %v1556_v15 = vrot.slane %v484_v14, %v1488_v3  ;;  %v1565_v16 = vrot.slane %v484_v14, %v1481_v2 }
  0x28   : > { %555 = vrot.lane.b32.xlu1 %v1520_v11, %s1392_s9 }
  0x29   : > { %553 = vrot.lane.b32.xlu0 %v1517_v10, %s1392_s9 }
  0x2c   : > { %513 = vrot.lane.b32.xlu1 %v1520_v11, %s1391_s18 }
  0x2d   : > { %511 = vrot.lane.b32.xlu0 %v1517_v10, %s1391_s18 }
  0x30   : > { %575 = vrot.lane.b32.xlu1 %v1520_v11, %s1393_s11 }
  0x31   : > { %573 = vrot.lane.b32.xlu0 %v1517_v10, %s1393_s11 }
  0x34   : > { %655 = vrot.lane.b32.xlu1 %v1520_v11, %s1394_s14 }
  0x35   : > { %653 = vrot.lane.b32.xlu0 %v1517_v10, %s1394_s14 }
  0x38   : > { %702 = vrot.lane.b32.xlu1 %v1502_v6, %s1392_s9 }
  0x39   : > { %700 = vrot.lane.b32.xlu0 %v1494_v5, %s1392_s9 }
  0x3c   : > { %742 = vrot.lane.b32.xlu1 %v1502_v6, %s1394_s14 }
  0x3d   : > { %740 = vrot.lane.b32.xlu0 %v1494_v5, %s1394_s14 }
  0x40   : > { %710 = vrot.lane.b32.xlu1 %v1502_v6, %s1393_s11 }
  0x41   : > { %708 = vrot.lane.b32.xlu0 %v1494_v5, %s1393_s11 }
  0x44   : > { %761 = vrot.lane.b32.xlu1 %v1556_v15, %s1391_s18 }
  0x45   : > { %759 = vrot.lane.b32.xlu0 %v1565_v16, %s1391_s18 }
  0x48   : > { %595 = vrot.lane.b32.xlu1 %v1520_v11, %s1395_s16 }
  0x49   : > { %593 = vrot.lane.b32.xlu0 %v1517_v10, %s1395_s16 }
  0x4c   : > { %734 = vrot.lane.b32.xlu1 %v1502_v6, %s1396_s20 }
  0x4d   : > { %732 = vrot.lane.b32.xlu0 %v1494_v5, %s1396_s20 }
  0x50   : > { %769 = vrot.lane.b32.xlu1 %v1556_v15, %s1390_s17 }
  0x51   : > { %767 = vrot.lane.b32.xlu0 %v1565_v16, %s1390_s17 }
  0x54   : > { %615 = vrot.lane.b32.xlu1 %v1520_v11, %s1397_s23 }
  0x55   : > { %613 = vrot.lane.b32.xlu0 %v1517_v10, %s1397_s23 }
  0x58   : > { %718 = vrot.lane.b32.xlu1 %v1502_v6, %s1395_s16 }
  0x59   : > { %716 = vrot.lane.b32.xlu0 %v1494_v5, %s1395_s16 }
  0x5c   : > { %777 = vrot.lane.b32.xlu1 %v1556_v15, %s1392_s9 }
  0x5d   : > { %775 = vrot.lane.b32.xlu0 %v1565_v16, %s1392_s9 }
  0x60   : > { %635 = vrot.lane.b32.xlu1 %v1520_v11, %s1396_s20 }
  0x61   : > { %633 = vrot.lane.b32.xlu0 %v1517_v10, %s1396_s20 }
  0x64   : > { %726 = vrot.lane.b32.xlu1 %v1502_v6, %s1397_s23 }
  0x65   : > { %724 = vrot.lane.b32.xlu0 %v1494_v5, %s1397_s23 }
  0x68   : > { %785 = vrot.lane.b32.xlu1 %v1556_v15, %s1393_s11 }
  0x69   : > { %783 = vrot.lane.b32.xlu0 %v1565_v16, %s1393_s11 }
  0x6c   : > { %809 = vrot.lane.b32.xlu1 %v1556_v15, %s1396_s20 }
  0x6d   : > { %807 = vrot.lane.b32.xlu0 %v1565_v16, %s1396_s20 }
  0x70   : > { %793 = vrot.lane.b32.xlu1 %v1556_v15, %s1395_s16 }
  0x71   : > { %791 = vrot.lane.b32.xlu0 %v1565_v16, %s1395_s16 }
  0x74   : > { %817 = vrot.lane.b32.xlu1 %v1556_v15, %s1394_s14 }
  0x75   : > { %815 = vrot.lane.b32.xlu0 %v1565_v16, %s1394_s14  ;;  %s1267_s14 = sshll.u32 %s469_s13, 2 }
  0x76   : > { %s471_s21 = scalar_lea.vmem %s1943_s7, %s1267_s14 }
  0x78   : > { %801 = vrot.lane.b32.xlu1 %v1556_v15, %s1397_s23 }
  0x79   : > { %799 = vrot.lane.b32.xlu0 %v1565_v16, %s1397_s23 }
  0x7c   : > { %1065 = vperm.xlu1 %1349, %v1062_v18  }
  0x7d   : > { %1057 = vperm.xlu0 %1348, %v1054_v19  }
  0x8e   : > { %v685_v22 = vpop.permute.xlu1 %684  ;;  %v693_v27 = vpop.permute.xlu0 %692 }
  0x92   : > { %v687_v26 = vpop.permute.xlu1 %686 }
  0x93   : > { %v688_v28 = vsel %vm517_vm0, %v685_v22, %v687_v26  ;;  %v689_v29 = vsel %vm517_vm0, %v687_v26, %v685_v22  ;;  %v534_v39 = vpop.permute.xlu0 %533 }
  0x94   : > { %v1631_v30 = vmul.f32 %v689_v29, %v1617_v23  ;;  %v1634_v31 = vmul.f32 %v688_v28, %v1620_v24  ;;  %v1708_v28 = vrot.slane %v1274_v9, %v1488_v3 }
  0x96   : > { %v695_v34 = vpop.permute.xlu1 %694 }
  0x97   : > { %v696_v35 = vsel %vm537_vm1, %v693_v27, %v695_v34  ;;  %v697_v36 = vsel %vm537_vm1, %v695_v34, %v693_v27  ;;  %v536_v42 = vpop.permute.xlu0 %535  ;;  %v1705_v27 = vrot.slane %v1274_v9, %v1481_v2 }
  0x98   : > { %v1647_v37 = vmul.f32 %v697_v36, %v1637_v32  ;;  %v1650_v38 = vmul.f32 %v696_v35, %v1640_v33  ;;  %v538_v43 = vsel %vm537_vm1, %v534_v39, %v536_v42  ;;  %v539_v44 = vsel %vm537_vm1, %v536_v42, %v534_v39 }
  0x99   : > { %v551_v46 = vmul.f32 %v1637_v32, %v539_v44  ;;  %v552_v47 = vmul.f32 %v1640_v33, %v538_v43  ;;  %v861_v36 = vrot.slane %v1631_v30, 7  ;;  %v862_v39 = vrot.slane %v1634_v31, 7 }
  0x9a   : > { %v556_v40 = vpop.permute.xlu1 %555  ;;  %v867_v30 = vrot.slane %v1647_v37, 6  ;;  %v868_v31 = vrot.slane %v1650_v38, 6 }
  0x9b   : > { %v554_v50 = vpop.permute.xlu0 %553  ;;  %v825_v63 = vrot.slane %v551_v46, 7  ;;  %v826_v0 = vrot.slane %v552_v47, 7 }
  0x9c   : > { %v558_v51 = vsel %vm557_vm2, %v554_v50, %v556_v40  ;;  %v559_v52 = vsel %vm557_vm2, %v556_v40, %v554_v50 }
  0x9d   : > { %v571_v54 = vmul.f32 %v1663_v48, %v559_v52  ;;  %v572_v55 = vmul.f32 %v1666_v49, %v558_v51 }
  0x9e   : > { %v514_v45 = vpop.permute.xlu1 %513 }
  0x9f   : > { %v512_v57 = vpop.permute.xlu0 %511  ;;  %v831_v7 = vrot.slane %v571_v54, 6  ;;  %v832_v8 = vrot.slane %v572_v55, 6 }
  0xa0   : > { %v518_v58 = vsel %vm517_vm0, %v512_v57, %v514_v45  ;;  %v519_v59 = vsel %vm517_vm0, %v514_v45, %v512_v57 }
  0xa1   : > { %v531_v1 = vmul.f32 %v1617_v23, %v519_v59  ;;  %v532_v4 = vmul.f32 %v1620_v24, %v518_v58 }
  0xa2   : > { %v576_v53 = vpop.permute.xlu1 %575 }
  0xa3   : > { %v896_v12 = vsel %vm895_vm3, %v531_v1, %v825_v63  ;;  %v897_v13 = vsel %vm895_vm3, %v532_v4, %v826_v0  ;;  %v574_v14 = vpop.permute.xlu0 %573 }
  0xa4   : > { %v899_v17 = vsel %vm898_vm4, %v896_v12, %v831_v7  ;;  %v900_v18 = vsel %vm898_vm4, %v897_v13, %v832_v8  ;;  %v578_v19 = vsel %vm577_vm5, %v574_v14, %v576_v53  ;;  %v579_v21 = vsel %vm577_vm5, %v576_v53, %v574_v14 }
  0xa5   : > { %v591_v25 = vmul.f32 %v1683_v60, %v579_v21  ;;  %v592_v26 = vmul.f32 %v1686_v61, %v578_v19  ;;  %v1271_v19 = vld [vmem:[%s1942_s6 + $0x5] ss:$8 sm:$0x3] }
  0xa6   : > { %v656_v62 = vpop.permute.xlu1 %655 }
  0xa7   : > { %v837_v29 = vrot.slane %v591_v25, 5  ;;  %v838_v34 = vrot.slane %v592_v26, 5  ;;  %v654_v35 = vpop.permute.xlu0 %653 }
  0xa8   : > { %v658_v40 = vsel %vm657_vm6, %v654_v35, %v656_v62  ;;  %v659_v41 = vsel %vm657_vm6, %v656_v62, %v654_v35  ;;  %v1760_v35 = vrot.slane %v1271_v19, %v1488_v3 }
  0xa9   : > { %v1717_v43 = vsel %vm901_vm7, %v899_v17, %v837_v29  ;;  %v903_v44 = vsel %vm901_vm7, %v900_v18, %v838_v34  ;;  %v671_v45 = vmul.f32 %v1705_v27, %v658_v40  ;;  %v672_v46 = vmul.f32 %v1708_v28, %v659_v41 }
  0xaa   : > { %v703_v22 = vpop.permute.xlu1 %702  ;;  %v1757_v34 = vrot.slane %v1271_v19, %v1481_v2 }
  0xab   : > { %v916_v47 = vsel %vm895_vm3, %v671_v45, %v861_v36  ;;  %v917_v50 = vsel %vm895_vm3, %v672_v46, %v862_v39  ;;  %v701_v51 = vpop.permute.xlu0 %700  ;;  %v1273_v45 = vld [vmem:[%s1942_s6 + $0x7] ss:$8 sm:$0x3] }
  0xac   : > { %v918_v52 = vsel %vm898_vm4, %v916_v47, %v867_v30  ;;  %v919_v53 = vsel %vm898_vm4, %v917_v50, %v868_v31  ;;  %v704_v54 = vsel %vm557_vm2, %v701_v51, %v703_v22  ;;  %v705_v55 = vsel %vm557_vm2, %v703_v22, %v701_v51 }
  0xad   : > { %v706_v37 = vmul.f32 %v705_v55, %v1663_v48  ;;  %v707_v38 = vmul.f32 %v704_v54, %v1666_v49  ;;  %v1781_v50 = vrot.slane %v1273_v45, %v1481_v2  ;;  %v1784_v51 = vrot.slane %v1273_v45, %v1488_v3 }
  0xae   : > { %v743_v42 = vpop.permute.xlu1 %742  ;;  %v906_v55 = vsel %vm904_vm8, %v903_v44, %v1520_v11 }
  0xaf   : > { %v873_v57 = vrot.slane %v706_v37, 5  ;;  %v874_v58 = vrot.slane %v707_v38, 5  ;;  %v741_v59 = vpop.permute.xlu0 %740 }
  0xb0   : > { %v744_v62 = vsel %vm657_vm6, %v741_v59, %v743_v42  ;;  %v745_v63 = vsel %vm657_vm6, %v743_v42, %v741_v59 }
  0xb1   : > { %v920_v1 = vsel %vm901_vm7, %v918_v52, %v873_v57  ;;  %v921_v4 = vsel %vm901_vm7, %v919_v53, %v874_v58  ;;  %v746_v7 = vmul.f32 %v744_v62, %v1705_v27  ;;  %v747_v8 = vmul.f32 %v745_v63, %v1708_v28 }
  0xb2   : > { %v711_v56 = vpop.permute.xlu1 %710 }
  0xb3   : > { %v709_v9 = vpop.permute.xlu0 %708  ;;  %v932_v37 = vrot.slane %v746_v7, 7  ;;  %v933_v38 = vrot.slane %v747_v8, 7 }
  0xb4   : > { %v712_v12 = vsel %vm577_vm5, %v709_v9, %v711_v56  ;;  %v713_v13 = vsel %vm577_vm5, %v711_v56, %v709_v9  ;;  %v905_v56 = vsel %vm904_vm8, %v1717_v43, %v1517_v10  ;;  %v1272_v10 = vld [vmem:[%s1942_s6 + $0x6] ss:$8 sm:$0x3] }
  0xb5   : > { %v714_v17 = vmul.f32 %v713_v13, %v1683_v60  ;;  %v715_v18 = vmul.f32 %v712_v12, %v1686_v61  ;;  %v1814_v19 = vrot.slane %v1272_v10, %v1481_v2 }
  0xb6   : > { %v762_v0 = vpop.permute.xlu1 %761 }
  0xb7   : > { %v879_v21 = vrot.slane %v714_v17, 4  ;;  %v880_v22 = vrot.slane %v715_v18, 4  ;;  %v760_v25 = vpop.permute.xlu0 %759 }
  0xb8   : > { %v763_v26 = vsel %vm517_vm0, %v760_v25, %v762_v0  ;;  %v764_v29 = vsel %vm517_vm0, %v762_v0, %v760_v25 }
  0xb9   : > { %v1763_v39 = vsel %vm904_vm8, %v920_v1, %v879_v21  ;;  %v765_v40 = vmul.f32 %v764_v29, %v1617_v23  ;;  %v766_v41 = vmul.f32 %v763_v26, %v1620_v24  ;;  %v1768_v42 = vsel %vm904_vm8, %v921_v4, %v880_v22 }
  0xba   : > { %v596_v14 = vpop.permute.xlu1 %595  ;;  %v1817_v21 = vrot.slane %v1272_v10, %v1488_v3 }
  0xbb   : > { %v594_v46 = vpop.permute.xlu0 %593  ;;  %v938_v44 = vrot.slane %v765_v40, 6  ;;  %v939_v1 = vrot.slane %v766_v41, 6 }
  0xbc   : > { %v598_v30 = vsel %vm597_vm9, %v594_v46, %v596_v14  ;;  %v599_v31 = vsel %vm597_vm9, %v596_v14, %v594_v46 }
  0xbd   : > { %v611_v23 = vmul.f32 %v1757_v34, %v598_v30  ;;  %v612_v24 = vmul.f32 %v1760_v35, %v599_v31 }
  0xbe   : > { %v735_v36 = vpop.permute.xlu1 %734 }
  0xbf   : > { %v843_v52 = vrot.slane %v611_v23, 3  ;;  %v844_v53 = vrot.slane %v612_v24, 3  ;;  %v733_v54 = vpop.permute.xlu0 %732 }
  0xc0   : > { %v736_v57 = vsel %vm637_vm10, %v733_v54, %v735_v36  ;;  %v737_v58 = vsel %vm637_vm10, %v735_v36, %v733_v54 }
  0xc1   : > { %v738_v62 = vmul.f32 %v736_v57, %v1781_v50  ;;  %v739_v63 = vmul.f32 %v737_v58, %v1784_v51  ;;  %v909_v0 = vsel %vm907_vm11, %v906_v55, %v844_v53  ;;  %v908_v11 = vsel %vm907_vm11, %v905_v56, %v843_v52 }
  0xc2   : > { %v770_v47 = vpop.permute.xlu1 %769  ;;  %v925_v58 = vsel %vm907_vm11, %v1768_v42, %v1502_v6 }
  0xc3   : > { %v978_v43 = vsel %vm895_vm3, %v738_v62, %v932_v37  ;;  %v979_v4 = vsel %vm895_vm3, %v739_v63, %v933_v38  ;;  %v768_v7 = vpop.permute.xlu0 %767 }
  0xc4   : > { %v980_v8 = vsel %vm898_vm4, %v978_v43, %v938_v44  ;;  %v981_v9 = vsel %vm898_vm4, %v979_v4, %v939_v1  ;;  %v771_v12 = vsel %vm537_vm1, %v768_v7, %v770_v47  ;;  %v772_v13 = vsel %vm537_vm1, %v770_v47, %v768_v7 }
  0xc5   : > { %v773_v17 = vmul.f32 %v772_v13, %v1637_v32  ;;  %v774_v18 = vmul.f32 %v771_v12, %v1640_v33 }
  0xc6   : > { %v616_v59 = vpop.permute.xlu1 %615 }
  0xc7   : > { %v944_v22 = vrot.slane %v773_v17, 5  ;;  %v945_v25 = vrot.slane %v774_v18, 5  ;;  %v614_v26 = vpop.permute.xlu0 %613 }
  0xc8   : > { %v618_v29 = vsel %vm617_vm12, %v614_v26, %v616_v59  ;;  %v619_v36 = vsel %vm617_vm12, %v616_v59, %v614_v26  ;;  %v924_v59 = vsel %vm907_vm11, %v1763_v39, %v1494_v5 }
  0xc9   : > { %v982_v32 = vsel %vm901_vm7, %v980_v8, %v944_v22  ;;  %v983_v33 = vsel %vm901_vm7, %v981_v9, %v945_v25  ;;  %v631_v2 = vmul.f32 %v1814_v19, %v618_v29  ;;  %v632_v41 = vmul.f32 %v1817_v21, %v619_v36 }
  0xca   : > { %v719_v14 = vpop.permute.xlu1 %718 }
  0xcb   : > { %v849_v3 = vrot.slane %v631_v2, 2  ;;  %v850_v45 = vrot.slane %v632_v41, 2  ;;  %v717_v46 = vpop.permute.xlu0 %716 }
  0xcc   : > { %v720_v30 = vsel %vm597_vm9, %v717_v46, %v719_v14  ;;  %v721_v31 = vsel %vm597_vm9, %v719_v14, %v717_v46 }
  0xcd   : > { %v722_v23 = vmul.f32 %v720_v30, %v1757_v34  ;;  %v723_v24 = vmul.f32 %v721_v31, %v1760_v35  ;;  %v912_v52 = vsel %vm910_vm13, %v909_v0, %v850_v45  ;;  %v911_v53 = vsel %vm910_vm13, %v908_v11, %v849_v3 }
  0xce   : > { %v778_v40 = vpop.permute.xlu1 %777 }
  0xcf   : > { %v885_v54 = vrot.slane %v722_v23, 2  ;;  %v886_v55 = vrot.slane %v723_v24, 2  ;;  %v776_v56 = vpop.permute.xlu0 %775 }
  0xd0   : > { %v779_v37 = vsel %vm557_vm2, %v776_v56, %v778_v40  ;;  %v780_v38 = vsel %vm557_vm2, %v778_v40, %v776_v56 }
  0xd1   : > { %v781_v62 = vmul.f32 %v780_v38, %v1663_v48  ;;  %v782_v63 = vmul.f32 %v779_v37, %v1666_v49  ;;  %v927_v0 = vsel %vm910_vm13, %v925_v58, %v886_v55  ;;  %v926_v11 = vsel %vm910_vm13, %v924_v59, %v885_v54 }
  0xd2   : > { %v636_v47 = vpop.permute.xlu1 %635 }
  0xd3   : > { %v950_v44 = vrot.slane %v781_v62, 4  ;;  %v951_v1 = vrot.slane %v782_v63, 4  ;;  %v634_v10 = vpop.permute.xlu0 %633 }
  0xd4   : > { %v638_v43 = vsel %vm637_vm10, %v634_v10, %v636_v47  ;;  %v639_v6 = vsel %vm637_vm10, %v636_v47, %v634_v10 }
  0xd5   : > { %v984_v5 = vsel %vm904_vm8, %v982_v32, %v950_v44  ;;  %v985_v48 = vsel %vm904_vm8, %v983_v33, %v951_v1  ;;  %v651_v49 = vmul.f32 %v1781_v50, %v638_v43  ;;  %v652_v39 = vmul.f32 %v1784_v51, %v639_v6 }
  0xd6   : > { %v727_v57 = vpop.permute.xlu1 %726 }
  0xd7   : > { %v855_v4 = vrot.slane %v651_v49, 1  ;;  %v856_v7 = vrot.slane %v652_v39, 1  ;;  %v725_v8 = vpop.permute.xlu0 %724 }
  0xd8   : > { %v728_v9 = vsel %vm617_vm12, %v725_v8, %v727_v57  ;;  %v729_v12 = vsel %vm617_vm12, %v727_v57, %v725_v8 }
  0xd9   : > { %v730_v14 = vmul.f32 %v728_v9, %v1814_v19  ;;  %v731_v17 = vmul.f32 %v729_v12, %v1817_v21  ;;  %v915_v18 = vsel %vm913_vm14, %v912_v52, %v856_v7  ;;  %v914_v22 = vsel %vm913_vm14, %v911_v53, %v855_v4 }
  0xda   : > { %v786_v42 = vpop.permute.xlu1 %785 }
  0xdb   : > { %v891_v25 = vrot.slane %v730_v14, 1  ;;  %v892_v26 = vrot.slane %v731_v17, 1  ;;  %v784_v29 = vpop.permute.xlu0 %783 }
  0xdc   : > { %v787_v36 = vsel %vm577_vm5, %v784_v29, %v786_v42  ;;  %v788_v40 = vsel %vm577_vm5, %v786_v42, %v784_v29 }
  0xdd   : > { %v789_v32 = vmul.f32 %v788_v40, %v1683_v60  ;;  %v790_v33 = vmul.f32 %v787_v36, %v1686_v61  ;;  %v929_v2 = vsel %vm913_vm14, %v927_v0, %v892_v26  ;;  %v928_v41 = vsel %vm913_vm14, %v926_v11, %v891_v25 }
  0xde   : > { %v810_v13 = vpop.permute.xlu1 %809  ;;  %v997_v45 = vpack.c.bf16 %v929_v2, %v915_v18  ;;  %v996_v46 = vpack.c.bf16 %v928_v41, %v914_v22 }
  0xdf   : > { %v956_v30 = vrot.slane %v789_v32, 3  ;;  %v957_v31 = vrot.slane %v790_v33, 3  ;;  %v808_v47 = vpop.permute.xlu0 %807 }
  0xe0   : > { %v811_v23 = vsel %vm637_vm10, %v808_v47, %v810_v13  ;;  %v812_v24 = vsel %vm637_vm10, %v810_v13, %v808_v47  ;;  %1013 = vmatprep.subr.bf16.mxu0 %v997_v45 }
  0xe1   : > { %v986_v60 = vsel %vm907_vm11, %v984_v5, %v956_v30  ;;  %v987_v61 = vsel %vm907_vm11, %v985_v48, %v957_v31  ;;  %v813_v52 = vmul.f32 %v811_v23, %v1781_v50  ;;  %v814_v53 = vmul.f32 %v812_v24, %v1784_v51  ;;  %1014 = vmatpush1.bf16.msra.mxu0 %v996_v46 }
  0xe2   : > { %v794_v3 = vpop.permute.xlu1 %793  ;;  %v989_v63 = vsel %vm910_vm13, %v987_v61, %v1556_v15  ;;  %v988_v0 = vsel %vm910_vm13, %v986_v60, %v1565_v16  ;;  %v1399_v15 = vmov 65535  }
  0xe3   : > { %v792_v54 = vpop.permute.xlu0 %791  ;;  %v1005_v42 = vsel %vm907_vm11, 4294967295, %v1399_v15  ;;  %v968_v16 = vrot.slane %v813_v52, 7  ;;  %v969_v5 = vrot.slane %v814_v53, 7 }
  0xe4   : > { %v795_v56 = vsel %vm597_vm9, %v792_v54, %v794_v3  ;;  %v796_v37 = vsel %vm597_vm9, %v794_v3, %v792_v54  ;;  %v1006_v7 = vsel %vm910_vm13, %v1005_v42, 0 }
  0xe5   : > { %v797_v38 = vmul.f32 %v795_v56, %v1757_v34  ;;  %v798_v57 = vmul.f32 %v796_v37, %v1760_v35 }
  0xe6   : > { %v818_v55 = vpop.permute.xlu1 %817 }
  0xe7   : > { %v962_v58 = vrot.slane %v797_v38, 1  ;;  %v963_v59 = vrot.slane %v798_v57, 1  ;;  %v816_v62 = vpop.permute.xlu0 %815 }
  0xe8   : > { %v819_v50 = vsel %vm657_vm6, %v816_v62, %v818_v55  ;;  %v820_v51 = vsel %vm657_vm6, %v818_v55, %v816_v62 }
  0xe9   : > { %v821_v11 = vmul.f32 %v819_v50, %v1705_v27  ;;  %v822_v34 = vmul.f32 %v820_v51, %v1708_v28  ;;  %v991_v44 = vsel %vm913_vm14, %v989_v63, %v963_v59  ;;  %v990_v1 = vsel %vm913_vm14, %v988_v0, %v962_v58 }
  0xea   : > { %v802_v35 = vpop.permute.xlu1 %801 }
  0xeb   : > { %v800_v10 = vpop.permute.xlu0 %799  ;;  %v974_v48 = vrot.slane %v821_v11, 6  ;;  %v975_v49 = vrot.slane %v822_v34, 6 }
  0xec   : > { %v803_v43 = vsel %vm617_vm12, %v800_v10, %v802_v35  ;;  %v804_v6 = vsel %vm617_vm12, %v802_v35, %v800_v10 }
  0xed   : > { %v805_v27 = vmul.f32 %v803_v43, %v1814_v19  ;;  %v806_v28 = vmul.f32 %v804_v6, %v1817_v21  ;;  %v1000_v21 = vld [vmem:[%s1939_s3] sm:$0xf] }
  0xef   : > { %v992_v39 = vsel %vm895_vm3, %v805_v27, %v968_v16  ;;  %v993_v4 = vsel %vm895_vm3, %v806_v28, %v969_v5 }
  0xf0   : > { %v995_v20 = vsel %vm898_vm4, %v993_v4, %v975_v49  ;;  %v994_v8 = vsel %vm898_vm4, %v992_v39, %v974_v48 }
  0xf1   : > { %v999_v9 = vpack.c.bf16 %v995_v20, %v991_v44  ;;  %v998_v12 = vpack.c.bf16 %v994_v8, %v990_v1 }
  0xf3   : > { %v1011_v19 = vand.u32 %v1006_v7, %v999_v9  ;;  %v1008_v13 = vand.u32 %v1006_v7, %v998_v12 }
  0xf5   : > { %1015 = vmatprep.subr.bf16.mxu0 %v1011_v19 }
  0xf6   : > { %1016 = vmatpush1.bf16.msra.mxu0 %v1008_v13 }
  0xf9   : > { %1275 = vmatmul.mubr.msk.bf16.vlgmr.msra.gmra.mrb[0].mxu0 %vm1001_vm15, %v1000_v21 }
  0xfb   : > { %v1066_v18 = vpop.permute.xlu1 %1065 }
  0xfc   : > { %v1058_v14 = vpop.permute.xlu0 %1057 }
 0x1cc   : > { %v1047_v17 = vpop.f32.mrb[0].mxu0 }
 0x1cd   : > { %v1060_v22 = vmul.f32 %v1058_v14, %v1047_v17  ;;  %v1049_v25 = vpop.f32.mrb[1].mxu0 }
 0x1ce   : > { %v1061_v26 = vmul.f32 %v1058_v14, %v1049_v25  ;;  %v1051_v29 = vpop.f32.mrb[2].mxu0 }
 0x1cf   : > { %v1068_v36 = vadd.f32 %v1066_v18, %v1060_v22  ;;  %v1052_v40 = vpop.f32.mrb[3].mxu0 }
 0x1d0   : > { %v1069_v32 = vadd.f32 %v1066_v18, %v1061_v26 }
 0x1d1   : > { %v1070_v33 = vmax.f32 %v1068_v36, 0.0 }
 0x1d2   : > { %v1071_v2 = vmax.f32 %v1069_v32, 0.0 }
 0x1d4   : > { %v1297_v41 = vpack.c.bf16 %v1071_v2, %v1070_v33 }
 0x1d6   : > { %1080 = vst [vmem:[%s471_s21] sm:$0xff] %v1297_v41 }
 0x1d7 PF: > { %s17_s28 = sadd.s32 1, %s1388_s28   ;;  %s1944_s24 = smov %s1380_s26 }
 0x1d8   : > { %p14_p3 = scmp.ge.s32.totalorder %s17_s28, 18   ;;  %s1945_s25 = smov %s1384_s27 }
 0x1d9   : > { %s1946_s26 = smov %s1949_s29  ;;  %s1947_s27 = smov %s1953_s30 }
 0x1da   :  { %16 = sbr.rel (!%p14_p3) target bundleno = 3 (0x3), region = 91 }

// kernel: segmentation_head_forward.11
= control target key start
LH: loop header
LB: loop body
LE: loop exit
PB: predicated region body
PF: predicated region fallthrough
CT: control target
= control target key end

     0   :  { %s1328_s24 = smov 0   ;;  %s1330_s25 = smov 0   ;;  %s1750_s0 = inlined_call_operand.vmem [shape: bf16[2,8,8,256], index: 0, kind: input, shape index: {}, may-alias: {0,1,2}]   ;;  %s1751_s1 = inlined_call_operand.vmem [shape: bf16[2,8,8,256], index: 1, kind: input, shape index: {}, may-alias: {0,1,2}]   ;;  %s1752_s2 = inlined_call_operand.vmem [shape: bf16[2,8,8,256], index: 2, kind: input, shape index: {}, may-alias: {0,1,2}]   ;;  %s1753_s3 = inlined_call_operand.vmem [shape: bf16[4,216], index: 3, kind: input, shape index: {}]   ;;  %s1754_s4 = inlined_call_operand.vmem [shape: f32[4,1], index: 4, kind: input, shape index: {}]   ;;  %s1755_s5 = inlined_call_operand.vmem [shape: f32[4,1], index: 5, kind: input, shape index: {}]   ;;  %s1756_s6 = inlined_call_operand.vmem [shape: f32[9,256], index: 6, kind: input, shape index: {}]   ;;  %s1757_s7 = inlined_call_operand.vmem [shape: f32[2,8,4,256], index: 7, kind: output, shape index: {}]  }
   0x1   :  { %s1332_s26 = smov 0   ;;  %s1334_s27 = smov 0  }
   0x2   :  { %s1336_s28 = smov 0  }
   0x3 LB: > { %s26_s29 = sadd.s32 1, %s1269_s26  ;;  %s29_s30 = sadd.s32 1, %s1273_s27  ;;  %s1277_s28 = sphi %s1336_s28, %s17_s28   ;;  %s1273_s27 = sphi %s1334_s27, %s1761_s27   ;;  %s1269_s26 = sphi %s1332_s26, %s1760_s26   ;;  %s1265_s25 = sphi %s1330_s25, %s1759_s25   ;;  %s1261_s24 = sphi %s1328_s24, %s1758_s24  }
   0x4   : > { %p27_p0 = scmp.ge.s32.totalorder %s26_s29, 8  ;;  %p1090_p1 = scmp.ge.s32.totalorder %s1277_s28, 1 }
   0x5   : > { %p345_p2 = scmp.lt.s32.totalorder %s1277_s28, 17 }
   0x6   : > { %s1763_s29 = smov (%p27_p0, %s26_s29), 0  ;;  %s1765_s30 = smov (!%p27_p0, %s29_s30), %s1273_s27 }
   0x7   : > { %p346_p3 = pnand %p1090_p1, %p345_p2  ;;  %p31_p4 = scmp.ge.s32.totalorder %s1765_s30, 2 }
   0x8   : > { %s417_s8 = sadd.s32 (!%p346_p3), 4294967295, %s1261_s24  ;;  %p422_p5 = scmp.lt.s32.totalorder (!%p346_p3), %s1265_s25, 1  ;;  %v1471_v16 = vld.sshfl [vmem:[%s1753_s3] sm:$0x33 pattern:$0x76325410] (!%p346_p3)  ;;  %v521_v21 = vlaneseq (!%p346_p3) }
   0x9   : > { %s1767_s30 = smov (%p31_p4, %s1765_s30), 0  ;;  %349 = sbr.rel (%p346_p3) target bundleno = 450 (0x1c2), region = 48 }
   0xa   : > { %p418_p6 = scmp.gt.s32.totalorder (!%p346_p3), %s417_s8, 0  ;;  %p1091_p7 = scmp.lt.s32.totalorder (!%p346_p3), %s417_s8, 7  ;;  %v844_v17 = vcombine.high (!%p346_p3), %v1471_v16, %v1471_v16  ;;  %vm846_vm0 = vcmask (!%p346_p3), 719872   ;;  %v1287_v18 = vmov (!%p346_p3), 0   ;;  %v898_v19 = vld [vmem:[%s1754_s4] sm:$0xf] (!%p346_p3) }
   0xb   : > { %p482_p8 = scmp.ge.s32.totalorder (!%p346_p3), %s1261_s24, 1  ;;  %p436_p10 = scmp.gt.s32.totalorder (!%p346_p3), %s1261_s24, 0  ;;  %1237 = vset.pattern.permute.xlu0 (!%p346_p3), %v1287_v18  ;;  %1238 = vset.pattern.permute.xlu1 (!%p346_p3), %v1287_v18  ;;  %v906_v20 = vld [vmem:[%s1755_s5] sm:$0xf] (!%p346_p3)  ;;  %v528_v22 = vshrl.u32 (!%p346_p3), %v521_v21, 7  ;;  %v1489_v23 = vand.u32 (!%p346_p3), 127, %v521_v21 }
   0xc   : > { %p1099_p11 = scmp.lt.s32.totalorder (!%p346_p3), %s1261_s24, 7  ;;  %s1279_s18 = smov (!%p346_p3), 16   ;;  %1127 = vmatprep.mubr.msk.bf16.mxu0 (!%p346_p3), %vm846_vm0, %v844_v17  ;;  %v1118_v26 = vld [vmem:[%s1756_s6 + $0x1] ss:$8 sm:$0x3] (!%p346_p3)  ;;  %vm850_vm9 = vcmask (!%p346_p3), 1043456  }
   0xd   : > { %s1280_s19 = smov (!%p346_p3), 17   ;;  %s1382_s20 = sadd.s32 (!%p346_p3), 1, %s1261_s24  ;;  %v1491_v24 = vsub.s32 (!%p346_p3), 0, %v528_v22  ;;  %v1493_v25 = vsub.s32 (!%p346_p3), 1, %v528_v22  ;;  %vm543_vm1 = vcmp.lt.s32.totalorder (!%p346_p3), %v1489_v23, 16  ;;  %vm523_vm2 = vcmp.lt.s32.totalorder (!%p346_p3), %v1489_v23, 17 }
   0xe   : > { %p454_p13 = scmp.gt.s32.totalorder (!%p346_p3), %s1382_s20, 0  ;;  %s1281_s21 = smov (!%p346_p3), 15   ;;  %v502_v27 = vld [vmem:[%s1756_s6] ss:$8 sm:$0x3] (!%p346_p3)  ;;  %vm563_vm3 = vcmp.lt.s32.totalorder (!%p346_p3), %v1489_v23, 15 }
   0xf   : > { %p1107_p0 = scmp.lt.s32.totalorder (!%p346_p3), %s1382_s20, 7  ;;  %s1284_s15 = smov (!%p346_p3), 113   ;;  %v1504_v30 = vrot.slane (!%p346_p3), %v1118_v26, %v1491_v24  ;;  %v1507_v31 = vrot.slane (!%p346_p3), %v502_v27, %v1491_v24  ;;  %v1510_v32 = vrot.slane (!%p346_p3), %v502_v27, %v1493_v25  ;;  %v1513_v33 = vrot.slane (!%p346_p3), %v1118_v26, %v1493_v25  ;;  %v1119_v42 = vld [vmem:[%s1756_s6 + $0x2] ss:$8 sm:$0x3] (!%p346_p3) }
  0x10   : > { %s1769_s8 = smov (!%p418_p6, %s417_s8), 0  ;;  %s1771_s25 = smov (!%p422_p5, %s1265_s25), 1  ;;  %v1120_v45 = vld [vmem:[%s1756_s6 + $0x3] ss:$8 sm:$0x3]  ;;  %v1535_v50 = vrot.slane %v1119_v42, %v1491_v24  ;;  %v1538_v51 = vrot.slane %v1119_v42, %v1493_v25  ;;  %vm583_vm4 = vcmp.lt.s32.totalorder %v1489_v23, 1 }
  0x11   : > { %s1773_s8 = smov (!%p1091_p7, %s1769_s8), 7  ;;  %s1362_s9 = sshll.u32 %s1771_s25, 4  ;;  %v1542_v52 = vrot.slane %v1120_v45, %v1491_v24  ;;  %v1545_v53 = vrot.slane %v1120_v45, %v1493_v25  ;;  %v1121_v54 = vld [vmem:[%s1756_s6 + $0x5] ss:$8 sm:$0x3]  ;;  %vm603_vm5 = vcmp.lt.s32.totalorder %v1489_v23, 127 }
  0x12   : > { %p424_p9 = scmp.lt.s32.totalorder %s1773_s8, 7  ;;  %s1282_s25 = smov 1   ;;  %v1560_v61 = vrot.slane %v1121_v54, %v1491_v24  ;;  %v1563_v62 = vrot.slane %v1121_v54, %v1493_v25  ;;  %vm623_vm6 = vcmp.lt.s32.totalorder %v1489_v23, 113  ;;  %vm643_vm7 = vcmp.lt.s32.totalorder %v1489_v23, 112 }
  0x13   : > { %s483_s10 = scalar_select %p482_p8, 1.0, 0.0  ;;  %v1124_v45 = vld [vmem:[%s1756_s6 + $0x10] ss:$8 sm:$0x3]  ;;  %vm663_vm8 = vcmp.lt.s32.totalorder %v1489_v23, 111 }
  0x14   : > { %s1775_s8 = smov (!%p424_p9, %s1773_s8), 7  ;;  %p485_p2 = scmp.lt.s32.totalorder %s1382_s20, 8  ;;  %v1617_v54 = vrot.slane %v1124_v45, %v1493_v25 }
  0x15   : > { %s1096_s11 = sshll.u32 %s1775_s8, 1  ;;  %v490_v1 = vstv %s483_s10 }
  0x16   : > { %s428_s12 = sadd.s32 %s1362_s9, %s1096_s11  ;;  %s1283_s11 = smov 127  }
  0x17   : > { %s1098_s13 = sshll.u32 %s428_s12, 2 }
  0x18   : > { %s430_s16 = scalar_lea.vmem %s1750_s0, %s1098_s13 }
  0x19   : > { %v487_v0 = vld [vmem:[%s430_s16] sm:$0xff]  ;;  %s437_s17 = scalar_select %p436_p10, %s1261_s24, 0 }
  0x1a   : > { %v488_v2 = vunpack.c.l.bf16 %v487_v0  ;;  %v489_v3 = vunpack.c.h.bf16 %v487_v0  ;;  %s455_s22 = scalar_select %p454_p13, %s1382_s20, 0 }
  0x1b   : > { %s1777_s17 = smov (!%p1099_p11, %s437_s17), 7  ;;  %s1285_s16 = smov 112  }
  0x1c   : > { %v1371_v4 = vmul.f32 %v490_v1, %v488_v2  ;;  %v1379_v5 = vmul.f32 %v490_v1, %v489_v3  ;;  %p442_p12 = scmp.lt.s32.totalorder %s1777_s17, 7  ;;  %s1781_s22 = smov (!%p1107_p0, %s455_s22), 7 }
  0x1d   : > { %p460_p1 = scmp.lt.s32.totalorder %s1781_s22, 7  ;;  %s1785_s24 = smov (!%p1099_p11, %s1261_s24), 7 }
  0x1e   : > { %539 = vrot.lane.b32.xlu1 %v1371_v4, %s1279_s18  ;;  %517 = vrot.lane.b32.xlu0 %v1371_v4, %s1280_s19  ;;  %s1779_s17 = smov (!%p442_p12, %s1777_s17), 7 }
  0x1f   : > { %s1104_s23 = sshll.u32 %s1779_s17, 1  ;;  %s1783_s22 = smov (!%p460_p1, %s1781_s22), 7 }
  0x20   : > { %s446_s8 = sadd.s32 %s1104_s23, %s1362_s9  ;;  %s1112_s17 = sshll.u32 %s1783_s22, 1 }
  0x21   : > { %s1106_s10 = sshll.u32 %s446_s8, 2  ;;  %s1286_s23 = smov 111  }
  0x22   : > { %541 = vrot.lane.b32.xlu1 %v1379_v5, %s1279_s18  ;;  %519 = vrot.lane.b32.xlu0 %v1379_v5, %s1280_s19  ;;  %s448_s14 = scalar_lea.vmem %s1751_s1, %s1106_s10  ;;  %s464_s8 = sadd.s32 %s1112_s17, %s1362_s9 }
  0x23   : > { %v1411_v6 = vld [vmem:[%s448_s14] sm:$0xff]  ;;  %s1114_s10 = sshll.u32 %s464_s8, 2 }
  0x24   : > { %v494_v7 = vunpack.c.l.bf16 %v1411_v6  ;;  %v495_v8 = vunpack.c.h.bf16 %v1411_v6  ;;  %s466_s13 = scalar_lea.vmem %s1752_s2, %s1114_s10 }
  0x25   : > { %s486_s14 = scalar_select %p485_p2, 1.0, 0.0  ;;  %v496_v10 = vld [vmem:[%s466_s13] sm:$0xff] }
  0x26   : > { %561 = vrot.lane.b32.xlu1 %v1379_v5, %s1281_s21  ;;  %559 = vrot.lane.b32.xlu0 %v1371_v4, %s1281_s21  ;;  %v1202_v9 = vpack.i.bf16 %v495_v8, %v494_v7  ;;  %v498_v11 = vunpack.c.h.bf16 %v496_v10  ;;  %v497_v12 = vunpack.c.l.bf16 %v496_v10 }
  0x27   : > { %v499_v13 = vstv %s486_s14 }
  0x28   : > { %v1440_v14 = vmul.f32 %v499_v13, %v498_v11  ;;  %v1442_v15 = vmul.f32 %v499_v13, %v497_v12 }
  0x2a   : > { %581 = vrot.lane.b32.xlu1 %v1379_v5, %s1282_s25  ;;  %579 = vrot.lane.b32.xlu0 %v1371_v4, %s1282_s25 }
  0x2e   : > { %601 = vrot.lane.b32.xlu1 %v1379_v5, %s1283_s11  ;;  %599 = vrot.lane.b32.xlu0 %v1371_v4, %s1283_s11 }
  0x32   : > { %621 = vrot.lane.b32.xlu1 %v1379_v5, %s1284_s15  ;;  %619 = vrot.lane.b32.xlu0 %v1371_v4, %s1284_s15 }
  0x36   : > { %641 = vrot.lane.b32.xlu1 %v1379_v5, %s1285_s16  ;;  %639 = vrot.lane.b32.xlu0 %v1371_v4, %s1285_s16 }
  0x3a   : > { %661 = vrot.lane.b32.xlu1 %v1379_v5, %s1286_s23  ;;  %659 = vrot.lane.b32.xlu0 %v1371_v4, %s1286_s23 }
  0x3e   : > { %1203 = vrot.lane.b32.xlu1 %v1202_v9, %s1279_s18  ;;  %1198 = vrot.lane.b32.xlu0 %v1202_v9, %s1280_s19 }
  0x42   : > { %1213 = vrot.lane.b32.xlu1 %v1202_v9, %s1282_s25  ;;  %1208 = vrot.lane.b32.xlu0 %v1202_v9, %s1281_s21 }
  0x46   : > { %1223 = vrot.lane.b32.xlu1 %v1202_v9, %s1284_s15  ;;  %1218 = vrot.lane.b32.xlu0 %v1202_v9, %s1283_s11 }
  0x4a   : > { %1233 = vrot.lane.b32.xlu1 %v1202_v9, %s1286_s23  ;;  %1228 = vrot.lane.b32.xlu0 %v1202_v9, %s1285_s16 }
  0x4e   : > { %745 = vrot.lane.b32.xlu1 %v1440_v14, %s1280_s19  ;;  %743 = vrot.lane.b32.xlu0 %v1442_v15, %s1280_s19 }
  0x52   : > { %753 = vrot.lane.b32.xlu1 %v1440_v14, %s1279_s18  ;;  %751 = vrot.lane.b32.xlu0 %v1442_v15, %s1279_s18 }
  0x56   : > { %761 = vrot.lane.b32.xlu1 %v1440_v14, %s1281_s21  ;;  %759 = vrot.lane.b32.xlu0 %v1442_v15, %s1281_s21 }
  0x5a   : > { %769 = vrot.lane.b32.xlu1 %v1440_v14, %s1282_s25  ;;  %767 = vrot.lane.b32.xlu0 %v1442_v15, %s1282_s25 }
  0x5e   : > { %777 = vrot.lane.b32.xlu1 %v1440_v14, %s1283_s11  ;;  %775 = vrot.lane.b32.xlu0 %v1442_v15, %s1283_s11 }
  0x62   : > { %785 = vrot.lane.b32.xlu1 %v1440_v14, %s1284_s15  ;;  %783 = vrot.lane.b32.xlu0 %v1442_v15, %s1284_s15  ;;  %s1115_s15 = sshll.u32 %s1785_s24, 1 }
  0x66   : > { %793 = vrot.lane.b32.xlu1 %v1440_v14, %s1285_s16  ;;  %791 = vrot.lane.b32.xlu0 %v1442_v15, %s1285_s16  ;;  %s478_s16 = sadd.s32 %s1115_s15, %s1362_s9 }
  0x67   : > { %s1117_s17 = sshll.u32 %s478_s16, 2 }
  0x68   : > { %s480_s10 = scalar_lea.vmem %s1757_s7, %s1117_s17 }
  0x6a   : > { %801 = vrot.lane.b32.xlu1 %v1440_v14, %s1286_s23  ;;  %799 = vrot.lane.b32.xlu0 %v1442_v15, %s1286_s23 }
  0x6e   : > { %901 = vperm.xlu0 %1237, %v898_v19   ;;  %909 = vperm.xlu1 %1238, %v906_v20   ;;  %v1122_v19 = vld [vmem:[%s1756_s6 + $0x6] ss:$8 sm:$0x3]  ;;  %v1123_v20 = vld [vmem:[%s1756_s6 + $0x7] ss:$8 sm:$0x3] }
  0x90   : > { %v540_v28 = vpop.permute.xlu1 %539  ;;  %v518_v29 = vpop.permute.xlu0 %517 }
  0x94   : > { %v542_v34 = vpop.permute.xlu1 %541  ;;  %v520_v35 = vpop.permute.xlu0 %519 }
  0x95   : > { %v544_v36 = vsel %vm543_vm1, %v540_v28, %v542_v34  ;;  %v545_v37 = vsel %vm543_vm1, %v542_v34, %v540_v28  ;;  %v524_v38 = vsel %vm523_vm2, %v518_v29, %v520_v35  ;;  %v525_v39 = vsel %vm523_vm2, %v520_v35, %v518_v29 }
  0x96   : > { %v557_v40 = vmul.f32 %v1504_v30, %v545_v37  ;;  %v537_v41 = vmul.f32 %v1507_v31, %v525_v39  ;;  %v538_v43 = vmul.f32 %v1510_v32, %v524_v38  ;;  %v558_v44 = vmul.f32 %v1513_v33, %v544_v36 }
  0x97   : > { %v1585_v28 = vrot.slane %v1122_v19, %v1491_v24  ;;  %v1588_v29 = vrot.slane %v1122_v19, %v1493_v25  ;;  %v1592_v34 = vrot.slane %v1123_v20, %v1491_v24  ;;  %v1595_v35 = vrot.slane %v1123_v20, %v1493_v25 }
  0x98   : > { %v562_v46 = vpop.permute.xlu1 %561  ;;  %v560_v47 = vpop.permute.xlu0 %559  ;;  %v808_v48 = vpack.c.bf16 %v558_v44, %v538_v43  ;;  %v807_v49 = vpack.c.bf16 %v557_v40, %v537_v41 }
  0x99   : > { %v564_v55 = vsel %vm563_vm3, %v560_v47, %v562_v46  ;;  %v565_v56 = vsel %vm563_vm3, %v562_v46, %v560_v47 }
  0x9a   : > { %857 = vmatprep.subr.bf16.mxu0 %v808_v48  ;;  %v577_v63 = vmul.f32 %v1535_v50, %v565_v56  ;;  %v578_v0 = vmul.f32 %v1538_v51, %v564_v55 }
  0x9b   : > { %858 = vmatpush1.bf16.msra.mxu0 %v807_v49  ;;  %v1614_v49 = vrot.slane %v1124_v45, %v1491_v24 }
  0x9c   : > { %v582_v57 = vpop.permute.xlu1 %581  ;;  %v580_v58 = vpop.permute.xlu0 %579 }
  0x9d   : > { %v584_v59 = vsel %vm583_vm4, %v580_v58, %v582_v57  ;;  %v585_v60 = vsel %vm583_vm4, %v582_v57, %v580_v58 }
  0x9e   : > { %v597_v1 = vmul.f32 %v1542_v52, %v585_v60  ;;  %v598_v2 = vmul.f32 %v1545_v53, %v584_v59 }
  0xa0   : > { %v602_v3 = vpop.permute.xlu1 %601  ;;  %v600_v9 = vpop.permute.xlu0 %599  ;;  %v810_v10 = vpack.c.bf16 %v598_v2, %v578_v0  ;;  %v809_v11 = vpack.c.bf16 %v597_v1, %v577_v63 }
  0xa1   : > { %v604_v12 = vsel %vm603_vm5, %v600_v9, %v602_v3  ;;  %v605_v13 = vsel %vm603_vm5, %v602_v3, %v600_v9 }
  0xa2   : > { %v617_v17 = vmul.f32 %v1560_v61, %v604_v12  ;;  %v618_v18 = vmul.f32 %v1563_v62, %v605_v13  ;;  %859 = vmatprep.subr.bf16.mxu0 %v810_v10 }
  0xa3   : > { %860 = vmatpush1.bf16.msra.mxu0 %v809_v11 }
  0xa4   : > { %v622_v21 = vpop.permute.xlu1 %621  ;;  %v620_v22 = vpop.permute.xlu0 %619  ;;  %v812_v26 = vpack.c.bf16 %v618_v18, %v1379_v5  ;;  %v811_v27 = vpack.c.bf16 %v617_v17, %v1371_v4 }
  0xa5   : > { %v624_v5 = vsel %vm623_vm6, %v620_v22, %v622_v21  ;;  %v625_v4 = vsel %vm623_vm6, %v622_v21, %v620_v22 }
  0xa6   : > { %861 = vmatprep.subr.bf16.mxu0 %v812_v26  ;;  %v637_v40 = vmul.f32 %v1585_v28, %v624_v5  ;;  %v638_v41 = vmul.f32 %v1588_v29, %v625_v4 }
  0xa7   : > { %862 = vmatpush1.bf16.msra.mxu0 %v811_v27 }
  0xa8   : > { %v642_v36 = vpop.permute.xlu1 %641  ;;  %v640_v37 = vpop.permute.xlu0 %639 }
  0xa9   : > { %v644_v38 = vsel %vm643_vm7, %v640_v37, %v642_v36  ;;  %v645_v39 = vsel %vm643_vm7, %v642_v36, %v640_v37 }
  0xaa   : > { %v657_v42 = vmul.f32 %v1592_v34, %v644_v38  ;;  %v658_v43 = vmul.f32 %v1595_v35, %v645_v39 }
  0xac   : > { %v662_v44 = vpop.permute.xlu1 %661  ;;  %v660_v46 = vpop.permute.xlu0 %659  ;;  %v814_v47 = vpack.c.bf16 %v658_v43, %v638_v41  ;;  %v813_v48 = vpack.c.bf16 %v657_v42, %v637_v40 }
  0xad   : > { %v664_v55 = vsel %vm663_vm8, %v660_v46, %v662_v44  ;;  %v665_v56 = vsel %vm663_vm8, %v662_v44, %v660_v46 }
  0xae   : > { %863 = vmatprep.subr.bf16.mxu0 %v814_v47  ;;  %v677_v1 = vmul.f32 %v1614_v49, %v664_v55  ;;  %v678_v3 = vmul.f32 %v1617_v54, %v665_v56 }
  0xaf   : > { %864 = vmatpush1.bf16.msra.mxu0 %v813_v48 }
  0xb0   : > { %v1204_v57 = vpop.permute.xlu1 %1203  ;;  %v1199_v58 = vpop.permute.xlu0 %1198 }
  0xb1   : > { %v1206_v59 = vunpack.i.h.bf16 %v1204_v57  ;;  %v1205_v60 = vunpack.i.l.bf16 %v1204_v57  ;;  %v1201_v63 = vunpack.i.h.bf16 %v1199_v58  ;;  %v1200_v0 = vunpack.i.l.bf16 %v1199_v58 }
  0xb3   : > { %v691_v24 = vsel %vm543_vm1, %v1205_v60, %v1206_v59  ;;  %v683_v25 = vsel %vm523_vm2, %v1200_v0, %v1201_v63  ;;  %v684_v2 = vsel %vm523_vm2, %v1201_v63, %v1200_v0  ;;  %v692_v9 = vsel %vm543_vm1, %v1206_v59, %v1205_v60 }
  0xb4   : > { %v1214_v10 = vpop.permute.xlu1 %1213  ;;  %v1209_v11 = vpop.permute.xlu0 %1208  ;;  %v686_v12 = vmul.f32 %v683_v25, %v1510_v32  ;;  %v685_v13 = vmul.f32 %v684_v2, %v1507_v31  ;;  %v694_v26 = vmul.f32 %v691_v24, %v1513_v33  ;;  %v693_v40 = vmul.f32 %v692_v9, %v1504_v30 }
  0xb5   : > { %v1216_v17 = vunpack.i.h.bf16 %v1214_v10  ;;  %v1215_v18 = vunpack.i.l.bf16 %v1214_v10  ;;  %v1211_v19 = vunpack.i.h.bf16 %v1209_v11  ;;  %v1210_v20 = vunpack.i.l.bf16 %v1209_v11 }
  0xb6   : > { %v816_v21 = vpack.c.bf16 %v686_v12, %v678_v3  ;;  %v815_v22 = vpack.c.bf16 %v685_v13, %v677_v1 }
  0xb7   : > { %v707_v27 = vsel %vm583_vm4, %v1215_v18, %v1216_v17  ;;  %v708_v5 = vsel %vm583_vm4, %v1216_v17, %v1215_v18  ;;  %v699_v4 = vsel %vm563_vm3, %v1210_v20, %v1211_v19  ;;  %v700_v36 = vsel %vm563_vm3, %v1211_v19, %v1210_v20 }
  0xb8   : > { %v1224_v37 = vpop.permute.xlu1 %1223  ;;  %v1219_v38 = vpop.permute.xlu0 %1218  ;;  %865 = vmatprep.subr.bf16.mxu0 %v816_v21  ;;  %v702_v39 = vmul.f32 %v699_v4, %v1538_v51  ;;  %v701_v41 = vmul.f32 %v700_v36, %v1535_v50  ;;  %v710_v42 = vmul.f32 %v707_v27, %v1545_v53  ;;  %v709_v55 = vmul.f32 %v708_v5, %v1542_v52 }
  0xb9   : > { %v1226_v43 = vunpack.i.h.bf16 %v1224_v37  ;;  %v1225_v44 = vunpack.i.l.bf16 %v1224_v37  ;;  %v1221_v45 = vunpack.i.h.bf16 %v1219_v38  ;;  %v1220_v46 = vunpack.i.l.bf16 %v1219_v38  ;;  %866 = vmatpush1.bf16.msra.mxu0 %v815_v22 }
  0xba   : > { %v818_v47 = vpack.c.bf16 %v702_v39, %v694_v26  ;;  %v817_v48 = vpack.c.bf16 %v701_v41, %v693_v40  ;;  %v820_v0 = vpack.c.bf16 %v495_v8, %v710_v42  ;;  %v819_v10 = vpack.c.bf16 %v494_v7, %v709_v55 }
  0xbb   : > { %v724_v56 = vsel %vm623_vm6, %v1226_v43, %v1225_v44  ;;  %v715_v57 = vsel %vm603_vm5, %v1220_v46, %v1221_v45  ;;  %v716_v58 = vsel %vm603_vm5, %v1221_v45, %v1220_v46  ;;  %v723_v59 = vsel %vm623_vm6, %v1225_v44, %v1226_v43 }
  0xbc   : > { %v1234_v60 = vpop.permute.xlu1 %1233  ;;  %v1229_v63 = vpop.permute.xlu0 %1228  ;;  %867 = vmatprep.subr.bf16.mxu0 %v818_v47  ;;  %v718_v1 = vmul.f32 %v716_v58, %v1563_v62  ;;  %v726_v24 = vmul.f32 %v724_v56, %v1588_v29  ;;  %v717_v11 = vmul.f32 %v715_v57, %v1560_v61  ;;  %v725_v17 = vmul.f32 %v723_v59, %v1585_v28 }
  0xbd   : > { %v1236_v25 = vunpack.i.h.bf16 %v1234_v60  ;;  %v1235_v2 = vunpack.i.l.bf16 %v1234_v60  ;;  %v1231_v3 = vunpack.i.h.bf16 %v1229_v63  ;;  %v1230_v9 = vunpack.i.l.bf16 %v1229_v63  ;;  %868 = vmatpush1.bf16.msra.mxu0 %v817_v48 }
  0xbe   : > { %869 = vmatprep.subr.bf16.mxu0 %v820_v0  ;;  %v822_v13 = vpack.c.bf16 %v726_v24, %v718_v1  ;;  %v821_v26 = vpack.c.bf16 %v725_v17, %v717_v11 }
  0xbf   : > { %v740_v12 = vsel %vm663_vm8, %v1236_v25, %v1235_v2  ;;  %v732_v8 = vsel %vm643_vm7, %v1231_v3, %v1230_v9  ;;  %v739_v18 = vsel %vm663_vm8, %v1235_v2, %v1236_v25  ;;  %v731_v19 = vsel %vm643_vm7, %v1230_v9, %v1231_v3 }
  0xc0   : > { %v746_v20 = vpop.permute.xlu1 %745  ;;  %v744_v6 = vpop.permute.xlu0 %743  ;;  %v734_v7 = vmul.f32 %v732_v8, %v1595_v35  ;;  %v742_v21 = vmul.f32 %v740_v12, %v1617_v54  ;;  %v733_v27 = vmul.f32 %v731_v19, %v1592_v34  ;;  %v741_v5 = vmul.f32 %v739_v18, %v1614_v49 }
  0xc1   : > { %870 = vmatpush1.bf16.msra.mxu0 %v819_v10  ;;  %v747_v22 = vsel %vm523_vm2, %v744_v6, %v746_v20  ;;  %v748_v40 = vsel %vm523_vm2, %v746_v20, %v744_v6 }
  0xc2   : > { %871 = vmatprep.subr.bf16.mxu0 %v822_v13  ;;  %v824_v37 = vpack.c.bf16 %v742_v21, %v734_v7  ;;  %v750_v41 = vmul.f32 %v747_v22, %v1510_v32  ;;  %v823_v44 = vpack.c.bf16 %v741_v5, %v733_v27  ;;  %v749_v48 = vmul.f32 %v748_v40, %v1507_v31 }
  0xc4   : > { %v754_v4 = vpop.permute.xlu1 %753  ;;  %v752_v36 = vpop.permute.xlu0 %751 }
  0xc5   : > { %v755_v38 = vsel %vm543_vm1, %v752_v36, %v754_v4  ;;  %v756_v39 = vsel %vm543_vm1, %v754_v4, %v752_v36  ;;  %872 = vmatpush1.bf16.msra.mxu0 %v821_v26 }
  0xc6   : > { %v758_v42 = vmul.f32 %v755_v38, %v1513_v33  ;;  %873 = vmatprep.subr.bf16.mxu0 %v824_v37  ;;  %v757_v43 = vmul.f32 %v756_v39, %v1504_v30 }
  0xc8   : > { %v762_v45 = vpop.permute.xlu1 %761  ;;  %v760_v46 = vpop.permute.xlu0 %759  ;;  %v826_v47 = vpack.c.bf16 %v758_v42, %v750_v41  ;;  %v825_v32 = vpack.c.bf16 %v757_v43, %v749_v48 }
  0xc9   : > { %874 = vmatpush1.bf16.msra.mxu0 %v823_v44  ;;  %v763_v55 = vsel %vm563_vm3, %v760_v46, %v762_v45  ;;  %v764_v56 = vsel %vm563_vm3, %v762_v45, %v760_v46 }
  0xca   : > { %875 = vmatprep.subr.bf16.mxu0 %v826_v47  ;;  %v765_v31 = vmul.f32 %v764_v56, %v1535_v50  ;;  %v766_v59 = vmul.f32 %v763_v55, %v1538_v51 }
  0xcc   : > { %v770_v57 = vpop.permute.xlu1 %769  ;;  %v768_v33 = vpop.permute.xlu0 %767 }
  0xcd   : > { %v771_v30 = vsel %vm583_vm4, %v768_v33, %v770_v57  ;;  %v772_v58 = vsel %vm583_vm4, %v770_v57, %v768_v33  ;;  %876 = vmatpush1.bf16.msra.mxu0 %v825_v32 }
  0xce   : > { %v773_v60 = vmul.f32 %v772_v58, %v1542_v52  ;;  %v774_v63 = vmul.f32 %v771_v30, %v1545_v53 }
  0xd0   : > { %v778_v0 = vpop.permute.xlu1 %777  ;;  %v776_v1 = vpop.permute.xlu0 %775  ;;  %v828_v24 = vpack.c.bf16 %v774_v63, %v766_v59  ;;  %v827_v25 = vpack.c.bf16 %v773_v60, %v765_v31 }
  0xd1   : > { %v779_v2 = vsel %vm603_vm5, %v776_v1, %v778_v0  ;;  %v780_v3 = vsel %vm603_vm5, %v778_v0, %v776_v1 }
  0xd2   : > { %v781_v9 = vmul.f32 %v779_v2, %v1560_v61  ;;  %v782_v50 = vmul.f32 %v780_v3, %v1563_v62  ;;  %877 = vmatprep.subr.bf16.mxu0 %v828_v24 }
  0xd3   : > { %878 = vmatpush1.bf16.msra.mxu0 %v827_v25 }
  0xd4   : > { %v786_v51 = vpop.permute.xlu1 %785  ;;  %v784_v52 = vpop.permute.xlu0 %783  ;;  %v830_v53 = vpack.c.bf16 %v782_v50, %v1440_v14  ;;  %v829_v10 = vpack.c.bf16 %v781_v9, %v1442_v15 }
  0xd5   : > { %v787_v11 = vsel %vm623_vm6, %v784_v52, %v786_v51  ;;  %v788_v12 = vsel %vm623_vm6, %v786_v51, %v784_v52 }
  0xd6   : > { %879 = vmatprep.subr.bf16.mxu0 %v830_v53  ;;  %v789_v14 = vmul.f32 %v787_v11, %v1585_v28  ;;  %v790_v15 = vmul.f32 %v788_v12, %v1588_v29 }
  0xd7   : > { %880 = vmatpush1.bf16.msra.mxu0 %v829_v10 }
  0xd8   : > { %v794_v8 = vpop.permute.xlu1 %793  ;;  %v792_v61 = vpop.permute.xlu0 %791 }
  0xd9   : > { %v795_v62 = vsel %vm643_vm7, %v792_v61, %v794_v8  ;;  %v796_v13 = vsel %vm643_vm7, %v794_v8, %v792_v61 }
  0xda   : > { %v797_v17 = vmul.f32 %v795_v62, %v1592_v34  ;;  %v798_v18 = vmul.f32 %v796_v13, %v1595_v35 }
  0xdc   : > { %v802_v19 = vpop.permute.xlu1 %801  ;;  %v800_v20 = vpop.permute.xlu0 %799  ;;  %v832_v6 = vpack.c.bf16 %v798_v18, %v790_v15  ;;  %v831_v7 = vpack.c.bf16 %v797_v17, %v789_v14 }
  0xdd   : > { %v803_v21 = vsel %vm663_vm8, %v800_v20, %v802_v19  ;;  %v804_v22 = vsel %vm663_vm8, %v802_v19, %v800_v20 }
  0xde   : > { %v805_v28 = vmul.f32 %v803_v21, %v1614_v49  ;;  %v806_v29 = vmul.f32 %v804_v22, %v1617_v54  ;;  %881 = vmatprep.subr.bf16.mxu0 %v832_v6 }
  0xdf   : > { %882 = vmatpush1.bf16.msra.mxu0 %v831_v7 }
  0xe0   : > { %v833_v34 = vpack.c.bf16 %v805_v28, %v805_v28  ;;  %v834_v35 = vpack.c.bf16 %v806_v29, %v806_v29 }
  0xe2   : > { %1126 = vmatprep.subr.msk.bf16.mxu0 %vm850_vm9, %v834_v35  ;;  %v852_v26 = vsel %vm850_vm9, %v833_v34, 0 }
  0xe3   : > { %884 = vmatpush1.bf16.msra.mxu0 %v852_v26 }
  0xe6   : > { %890 = vmatmul.mubr.bf16.vlgmr.msra.gmra.mrb[0].mxu0 %v1471_v16 }
  0xed   : > { %v902_v23 = vpop.permute.xlu0 %901  ;;  %v910_v5 = vpop.permute.xlu1 %909 }
 0x1b9   : > { %v891_v27 = vpop.f32.mrb[0].mxu0 }
 0x1ba   : > { %v904_v49 = vmul.f32 %v902_v23, %v891_v27  ;;  %v893_v4 = vpop.f32.mrb[1].mxu0 }
 0x1bb   : > { %v905_v54 = vmul.f32 %v902_v23, %v893_v4  ;;  %v895_v36 = vpop.f32.mrb[2].mxu0 }
 0x1bc   : > { %v912_v37 = vadd.f32 %v910_v5, %v904_v49  ;;  %v896_v38 = vpop.f32.mrb[3].mxu0 }
 0x1bd   : > { %v913_v39 = vadd.f32 %v910_v5, %v905_v54 }
 0x1bf   : > { %v916_v16 = vcombine.low %v912_v37, %v913_v39 }
 0x1c1   : > { %918 = vst [vmem:[%s480_s10] sm:$0xff] %v916_v16 }
 0x1c2 PF: > { %s17_s28 = sadd.s32 1, %s1277_s28   ;;  %s1758_s24 = smov %s1269_s26 }
 0x1c3   : > { %p14_p3 = scmp.ge.s32.totalorder %s17_s28, 18   ;;  %s1759_s25 = smov %s1273_s27 }
 0x1c4   : > { %s1760_s26 = smov %s1763_s29  ;;  %s1761_s27 = smov %s1767_s30 }
 0x1c5   :  { %16 = sbr.rel (!%p14_p3) target bundleno = 3 (0x3), region = 91 }

// kernel: segmentation_head_forward.10
= control target key start
LH: loop header
LB: loop body
LE: loop exit
PB: predicated region body
PF: predicated region fallthrough
CT: control target
= control target key end

     0   :  { %s1430_s27 = smov 0   ;;  %s1432_s28 = smov 0   ;;  %s1856_s0 = inlined_call_operand.vmem [shape: bf16[2,8,8,256], index: 0, kind: input, shape index: {}, may-alias: {0,1,2}]   ;;  %s1857_s1 = inlined_call_operand.vmem [shape: bf16[2,8,8,256], index: 1, kind: input, shape index: {}, may-alias: {0,1,2}]   ;;  %s1858_s2 = inlined_call_operand.vmem [shape: bf16[2,8,8,256], index: 2, kind: input, shape index: {}, may-alias: {0,1,2}]   ;;  %s1859_s3 = inlined_call_operand.vmem [shape: bf16[8,216], index: 3, kind: input, shape index: {}]   ;;  %s1860_s4 = inlined_call_operand.vmem [shape: f32[8,1], index: 4, kind: input, shape index: {}]   ;;  %s1861_s5 = inlined_call_operand.vmem [shape: f32[8,1], index: 5, kind: input, shape index: {}]   ;;  %s1862_s6 = inlined_call_operand.vmem [shape: f32[9,256], index: 6, kind: input, shape index: {}]   ;;  %s1863_s7 = inlined_call_operand.vmem [shape: bf16[2,8,8,256], index: 7, kind: input, shape index: {}]   ;;  %s1864_s8 = inlined_call_operand.vmem [shape: bf16[2,8,8,256], index: 8, kind: output, shape index: {}]  }
   0x1   :  { %s1434_s29 = smov 0   ;;  %s1436_s30 = smov 0  }
   0x2   :  { %s1438_s9 = smov 0  }
   0x3 LB: > { %s27_s10 = sadd.s32 1, %s1366_s29  ;;  %s30_s11 = sadd.s32 1, %s1370_s30  ;;  %s1374_s9 = sphi %s1438_s9, %s18_s9   ;;  %s1370_s30 = sphi %s1436_s30, %s1871_s30   ;;  %s1366_s29 = sphi %s1434_s29, %s1870_s29   ;;  %s1362_s28 = sphi %s1432_s28, %s1869_s28   ;;  %s1358_s27 = sphi %s1430_s27, %s1868_s27  }
   0x4   : > { %p28_p0 = scmp.ge.s32.totalorder %s27_s10, 8  ;;  %p1179_p1 = scmp.ge.s32.totalorder %s1374_s9, 1 }
   0x5   : > { %p386_p2 = scmp.lt.s32.totalorder %s1374_s9, 17 }
   0x6   : > { %s1873_s10 = smov (%p28_p0, %s27_s10), 0  ;;  %s1875_s11 = smov (!%p28_p0, %s30_s11), %s1370_s30 }
   0x7   : > { %p387_p3 = pnand %p1179_p1, %p386_p2  ;;  %p32_p4 = scmp.ge.s32.totalorder %s1875_s11, 2 }
   0x8   : > { %s469_s12 = sadd.s32 (!%p387_p3), 4294967294, %s1358_s27  ;;  %p474_p5 = scmp.lt.s32.totalorder (!%p387_p3), %s1362_s28, 1  ;;  %v1573_v16 = vld [vmem:[%s1859_s3] sm:$0xff] (!%p387_p3)  ;;  %vm903_vm0 = vcmask (!%p387_p3), 719872   ;;  %v1384_v18 = vmov (!%p387_p3), 0   ;;  %v582_v21 = vlaneseq (!%p387_p3)  ;;  %vm907_vm9 = vcmask (!%p387_p3), 1043456  }
   0x9   : > { %s1877_s11 = smov (%p32_p4, %s1875_s11), 0  ;;  %390 = sbr.rel (%p387_p3) target bundleno = 454 (0x1c6), region = 52 }
   0xa   : > { %p470_p6 = scmp.gt.s32.totalorder (!%p387_p3), %s469_s12, 0  ;;  %p1180_p7 = scmp.lt.s32.totalorder (!%p387_p3), %s469_s12, 7  ;;  %v1218_v17 = vcombine.high (!%p387_p3), %v1573_v16, %v1573_v16  ;;  %1332 = vset.pattern.permute.xlu0 (!%p387_p3), %v1384_v18  ;;  %1333 = vset.pattern.permute.xlu1 (!%p387_p3), %v1384_v18  ;;  %v955_v19 = vld [vmem:[%s1860_s4] sm:$0xff] (!%p387_p3)  ;;  %v589_v22 = vshrl.u32 (!%p387_p3), %v582_v21, 7  ;;  %v1591_v23 = vand.u32 (!%p387_p3), 127, %v582_v21 }
   0xb   : > { %p543_p8 = scmp.ge.s32.totalorder (!%p387_p3), %s1358_s27, 2  ;;  %p488_p10 = scmp.gt.s32.totalorder (!%p387_p3), %s1358_s27, 0  ;;  %v963_v20 = vld [vmem:[%s1861_s5] sm:$0xff] (!%p387_p3) }
   0xc   : > { %p1188_p11 = scmp.lt.s32.totalorder (!%p387_p3), %s1358_s27, 7  ;;  %s1376_s22 = smov (!%p387_p3), 32   ;;  %1220 = vmatprep.mubr.msk.bf16.mxu0 (!%p387_p3), %vm903_vm0, %v1218_v17  ;;  %v1593_v24 = vsub.s32 (!%p387_p3), 0, %v589_v22  ;;  %v1595_v25 = vsub.s32 (!%p387_p3), 1, %v589_v22  ;;  %vm604_vm1 = vcmp.lt.s32.totalorder (!%p387_p3), %v1591_v23, 32  ;;  %vm584_vm2 = vcmp.lt.s32.totalorder (!%p387_p3), %v1591_v23, 34 }
   0xd   : > { %s1377_s23 = smov (!%p387_p3), 34   ;;  %s1484_s24 = sadd.s32 (!%p387_p3), 2, %s1358_s27  ;;  %v1210_v26 = vld [vmem:[%s1862_s6 + $0x1] ss:$8 sm:$0x3] (!%p387_p3)  ;;  %vm624_vm3 = vcmp.lt.s32.totalorder (!%p387_p3), %v1591_v23, 30 }
   0xe   : > { %p506_p13 = scmp.gt.s32.totalorder (!%p387_p3), %s1484_s24, 0  ;;  %s1378_s25 = smov (!%p387_p3), 30   ;;  %v563_v27 = vld [vmem:[%s1862_s6] ss:$8 sm:$0x3] (!%p387_p3)  ;;  %v1606_v30 = vrot.slane (!%p387_p3), %v1210_v26, %v1593_v24  ;;  %v1615_v33 = vrot.slane (!%p387_p3), %v1210_v26, %v1595_v25  ;;  %vm644_vm4 = vcmp.lt.s32.totalorder (!%p387_p3), %v1591_v23, 2 }
   0xf   : > { %p1196_p0 = scmp.lt.s32.totalorder (!%p387_p3), %s1484_s24, 7  ;;  %p546_p2 = scmp.lt.s32.totalorder (!%p387_p3), %s1484_s24, 8  ;;  %v1609_v31 = vrot.slane (!%p387_p3), %v563_v27, %v1593_v24  ;;  %v1612_v32 = vrot.slane (!%p387_p3), %v563_v27, %v1595_v25  ;;  %v1211_v42 = vld [vmem:[%s1862_s6 + $0x2] ss:$8 sm:$0x3] (!%p387_p3)  ;;  %vm664_vm5 = vcmp.lt.s32.totalorder (!%p387_p3), %v1591_v23, 126 }
  0x10   : > { %s1879_s12 = smov (!%p470_p6, %s469_s12), 0  ;;  %s1881_s28 = smov (!%p474_p5, %s1362_s28), 1  ;;  %v1212_v45 = vld [vmem:[%s1862_s6 + $0x3] ss:$8 sm:$0x3]  ;;  %v1637_v50 = vrot.slane %v1211_v42, %v1593_v24  ;;  %v1640_v51 = vrot.slane %v1211_v42, %v1595_v25  ;;  %vm684_vm6 = vcmp.lt.s32.totalorder %v1591_v23, 98 }
  0x11   : > { %s1883_s12 = smov (!%p1180_p7, %s1879_s12), 7  ;;  %s1464_s13 = sshll.u32 %s1881_s28, 4  ;;  %v1644_v52 = vrot.slane %v1212_v45, %v1593_v24  ;;  %v1647_v53 = vrot.slane %v1212_v45, %v1595_v25  ;;  %v1213_v54 = vld [vmem:[%s1862_s6 + $0x5] ss:$8 sm:$0x3]  ;;  %vm704_vm7 = vcmp.lt.s32.totalorder %v1591_v23, 96 }
  0x12   : > { %p476_p9 = scmp.lt.s32.totalorder %s1883_s12, 7  ;;  %v1662_v61 = vrot.slane %v1213_v54, %v1593_v24  ;;  %v1665_v62 = vrot.slane %v1213_v54, %v1595_v25  ;;  %v1216_v45 = vld [vmem:[%s1862_s6 + $0x10] ss:$8 sm:$0x3]  ;;  %vm724_vm8 = vcmp.lt.s32.totalorder %v1591_v23, 94 }
  0x13   : > { %s544_s14 = scalar_select %p543_p8, 1.0, 0.0  ;;  %v1719_v54 = vrot.slane %v1216_v45, %v1595_v25 }
  0x14   : > { %s1885_s12 = smov (!%p476_p9, %s1883_s12), 7 }
  0x15   : > { %s1185_s15 = sshll.u32 %s1885_s12, 1  ;;  %v551_v1 = vstv %s544_s14  ;;  %s1379_s12 = smov 2  }
  0x16   : > { %s480_s16 = sadd.s32 %s1464_s13, %s1185_s15 }
  0x17   : > { %s1187_s17 = sshll.u32 %s480_s16, 2  ;;  %s1380_s16 = smov 126  }
  0x18   : > { %s482_s20 = scalar_lea.vmem %s1856_s0, %s1187_s17 }
  0x19   : > { %v548_v0 = vld [vmem:[%s482_s20] sm:$0xff]  ;;  %s489_s21 = scalar_select %p488_p10, %s1358_s27, 0 }
  0x1a   : > { %v549_v2 = vunpack.c.l.bf16 %v548_v0  ;;  %v550_v3 = vunpack.c.h.bf16 %v548_v0  ;;  %s507_s26 = scalar_select %p506_p13, %s1484_s24, 0 }
  0x1b   : > { %s1887_s21 = smov (!%p1188_p11, %s489_s21), 7  ;;  %s1381_s20 = smov 98  }
  0x1c   : > { %v1473_v4 = vmul.f32 %v551_v1, %v549_v2  ;;  %v1481_v5 = vmul.f32 %v551_v1, %v550_v3  ;;  %p494_p12 = scmp.lt.s32.totalorder %s1887_s21, 7  ;;  %s1891_s26 = smov (!%p1196_p0, %s507_s26), 7 }
  0x1d   : > { %p512_p1 = scmp.lt.s32.totalorder %s1891_s26, 7  ;;  %s1867_s24 = smov 96  }
  0x1e   : > { %600 = vrot.lane.b32.xlu1 %v1473_v4, %s1376_s22  ;;  %578 = vrot.lane.b32.xlu0 %v1473_v4, %s1377_s23  ;;  %s1889_s21 = smov (!%p494_p12, %s1887_s21), 7  ;;  %s1895_s27 = smov (!%p1188_p11, %s1358_s27), 7 }
  0x1f   : > { %s1193_s28 = sshll.u32 %s1889_s21, 1  ;;  %s1893_s26 = smov (!%p512_p1, %s1891_s26), 7 }
  0x20   : > { %s498_s14 = sadd.s32 %s1193_s28, %s1464_s13  ;;  %s1865_s21 = smov 96  }
  0x21   : > { %s1195_s15 = sshll.u32 %s498_s14, 2  ;;  %s1201_s28 = sshll.u32 %s1893_s26, 1 }
  0x22   : > { %602 = vrot.lane.b32.xlu1 %v1481_v5, %s1376_s22  ;;  %580 = vrot.lane.b32.xlu0 %v1481_v5, %s1377_s23  ;;  %s500_s19 = scalar_lea.vmem %s1857_s1, %s1195_s15  ;;  %s1383_s14 = smov 94  }
  0x23   : > { %v1513_v6 = vld [vmem:[%s500_s19] sm:$0xff]  ;;  %s516_s15 = sadd.s32 %s1201_s28, %s1464_s13  ;;  %s1204_s28 = sshll.u32 %s1895_s27, 1 }
  0x24   : > { %v555_v7 = vunpack.c.l.bf16 %v1513_v6  ;;  %v556_v8 = vunpack.c.h.bf16 %v1513_v6  ;;  %s1203_s17 = sshll.u32 %s516_s15, 2 }
  0x25   : > { %s518_s19 = scalar_lea.vmem %s1858_s2, %s1203_s17 }
  0x26   : > { %622 = vrot.lane.b32.xlu1 %v1481_v5, %s1378_s25  ;;  %620 = vrot.lane.b32.xlu0 %v1473_v4, %s1378_s25  ;;  %v1297_v9 = vpack.i.bf16 %v556_v8, %v555_v7  ;;  %v557_v10 = vld [vmem:[%s518_s19] sm:$0xff] }
  0x27   : > { %v559_v11 = vunpack.c.h.bf16 %v557_v10  ;;  %v558_v12 = vunpack.c.l.bf16 %v557_v10 }
  0x2a   : > { %642 = vrot.lane.b32.xlu1 %v1481_v5, %s1379_s12  ;;  %640 = vrot.lane.b32.xlu0 %v1473_v4, %s1379_s12 }
  0x2e   : > { %662 = vrot.lane.b32.xlu1 %v1481_v5, %s1380_s16  ;;  %660 = vrot.lane.b32.xlu0 %v1473_v4, %s1380_s16 }
  0x32   : > { %682 = vrot.lane.b32.xlu1 %v1481_v5, %s1381_s20  ;;  %680 = vrot.lane.b32.xlu0 %v1473_v4, %s1381_s20 }
  0x36   : > { %702 = vrot.lane.b32.xlu1 %v1481_v5, %s1865_s21  ;;  %700 = vrot.lane.b32.xlu0 %v1473_v4, %s1865_s21  ;;  %s547_s21 = scalar_select %p546_p2, 1.0, 0.0 }
  0x38   : > { %v560_v13 = vstv %s547_s21 }
  0x39   : > { %v1542_v14 = vmul.f32 %v560_v13, %v559_v11  ;;  %v1544_v15 = vmul.f32 %v560_v13, %v558_v12 }
  0x3a   : > { %722 = vrot.lane.b32.xlu1 %v1481_v5, %s1383_s14  ;;  %720 = vrot.lane.b32.xlu0 %v1473_v4, %s1383_s14 }
  0x3e   : > { %1298 = vrot.lane.b32.xlu1 %v1297_v9, %s1376_s22  ;;  %1293 = vrot.lane.b32.xlu0 %v1297_v9, %s1377_s23 }
  0x42   : > { %1308 = vrot.lane.b32.xlu1 %v1297_v9, %s1379_s12  ;;  %1303 = vrot.lane.b32.xlu0 %v1297_v9, %s1378_s25 }
  0x46   : > { %1318 = vrot.lane.b32.xlu1 %v1297_v9, %s1381_s20  ;;  %1313 = vrot.lane.b32.xlu0 %v1297_v9, %s1380_s16 }
  0x4a   : > { %1328 = vrot.lane.b32.xlu1 %v1297_v9, %s1383_s14  ;;  %1323 = vrot.lane.b32.xlu0 %v1297_v9, %s1867_s24 }
  0x4e   : > { %806 = vrot.lane.b32.xlu1 %v1542_v14, %s1377_s23  ;;  %804 = vrot.lane.b32.xlu0 %v1544_v15, %s1377_s23 }
  0x52   : > { %814 = vrot.lane.b32.xlu1 %v1542_v14, %s1376_s22  ;;  %812 = vrot.lane.b32.xlu0 %v1544_v15, %s1376_s22 }
  0x56   : > { %822 = vrot.lane.b32.xlu1 %v1542_v14, %s1378_s25  ;;  %820 = vrot.lane.b32.xlu0 %v1544_v15, %s1378_s25 }
  0x5a   : > { %830 = vrot.lane.b32.xlu1 %v1542_v14, %s1379_s12  ;;  %828 = vrot.lane.b32.xlu0 %v1544_v15, %s1379_s12 }
  0x5e   : > { %838 = vrot.lane.b32.xlu1 %v1542_v14, %s1380_s16  ;;  %836 = vrot.lane.b32.xlu0 %v1544_v15, %s1380_s16 }
  0x62   : > { %846 = vrot.lane.b32.xlu1 %v1542_v14, %s1381_s20  ;;  %844 = vrot.lane.b32.xlu0 %v1544_v15, %s1381_s20 }
  0x66   : > { %854 = vrot.lane.b32.xlu1 %v1542_v14, %s1867_s24  ;;  %852 = vrot.lane.b32.xlu0 %v1544_v15, %s1867_s24 }
  0x6a   : > { %862 = vrot.lane.b32.xlu1 %v1542_v14, %s1383_s14  ;;  %860 = vrot.lane.b32.xlu0 %v1544_v15, %s1383_s14  ;;  %s530_s14 = sadd.s32 %s1204_s28, %s1464_s13 }
  0x6b   : > { %s1206_s15 = sshll.u32 %s530_s14, 2 }
  0x6c   : > { %s532_s18 = scalar_lea.vmem %s1863_s7, %s1206_s15  ;;  %s541_s19 = scalar_lea.vmem %s1864_s8, %s1206_s15 }
  0x6e   : > { %958 = vperm.xlu0 %1332, %v955_v19   ;;  %966 = vperm.xlu1 %1333, %v963_v20   ;;  %v1214_v19 = vld [vmem:[%s1862_s6 + $0x6] ss:$8 sm:$0x3]  ;;  %v1215_v20 = vld [vmem:[%s1862_s6 + $0x7] ss:$8 sm:$0x3] }
  0x90   : > { %v601_v28 = vpop.permute.xlu1 %600  ;;  %v579_v29 = vpop.permute.xlu0 %578 }
  0x94   : > { %v603_v34 = vpop.permute.xlu1 %602  ;;  %v581_v35 = vpop.permute.xlu0 %580 }
  0x95   : > { %v605_v36 = vsel %vm604_vm1, %v601_v28, %v603_v34  ;;  %v606_v37 = vsel %vm604_vm1, %v603_v34, %v601_v28  ;;  %v585_v38 = vsel %vm584_vm2, %v579_v29, %v581_v35  ;;  %v586_v39 = vsel %vm584_vm2, %v581_v35, %v579_v29 }
  0x96   : > { %v618_v40 = vmul.f32 %v1606_v30, %v606_v37  ;;  %v598_v41 = vmul.f32 %v1609_v31, %v586_v39  ;;  %v599_v43 = vmul.f32 %v1612_v32, %v585_v38  ;;  %v619_v44 = vmul.f32 %v1615_v33, %v605_v36 }
  0x97   : > { %v1687_v28 = vrot.slane %v1214_v19, %v1593_v24  ;;  %v1690_v29 = vrot.slane %v1214_v19, %v1595_v25  ;;  %v1694_v34 = vrot.slane %v1215_v20, %v1593_v24  ;;  %v1697_v35 = vrot.slane %v1215_v20, %v1595_v25 }
  0x98   : > { %v623_v46 = vpop.permute.xlu1 %622  ;;  %v621_v47 = vpop.permute.xlu0 %620  ;;  %v869_v48 = vpack.c.bf16 %v619_v44, %v599_v43  ;;  %v868_v49 = vpack.c.bf16 %v618_v40, %v598_v41 }
  0x99   : > { %v625_v55 = vsel %vm624_vm3, %v621_v47, %v623_v46  ;;  %v626_v56 = vsel %vm624_vm3, %v623_v46, %v621_v47 }
  0x9a   : > { %914 = vmatprep.subr.bf16.mxu0 %v869_v48  ;;  %v638_v63 = vmul.f32 %v1637_v50, %v626_v56  ;;  %v639_v0 = vmul.f32 %v1640_v51, %v625_v55 }
  0x9b   : > { %915 = vmatpush1.bf16.msra.mxu0 %v868_v49  ;;  %v1716_v49 = vrot.slane %v1216_v45, %v1593_v24 }
  0x9c   : > { %v643_v57 = vpop.permute.xlu1 %642  ;;  %v641_v58 = vpop.permute.xlu0 %640 }
  0x9d   : > { %v645_v59 = vsel %vm644_vm4, %v641_v58, %v643_v57  ;;  %v646_v60 = vsel %vm644_vm4, %v643_v57, %v641_v58 }
  0x9e   : > { %v658_v1 = vmul.f32 %v1644_v52, %v646_v60  ;;  %v659_v2 = vmul.f32 %v1647_v53, %v645_v59 }
  0xa0   : > { %v663_v3 = vpop.permute.xlu1 %662  ;;  %v661_v9 = vpop.permute.xlu0 %660  ;;  %v871_v10 = vpack.c.bf16 %v659_v2, %v639_v0  ;;  %v870_v11 = vpack.c.bf16 %v658_v1, %v638_v63 }
  0xa1   : > { %v665_v12 = vsel %vm664_vm5, %v661_v9, %v663_v3  ;;  %v666_v13 = vsel %vm664_vm5, %v663_v3, %v661_v9 }
  0xa2   : > { %v678_v17 = vmul.f32 %v1662_v61, %v665_v12  ;;  %v679_v18 = vmul.f32 %v1665_v62, %v666_v13  ;;  %916 = vmatprep.subr.bf16.mxu0 %v871_v10 }
  0xa3   : > { %917 = vmatpush1.bf16.msra.mxu0 %v870_v11 }
  0xa4   : > { %v683_v21 = vpop.permute.xlu1 %682  ;;  %v681_v22 = vpop.permute.xlu0 %680  ;;  %v873_v26 = vpack.c.bf16 %v679_v18, %v1481_v5  ;;  %v872_v27 = vpack.c.bf16 %v678_v17, %v1473_v4 }
  0xa5   : > { %v685_v5 = vsel %vm684_vm6, %v681_v22, %v683_v21  ;;  %v686_v4 = vsel %vm684_vm6, %v683_v21, %v681_v22 }
  0xa6   : > { %918 = vmatprep.subr.bf16.mxu0 %v873_v26  ;;  %v698_v40 = vmul.f32 %v1687_v28, %v685_v5  ;;  %v699_v41 = vmul.f32 %v1690_v29, %v686_v4 }
  0xa7   : > { %919 = vmatpush1.bf16.msra.mxu0 %v872_v27 }
  0xa8   : > { %v703_v36 = vpop.permute.xlu1 %702  ;;  %v701_v37 = vpop.permute.xlu0 %700 }
  0xa9   : > { %v705_v38 = vsel %vm704_vm7, %v701_v37, %v703_v36  ;;  %v706_v39 = vsel %vm704_vm7, %v703_v36, %v701_v37 }
  0xaa   : > { %v718_v42 = vmul.f32 %v1694_v34, %v705_v38  ;;  %v719_v43 = vmul.f32 %v1697_v35, %v706_v39 }
  0xac   : > { %v723_v44 = vpop.permute.xlu1 %722  ;;  %v721_v46 = vpop.permute.xlu0 %720  ;;  %v875_v47 = vpack.c.bf16 %v719_v43, %v699_v41  ;;  %v874_v48 = vpack.c.bf16 %v718_v42, %v698_v40 }
  0xad   : > { %v725_v55 = vsel %vm724_vm8, %v721_v46, %v723_v44  ;;  %v726_v56 = vsel %vm724_vm8, %v723_v44, %v721_v46 }
  0xae   : > { %920 = vmatprep.subr.bf16.mxu0 %v875_v47  ;;  %v738_v1 = vmul.f32 %v1716_v49, %v725_v55  ;;  %v739_v3 = vmul.f32 %v1719_v54, %v726_v56 }
  0xaf   : > { %921 = vmatpush1.bf16.msra.mxu0 %v874_v48 }
  0xb0   : > { %v1299_v57 = vpop.permute.xlu1 %1298  ;;  %v1294_v58 = vpop.permute.xlu0 %1293 }
  0xb1   : > { %v1301_v59 = vunpack.i.h.bf16 %v1299_v57  ;;  %v1300_v60 = vunpack.i.l.bf16 %v1299_v57  ;;  %v1296_v63 = vunpack.i.h.bf16 %v1294_v58  ;;  %v1295_v0 = vunpack.i.l.bf16 %v1294_v58 }
  0xb3   : > { %v752_v24 = vsel %vm604_vm1, %v1300_v60, %v1301_v59  ;;  %v744_v25 = vsel %vm584_vm2, %v1295_v0, %v1296_v63  ;;  %v745_v2 = vsel %vm584_vm2, %v1296_v63, %v1295_v0  ;;  %v753_v9 = vsel %vm604_vm1, %v1301_v59, %v1300_v60 }
  0xb4   : > { %v1309_v10 = vpop.permute.xlu1 %1308  ;;  %v1304_v11 = vpop.permute.xlu0 %1303  ;;  %v747_v12 = vmul.f32 %v744_v25, %v1612_v32  ;;  %v746_v13 = vmul.f32 %v745_v2, %v1609_v31  ;;  %v755_v26 = vmul.f32 %v752_v24, %v1615_v33  ;;  %v754_v40 = vmul.f32 %v753_v9, %v1606_v30 }
  0xb5   : > { %v1311_v17 = vunpack.i.h.bf16 %v1309_v10  ;;  %v1310_v18 = vunpack.i.l.bf16 %v1309_v10  ;;  %v1306_v19 = vunpack.i.h.bf16 %v1304_v11  ;;  %v1305_v20 = vunpack.i.l.bf16 %v1304_v11 }
  0xb6   : > { %v877_v21 = vpack.c.bf16 %v747_v12, %v739_v3  ;;  %v876_v22 = vpack.c.bf16 %v746_v13, %v738_v1 }
  0xb7   : > { %v768_v27 = vsel %vm644_vm4, %v1310_v18, %v1311_v17  ;;  %v769_v5 = vsel %vm644_vm4, %v1311_v17, %v1310_v18  ;;  %v760_v4 = vsel %vm624_vm3, %v1305_v20, %v1306_v19  ;;  %v761_v36 = vsel %vm624_vm3, %v1306_v19, %v1305_v20 }
  0xb8   : > { %v1319_v37 = vpop.permute.xlu1 %1318  ;;  %v1314_v38 = vpop.permute.xlu0 %1313  ;;  %922 = vmatprep.subr.bf16.mxu0 %v877_v21  ;;  %v763_v39 = vmul.f32 %v760_v4, %v1640_v51  ;;  %v762_v41 = vmul.f32 %v761_v36, %v1637_v50  ;;  %v771_v42 = vmul.f32 %v768_v27, %v1647_v53  ;;  %v770_v55 = vmul.f32 %v769_v5, %v1644_v52 }
  0xb9   : > { %v1321_v43 = vunpack.i.h.bf16 %v1319_v37  ;;  %v1320_v44 = vunpack.i.l.bf16 %v1319_v37  ;;  %v1316_v45 = vunpack.i.h.bf16 %v1314_v38  ;;  %v1315_v46 = vunpack.i.l.bf16 %v1314_v38  ;;  %923 = vmatpush1.bf16.msra.mxu0 %v876_v22 }
  0xba   : > { %v879_v47 = vpack.c.bf16 %v763_v39, %v755_v26  ;;  %v878_v48 = vpack.c.bf16 %v762_v41, %v754_v40  ;;  %v881_v0 = vpack.c.bf16 %v556_v8, %v771_v42  ;;  %v880_v10 = vpack.c.bf16 %v555_v7, %v770_v55 }
  0xbb   : > { %v785_v56 = vsel %vm684_vm6, %v1321_v43, %v1320_v44  ;;  %v776_v57 = vsel %vm664_vm5, %v1315_v46, %v1316_v45  ;;  %v777_v58 = vsel %vm664_vm5, %v1316_v45, %v1315_v46  ;;  %v784_v59 = vsel %vm684_vm6, %v1320_v44, %v1321_v43 }
  0xbc   : > { %v1329_v60 = vpop.permute.xlu1 %1328  ;;  %v1324_v63 = vpop.permute.xlu0 %1323  ;;  %924 = vmatprep.subr.bf16.mxu0 %v879_v47  ;;  %v779_v1 = vmul.f32 %v777_v58, %v1665_v62  ;;  %v787_v24 = vmul.f32 %v785_v56, %v1690_v29  ;;  %v778_v11 = vmul.f32 %v776_v57, %v1662_v61  ;;  %v786_v17 = vmul.f32 %v784_v59, %v1687_v28 }
  0xbd   : > { %v1331_v25 = vunpack.i.h.bf16 %v1329_v60  ;;  %v1330_v2 = vunpack.i.l.bf16 %v1329_v60  ;;  %v1326_v3 = vunpack.i.h.bf16 %v1324_v63  ;;  %v1325_v9 = vunpack.i.l.bf16 %v1324_v63  ;;  %925 = vmatpush1.bf16.msra.mxu0 %v878_v48 }
  0xbe   : > { %926 = vmatprep.subr.bf16.mxu0 %v881_v0  ;;  %v883_v13 = vpack.c.bf16 %v787_v24, %v779_v1  ;;  %v882_v26 = vpack.c.bf16 %v786_v17, %v778_v11 }
  0xbf   : > { %v801_v12 = vsel %vm724_vm8, %v1331_v25, %v1330_v2  ;;  %v793_v8 = vsel %vm704_vm7, %v1326_v3, %v1325_v9  ;;  %v800_v18 = vsel %vm724_vm8, %v1330_v2, %v1331_v25  ;;  %v792_v19 = vsel %vm704_vm7, %v1325_v9, %v1326_v3 }
  0xc0   : > { %v807_v20 = vpop.permute.xlu1 %806  ;;  %v805_v6 = vpop.permute.xlu0 %804  ;;  %v795_v7 = vmul.f32 %v793_v8, %v1697_v35  ;;  %v803_v21 = vmul.f32 %v801_v12, %v1719_v54  ;;  %v794_v27 = vmul.f32 %v792_v19, %v1694_v34  ;;  %v802_v5 = vmul.f32 %v800_v18, %v1716_v49 }
  0xc1   : > { %927 = vmatpush1.bf16.msra.mxu0 %v880_v10  ;;  %v808_v22 = vsel %vm584_vm2, %v805_v6, %v807_v20  ;;  %v809_v40 = vsel %vm584_vm2, %v807_v20, %v805_v6 }
  0xc2   : > { %928 = vmatprep.subr.bf16.mxu0 %v883_v13  ;;  %v885_v37 = vpack.c.bf16 %v803_v21, %v795_v7  ;;  %v811_v41 = vmul.f32 %v808_v22, %v1612_v32  ;;  %v884_v44 = vpack.c.bf16 %v802_v5, %v794_v27  ;;  %v810_v48 = vmul.f32 %v809_v40, %v1609_v31 }
  0xc3   : > { %v1217_v27 = vcombine.low %v1573_v16, %v1573_v16 }
  0xc4   : > { %v815_v4 = vpop.permute.xlu1 %814  ;;  %v813_v36 = vpop.permute.xlu0 %812 }
  0xc5   : > { %v816_v38 = vsel %vm604_vm1, %v813_v36, %v815_v4  ;;  %v817_v39 = vsel %vm604_vm1, %v815_v4, %v813_v36  ;;  %929 = vmatpush1.bf16.msra.mxu0 %v882_v26 }
  0xc6   : > { %v819_v42 = vmul.f32 %v816_v38, %v1615_v33  ;;  %930 = vmatprep.subr.bf16.mxu0 %v885_v37  ;;  %v818_v43 = vmul.f32 %v817_v39, %v1606_v30 }
  0xc8   : > { %v823_v45 = vpop.permute.xlu1 %822  ;;  %v821_v46 = vpop.permute.xlu0 %820  ;;  %v887_v47 = vpack.c.bf16 %v819_v42, %v811_v41  ;;  %v886_v32 = vpack.c.bf16 %v818_v43, %v810_v48 }
  0xc9   : > { %931 = vmatpush1.bf16.msra.mxu0 %v884_v44  ;;  %v824_v55 = vsel %vm624_vm3, %v821_v46, %v823_v45  ;;  %v825_v56 = vsel %vm624_vm3, %v823_v45, %v821_v46 }
  0xca   : > { %932 = vmatprep.subr.bf16.mxu0 %v887_v47  ;;  %v826_v31 = vmul.f32 %v825_v56, %v1637_v50  ;;  %v827_v59 = vmul.f32 %v824_v55, %v1640_v51 }
  0xcc   : > { %v831_v57 = vpop.permute.xlu1 %830  ;;  %v829_v33 = vpop.permute.xlu0 %828 }
  0xcd   : > { %v832_v30 = vsel %vm644_vm4, %v829_v33, %v831_v57  ;;  %v833_v58 = vsel %vm644_vm4, %v831_v57, %v829_v33  ;;  %933 = vmatpush1.bf16.msra.mxu0 %v886_v32 }
  0xce   : > { %v834_v60 = vmul.f32 %v833_v58, %v1644_v52  ;;  %v835_v63 = vmul.f32 %v832_v30, %v1647_v53 }
  0xd0   : > { %v839_v0 = vpop.permute.xlu1 %838  ;;  %v837_v1 = vpop.permute.xlu0 %836  ;;  %v889_v24 = vpack.c.bf16 %v835_v63, %v827_v59  ;;  %v888_v25 = vpack.c.bf16 %v834_v60, %v826_v31 }
  0xd1   : > { %v840_v2 = vsel %vm664_vm5, %v837_v1, %v839_v0  ;;  %v841_v3 = vsel %vm664_vm5, %v839_v0, %v837_v1 }
  0xd2   : > { %v842_v9 = vmul.f32 %v840_v2, %v1662_v61  ;;  %v843_v50 = vmul.f32 %v841_v3, %v1665_v62  ;;  %934 = vmatprep.subr.bf16.mxu0 %v889_v24 }
  0xd3   : > { %935 = vmatpush1.bf16.msra.mxu0 %v888_v25 }
  0xd4   : > { %v847_v51 = vpop.permute.xlu1 %846  ;;  %v845_v52 = vpop.permute.xlu0 %844  ;;  %v891_v53 = vpack.c.bf16 %v843_v50, %v1542_v14  ;;  %v890_v10 = vpack.c.bf16 %v842_v9, %v1544_v15 }
  0xd5   : > { %v848_v11 = vsel %vm684_vm6, %v845_v52, %v847_v51  ;;  %v849_v12 = vsel %vm684_vm6, %v847_v51, %v845_v52 }
  0xd6   : > { %936 = vmatprep.subr.bf16.mxu0 %v891_v53  ;;  %v850_v14 = vmul.f32 %v848_v11, %v1687_v28  ;;  %v851_v15 = vmul.f32 %v849_v12, %v1690_v29 }
  0xd7   : > { %937 = vmatpush1.bf16.msra.mxu0 %v890_v10 }
  0xd8   : > { %v855_v8 = vpop.permute.xlu1 %854  ;;  %v853_v61 = vpop.permute.xlu0 %852 }
  0xd9   : > { %v856_v62 = vsel %vm704_vm7, %v853_v61, %v855_v8  ;;  %v857_v13 = vsel %vm704_vm7, %v855_v8, %v853_v61 }
  0xda   : > { %v858_v17 = vmul.f32 %v856_v62, %v1694_v34  ;;  %v859_v18 = vmul.f32 %v857_v13, %v1697_v35 }
  0xdc   : > { %v863_v19 = vpop.permute.xlu1 %862  ;;  %v861_v20 = vpop.permute.xlu0 %860  ;;  %v893_v6 = vpack.c.bf16 %v859_v18, %v851_v15  ;;  %v892_v7 = vpack.c.bf16 %v858_v17, %v850_v14 }
  0xdd   : > { %v864_v21 = vsel %vm724_vm8, %v861_v20, %v863_v19  ;;  %v865_v22 = vsel %vm724_vm8, %v863_v19, %v861_v20 }
  0xde   : > { %v866_v28 = vmul.f32 %v864_v21, %v1716_v49  ;;  %v867_v29 = vmul.f32 %v865_v22, %v1719_v54  ;;  %938 = vmatprep.subr.bf16.mxu0 %v893_v6  ;;  %v971_v49 = vld [vmem:[%s532_s18] sm:$0xff] }
  0xdf   : > { %939 = vmatpush1.bf16.msra.mxu0 %v892_v7  ;;  %v972_v37 = vunpack.c.l.bf16 %v971_v49  ;;  %v973_v16 = vunpack.c.h.bf16 %v971_v49 }
  0xe0   : > { %v894_v34 = vpack.c.bf16 %v866_v28, %v866_v28  ;;  %v895_v35 = vpack.c.bf16 %v867_v29, %v867_v29 }
  0xe2   : > { %1219 = vmatprep.subr.msk.bf16.mxu0 %vm907_vm9, %v895_v35  ;;  %v909_v26 = vsel %vm907_vm9, %v894_v34, 0 }
  0xe3   : > { %941 = vmatpush1.bf16.msra.mxu0 %v909_v26 }
  0xe6   : > { %947 = vmatmul.mubr.bf16.vlgmr.msra.gmra.mrb[0].mxu0 %v1217_v27 }
  0xed   : > { %v959_v23 = vpop.permute.xlu0 %958  ;;  %v967_v5 = vpop.permute.xlu1 %966 }
 0x1b9   : > { %v948_v54 = vpop.f32.mrb[0].mxu0 }
 0x1ba   : > { %v961_v4 = vmul.f32 %v959_v23, %v948_v54  ;;  %v950_v36 = vpop.f32.mrb[1].mxu0 }
 0x1bb   : > { %v962_v38 = vmul.f32 %v959_v23, %v950_v36  ;;  %v952_v39 = vpop.f32.mrb[2].mxu0 }
 0x1bc   : > { %v969_v40 = vadd.f32 %v967_v5, %v961_v4  ;;  %v953_v41 = vpop.f32.mrb[3].mxu0 }
 0x1bd   : > { %v970_v42 = vadd.f32 %v967_v5, %v962_v38 }
 0x1be   : > { %v974_v43 = vadd.f32 %v972_v37, %v969_v40 }
 0x1bf   : > { %v975_v44 = vadd.f32 %v973_v16, %v970_v42 }
 0x1c0   : > { %v976_v45 = vmax.f32 %v974_v43, 0.0 }
 0x1c1   : > { %v977_v46 = vmax.f32 %v975_v44, 0.0 }
 0x1c3   : > { %v1242_v47 = vpack.c.bf16 %v977_v46, %v976_v45 }
 0x1c5   : > { %986 = vst [vmem:[%s541_s19] sm:$0xff] %v1242_v47 }
 0x1c6 PF: > { %s18_s9 = sadd.s32 1, %s1374_s9   ;;  %s1868_s27 = smov %s1366_s29 }
 0x1c7   : > { %p15_p3 = scmp.ge.s32.totalorder %s18_s9, 18   ;;  %s1869_s28 = smov %s1370_s30 }
 0x1c8   : > { %s1870_s29 = smov %s1873_s10  ;;  %s1871_s30 = smov %s1877_s11 }
 0x1c9   :  { %17 = sbr.rel (!%p15_p3) target bundleno = 3 (0x3), region = 98 }

</bundles_post_ra>
